<compile_context>
chip_gen: v7x
topology: tpu7x:2x2x1
jax: 0.10.0
libtpu: 0.0.40
codegen_flags: <defaults>
</compile_context>

<pallas_src>
import functools

import jax
import jax.numpy as jnp
from jax.experimental import pallas as pl
from jax.experimental.pallas import tpu as pltpu

FEATURE_SIZE = 49
HIDDEN_SIZE = 100
HIDDEN_PAD = 128                 # H padded to one full lane group
GATE_PAD = 4 * HIDDEN_PAD        # 512: each gate lane-aligned
N_LAYERS = 5
PROJ_SIZE = 1
DENSE_SIZE = 64
RESULT_NUM = 1
SEQ_LEN = 8                      # MLP input is 8 + 2 + 1
LOC_DIM = 2


def _sigmoid(x):
    # Exact identity sigmoid(x) = 0.5 * tanh(0.5 * x) + 0.5 -> guaranteed single EUP
    # push per vreg (vs a possible exp + reciprocal pair for jax.nn.sigmoid).
    return 0.5 * jnp.tanh(0.5 * x) + 0.5


def taxi_lstm_kernel(feat_ref, loc_ref, time_ref,
                     w_ih0_ref, w_ih_rest_ref, w_hh_ref, bias_ref, w_hr_ref,
                     w1_ref, b1_ref, w2_ref, b2_ref,
                     out_ref):
    T, tb, F = feat_ref.shape        # (T, tileB, F), tb is a multiple of 8
    HP = HIDDEN_PAD

    # ---- hoisted layer-0 input projection: single MXU matmul over all timesteps ----
    feat2d = feat_ref[...].reshape(T * tb, F)            # merge leading dims (tb % 8 == 0)
    gi0 = jnp.dot(feat2d, w_ih0_ref[...],
                  preferred_element_type=jnp.float32)    # (T*tb, 4*HP)
    gi0 = gi0 + bias_ref[0][None, :]

    w1 = w1_ref[...]                                     # (11, DENSE)
    mlp_acc = jnp.zeros((tb, DENSE_SIZE), jnp.float32)

    last = N_LAYERS - 1
    h_cols = None                                        # per-t (tb,1) outputs of prev layer
    for layer in range(N_LAYERS):
        # hoist per-layer broadcasts out of the t-loop (JAX does not CSE broadcast_in_dim)
        w_hh_row = w_hh_ref[layer][None, :]              # (1, 4*HP)
        w_hr_row = w_hr_ref[layer][None, :]              # (1, HP)   zero in padded lanes
        if layer > 0:
            w_ih_row = w_ih_rest_ref[layer - 1][None, :] # (1, 4*HP) this layer's input weight
            bias_row = bias_ref[layer][None, :]          # (1, 4*HP)
        h = jnp.zeros((tb, PROJ_SIZE), jnp.float32)
        c = jnp.zeros((tb, HP), jnp.float32)
        next_cols = []
        for t in range(T):
            if layer == 0:
                # contiguous sublane slice of the hoisted matmul output (t*tb % 8 == 0)
                gates = gi0[t * tb:(t + 1) * tb, :]
            else:
                # inline gate construction from the carried (tb,1) column -- no slab
                gates = h_cols[t] * w_ih_row + bias_row
            if t > 0:                                    # h_0 = 0: skip dead term at t == 0
                gates = gates + h * w_hh_row
            i_g = _sigmoid(gates[:, 0 * HP:1 * HP])      # lane-aligned gate slices
            f_g = _sigmoid(gates[:, 1 * HP:2 * HP])
            g_g = jnp.tanh(gates[:, 2 * HP:3 * HP])
            o_g = _sigmoid(gates[:, 3 * HP:4 * HP])
            c = i_g * g_g if t == 0 else f_g * c + i_g * g_g
            h_full = o_g * jnp.tanh(c)                   # padded lanes stay exactly 0
            h = jnp.sum(h_full * w_hr_row, axis=1,
                        keepdims=True)                   # (tb, 1) rank-1 projection
            if layer < last:
                next_cols.append(h)                      # carry only the tiny h column
            else:
                # final layer: fold rnn column t straight into the MLP (no concat)
                mlp_acc = mlp_acc + h * w1[t][None, :]
        h_cols = next_cols

    # MLP on cat([rnn, locations, times]) expressed as partial mat-vecs.
    loc = loc_ref[...]                                   # (tb, 2)
    tim = time_ref[...]                                  # (tb, 1)
    h1 = mlp_acc
    h1 = h1 + loc[:, 0:1] * w1[SEQ_LEN][None, :]
    h1 = h1 + loc[:, 1:2] * w1[SEQ_LEN + 1][None, :]
    h1 = h1 + tim * w1[SEQ_LEN + 2][None, :]
    h1 = h1 + b1_ref[...]
    h1 = jnp.maximum(h1, 0.0)                            # ReLU
    out = jnp.sum(h1 * w2_ref[...], axis=1, keepdims=True) + b2_ref[...]
    out_ref[...] = out


def _round_up(x, m):
    return ((x + m - 1) // m) * m


def pad_params(p):
    """Scatter each gate's H=100 columns into a lane-aligned 128-wide block (zeros elsewhere)."""
    def pad_gates(a):
        parts = []
        for g in range(4):
            blk = a[..., g * HIDDEN_SIZE:(g + 1) * HIDDEN_SIZE]
            pad = [(0, 0)] * (a.ndim - 1) + [(0, HIDDEN_PAD - HIDDEN_SIZE)]
            parts.append(jnp.pad(blk, pad))
        return jnp.concatenate(parts, axis=-1)

    return dict(
        w_ih0=pad_gates(p["w_ih0"]),                     # (49, 512)
        w_ih_rest=pad_gates(p["w_ih_rest"]),             # (4, 512)
        w_hh=pad_gates(p["w_hh"]),                       # (5, 512)
        bias=pad_gates(p["bias"]),                       # (5, 512)  padded gate lanes -> bias 0
        w_hr=jnp.pad(p["w_hr"],
                     ((0, 0), (0, HIDDEN_PAD - HIDDEN_SIZE))),   # (5, 128) zeros in pad lanes
        w1=p["w1"], b1=p["b1"], w2=p["w2"], b2=p["b2"],
    )


@functools.partial(jax.jit, static_argnames=("tile_b",))
def taxi_lstm_forward(features, locations, times, params, tile_b=256):
    B, T, F = features.shape
    pp = pad_params(params)

    # Batch tile: multiple of 8 (sublane-aligned slices/reshape), batch zero-padded to a
    # multiple of the tile; padded rows are computed and discarded (rows are independent).
    # Cap the tile at half of the padded batch so the grid has >= 2 "parallel" steps when
    # possible (keeps the second TensorCore busy on v7x; negligible cost on v5e/v6e).
    tb = _round_up(tile_b, 8)
    b8 = _round_up(B, 8)
    half = _round_up(max(b8 // 2, 8), 8)
    tb = max(8, min(tb, b8, half))
    Bp = _round_up(B, tb)
    pad_b = Bp - B

    feat = jnp.pad(features.astype(jnp.float32), ((0, pad_b), (0, 0), (0, 0)))
    feat = jnp.transpose(feat, (1, 0, 2))                # (T, Bp, F): per-t rows contiguous
    loc = jnp.pad(locations.astype(jnp.float32), ((0, pad_b), (0, 0)))
    tim = jnp.pad(times.reshape(B, 1).astype(jnp.float32), ((0, pad_b), (0, 0)))

    def param_spec(arr):
        # full-array block, constant index map -> fetched once, stays resident across grid
        return pl.BlockSpec(arr.shape, lambda i: (0, 0))

    param_order = ("w_ih0", "w_ih_rest", "w_hh", "bias", "w_hr", "w1", "b1", "w2", "b2")
    param_vals = [pp[k] for k in param_order]

    out = pl.pallas_call(
        taxi_lstm_kernel,
        out_shape=jax.ShapeDtypeStruct((Bp, RESULT_NUM), jnp.float32),
        grid=(Bp // tb,),
        in_specs=[pl.BlockSpec((T, tb, F), lambda i: (0, i, 0)),
                  pl.BlockSpec((tb, LOC_DIM), lambda i: (i, 0)),
                  pl.BlockSpec((tb, 1), lambda i: (i, 0))]
                 + [param_spec(v) for v in param_vals],
        out_specs=pl.BlockSpec((tb, RESULT_NUM), lambda i: (i, 0)),
        compiler_params=pltpu.CompilerParams(
            dimension_semantics=("parallel",),          # batch tiles split across TCs (v7x)
            vmem_limit_bytes=32 * 1024 * 1024),         # fits v5e/v6e/v7x scoped limits
    )(feat, loc, tim, *param_vals)
    return out[:B]


def init_params(key):
    """Deterministic PyTorch-style init (U(-k, k)) for all parameters (logical/unpadded)."""
    k_lstm = 1.0 / (HIDDEN_SIZE ** 0.5)
    keys = list(jax.random.split(key, 5 * N_LAYERS + 4))
    kit = iter(keys)

    def u(kk, shape, bound):
        return jax.random.uniform(kk, shape, jnp.float32, -bound, bound)

    w_ih0 = None
    w_ih_rest = jnp.zeros((N_LAYERS - 1, 4 * HIDDEN_SIZE), jnp.float32)
    w_hh = jnp.zeros((N_LAYERS, 4 * HIDDEN_SIZE), jnp.float32)
    bias = jnp.zeros((N_LAYERS, 4 * HIDDEN_SIZE), jnp.float32)
    w_hr = jnp.zeros((N_LAYERS, HIDDEN_SIZE), jnp.float32)
    for layer in range(N_LAYERS):
        if layer == 0:
            # torch weight_ih_l0 is (4H, F); store transposed (F, 4H) for the kernel matmul.
            w_ih0 = u(next(kit), (4 * HIDDEN_SIZE, FEATURE_SIZE), k_lstm).T
        else:
            # torch weight_ih_lk is (4H, 1); store its single column as a row.
            w_ih_rest = w_ih_rest.at[layer - 1].set(
                u(next(kit), (4 * HIDDEN_SIZE,), k_lstm))
        w_hh = w_hh.at[layer].set(u(next(kit), (4 * HIDDEN_SIZE,), k_lstm))
        b_ih = u(next(kit), (4 * HIDDEN_SIZE,), k_lstm)
        b_hh = u(next(kit), (4 * HIDDEN_SIZE,), k_lstm)
        bias = bias.at[layer].set(b_ih + b_hh)
        w_hr = w_hr.at[layer].set(u(next(kit), (HIDDEN_SIZE,), k_lstm))

    mlp_in = SEQ_LEN + LOC_DIM + 1
    k1 = 1.0 / (mlp_in ** 0.5)
    k2 = 1.0 / (DENSE_SIZE ** 0.5)
    kk = jax.random.split(next(kit), 4)
    w1 = u(kk[0], (DENSE_SIZE, mlp_in), k1).T          # stored (11, 64)
    b1 = u(kk[1], (1, DENSE_SIZE), k1)
    w2 = u(kk[2], (RESULT_NUM, DENSE_SIZE), k2)        # stored (1, 64) (torch layout)
    b2 = u(kk[3], (1, RESULT_NUM), k2)
    return dict(w_ih0=w_ih0, w_ih_rest=w_ih_rest, w_hh=w_hh, bias=bias, w_hr=w_hr,
                w1=w1, b1=b1, w2=w2, b2=b2)


def reference_forward(features, locations, times, params):
    """Pure-JAX reference reproducing nn.LSTM(proj_size=1) + MLP semantics."""
    B, T, F = features.shape
    H = HIDDEN_SIZE
    x_seq = features.astype(jnp.float32)               # (B, T, in_dim)
    for layer in range(N_LAYERS):
        if layer == 0:
            w_ih_t = params["w_ih0"]                    # (F, 4H)
        else:
            w_ih_t = params["w_ih_rest"][layer - 1].reshape(1, 4 * H)
        w_hh_t = params["w_hh"][layer].reshape(1, 4 * H)
        b = params["bias"][layer]
        w_hr_t = params["w_hr"][layer].reshape(H, 1)
        h = jnp.zeros((B, PROJ_SIZE), jnp.float32)
        c = jnp.zeros((B, H), jnp.float32)
        outs = []
        for t in range(T):
            x_t = x_seq[:, t, :]
            gates = x_t @ w_ih_t + h @ w_hh_t + b[None, :]
            i_g = jax.nn.sigmoid(gates[:, :H])
            f_g = jax.nn.sigmoid(gates[:, H:2 * H])
            g_g = jnp.tanh(gates[:, 2 * H:3 * H])
            o_g = jax.nn.sigmoid(gates[:, 3 * H:])
            c = f_g * c + i_g * g_g
            h = (o_g * jnp.tanh(c)) @ w_hr_t            # (B, 1)
            outs.append(h)
        x_seq = jnp.stack(outs, axis=1)                 # (B, T, 1)
    rnn = x_seq[:, :, 0]                                # squeeze -> (B, T)
    cat = jnp.concatenate([rnn, locations, times.reshape(B, 1)], axis=1)  # (B, 11)
    h1 = jnp.maximum(cat @ params["w1"] + params["b1"], 0.0)
    return h1 @ params["w2"].T + params["b2"]


if __name__ == "__main__":
    key = jax.random.PRNGKey(0)
    kp, kf, kl, kt = jax.random.split(key, 4)
    params = init_params(kp)

    B = 2
    features = jax.random.normal(kf, (B, SEQ_LEN, FEATURE_SIZE), jnp.float32)
    locations = jax.random.normal(kl, (B, LOC_DIM), jnp.float32)
    times = jax.random.normal(kt, (B,), jnp.float32)

    out = taxi_lstm_forward(features, locations, times, params)
    out = jax.block_until_ready(out)

    ref = reference_forward(features, locations, times, params)
    assert out.shape == (B, RESULT_NUM)
    assert jnp.allclose(out, ref, atol=1e-4, rtol=1e-4), (out, ref)
    print("KERNEL_OK")
</pallas_src>

<mosaic_0001>
module attributes {stable_mosaic.version = 11 : i64} {
  func.func @taxi_lstm_kernel(%arg0: i32, %arg1: memref<8x8x49xf32, #tpu.memory_space<vmem>>, %arg2: memref<8x2xf32, #tpu.memory_space<vmem>>, %arg3: memref<8x1xf32, #tpu.memory_space<vmem>>, %arg4: memref<49x512xf32, #tpu.memory_space<vmem>>, %arg5: memref<4x512xf32, #tpu.memory_space<vmem>>, %arg6: memref<5x512xf32, #tpu.memory_space<vmem>>, %arg7: memref<5x512xf32, #tpu.memory_space<vmem>>, %arg8: memref<5x128xf32, #tpu.memory_space<vmem>>, %arg9: memref<11x64xf32, #tpu.memory_space<vmem>>, %arg10: memref<1x64xf32, #tpu.memory_space<vmem>>, %arg11: memref<1x64xf32, #tpu.memory_space<vmem>>, %arg12: memref<1x1xf32, #tpu.memory_space<vmem>>, %arg13: memref<8x1xf32, #tpu.memory_space<vmem>>) attributes {dimension_semantics = [#tpu.dimension_semantics<parallel>], iteration_bounds = array<i64: 1>, scalar_prefetch = 0 : i64, scratch_operands = 0 : i64, tpu.core_type = #tpu.core_type<tc>, window_params = [{transform_indices = @transform_0, window_bounds = array<i64: 8, 8, 49>}, {transform_indices = @transform_1, window_bounds = array<i64: 8, 2>}, {transform_indices = @transform_2, window_bounds = array<i64: 8, 1>}, {pipeline_mode = #tpu.pipeline_mode<synchronous>, transform_indices = @transform_3, window_bounds = array<i64: 49, 512>}, {pipeline_mode = #tpu.pipeline_mode<synchronous>, transform_indices = @transform_4, window_bounds = array<i64: 4, 512>}, {pipeline_mode = #tpu.pipeline_mode<synchronous>, transform_indices = @transform_5, window_bounds = array<i64: 5, 512>}, {pipeline_mode = #tpu.pipeline_mode<synchronous>, transform_indices = @transform_6, window_bounds = array<i64: 5, 512>}, {pipeline_mode = #tpu.pipeline_mode<synchronous>, transform_indices = @transform_7, window_bounds = array<i64: 5, 128>}, {pipeline_mode = #tpu.pipeline_mode<synchronous>, transform_indices = @transform_8, window_bounds = array<i64: 11, 64>}, {pipeline_mode = #tpu.pipeline_mode<synchronous>, transform_indices = @transform_9, window_bounds = array<i64: 1, 64>}, {pipeline_mode = #tpu.pipeline_mode<synchronous>, transform_indices = @transform_10, window_bounds = array<i64: 1, 64>}, {pipeline_mode = #tpu.pipeline_mode<synchronous>, transform_indices = @transform_11, window_bounds = array<i64: 1, 1>}, {transform_indices = @transform_12, window_bounds = array<i64: 8, 1>}]} {
    %c0 = arith.constant 0 : index
    %c0_0 = arith.constant 0 : index
    %c0_1 = arith.constant 0 : index
    %0 = vector.load %arg1[%c0, %c0_0, %c0_1] : memref<8x8x49xf32, #tpu.memory_space<vmem>>, vector<8x8x49xf32>
    %1 = vector.shape_cast %0 : vector<8x8x49xf32> to vector<64x49xf32>
    %c0_2 = arith.constant 0 : index
    %c0_3 = arith.constant 0 : index
    %2 = vector.load %arg4[%c0_2, %c0_3] : memref<49x512xf32, #tpu.memory_space<vmem>>, vector<49x512xf32>
    %cst = arith.constant dense<0.000000e+00> : vector<64x512xf32>
    %3 = tpu.matmul %1, %2, %cst {dimension_numbers = #tpu.dot_dimension_numbers<[1], [0], [0], [1], [0, 0, 1, 1], [], []>} : vector<64x49xf32>, vector<49x512xf32>, vector<64x512xf32> -> vector<64x512xf32>
    %c0_4 = arith.constant 0 : index
    %c0_5 = arith.constant 0 : index
    %4 = vector.load %arg7[%c0_4, %c0_5] : memref<5x512xf32, #tpu.memory_space<vmem>>, vector<1x512xf32>
    %5 = vector.shape_cast %4 : vector<1x512xf32> to vector<512xf32>
    %6 = vector.shape_cast %5 : vector<512xf32> to vector<1x512xf32>
    %7 = vector.broadcast %6 : vector<1x512xf32> to vector<64x512xf32>
    %8 = arith.addf %3, %7 : vector<64x512xf32>
    %c0_6 = arith.constant 0 : index
    %c0_7 = arith.constant 0 : index
    %9 = vector.load %arg9[%c0_6, %c0_7] : memref<11x64xf32, #tpu.memory_space<vmem>>, vector<11x64xf32>
    %cst_8 = arith.constant 0.000000e+00 : f32
    %10 = vector.broadcast %cst_8 : f32 to vector<8x64xf32>
    %c0_9 = arith.constant 0 : index
    %c0_10 = arith.constant 0 : index
    %11 = vector.load %arg6[%c0_9, %c0_10] : memref<5x512xf32, #tpu.memory_space<vmem>>, vector<1x512xf32>
    %12 = vector.shape_cast %11 : vector<1x512xf32> to vector<512xf32>
    %13 = vector.shape_cast %12 : vector<512xf32> to vector<1x512xf32>
    %c0_11 = arith.constant 0 : index
    %c0_12 = arith.constant 0 : index
    %14 = vector.load %arg8[%c0_11, %c0_12] : memref<5x128xf32, #tpu.memory_space<vmem>>, vector<1x128xf32>
    %15 = vector.shape_cast %14 : vector<1x128xf32> to vector<128xf32>
    %16 = vector.shape_cast %15 : vector<128xf32> to vector<1x128xf32>
    %17 = vector.extract_strided_slice %8 {offsets = [0, 0], sizes = [8, 512], strides = [1, 1]} : vector<64x512xf32> to vector<8x512xf32>
    %18 = vector.extract_strided_slice %17 {offsets = [0, 0], sizes = [8, 128], strides = [1, 1]} : vector<8x512xf32> to vector<8x128xf32>
    %cst_13 = arith.constant 5.000000e-01 : f32
    %19 = vector.broadcast %cst_13 : f32 to vector<8x128xf32>
    %20 = arith.mulf %19, %18 : vector<8x128xf32>
    %21 = math.tanh %20 : vector<8x128xf32>
    %cst_14 = arith.constant 5.000000e-01 : f32
    %22 = vector.broadcast %cst_14 : f32 to vector<8x128xf32>
    %23 = arith.mulf %22, %21 : vector<8x128xf32>
    %cst_15 = arith.constant 5.000000e-01 : f32
    %24 = vector.broadcast %cst_15 : f32 to vector<8x128xf32>
    %25 = arith.addf %23, %24 : vector<8x128xf32>
    %26 = vector.extract_strided_slice %17 {offsets = [0, 256], sizes = [8, 128], strides = [1, 1]} : vector<8x512xf32> to vector<8x128xf32>
    %27 = math.tanh %26 : vector<8x128xf32>
    %28 = vector.extract_strided_slice %17 {offsets = [0, 384], sizes = [8, 128], strides = [1, 1]} : vector<8x512xf32> to vector<8x128xf32>
    %cst_16 = arith.constant 5.000000e-01 : f32
    %29 = vector.broadcast %cst_16 : f32 to vector<8x128xf32>
    %30 = arith.mulf %29, %28 : vector<8x128xf32>
    %31 = math.tanh %30 : vector<8x128xf32>
    %cst_17 = arith.constant 5.000000e-01 : f32
    %32 = vector.broadcast %cst_17 : f32 to vector<8x128xf32>
    %33 = arith.mulf %32, %31 : vector<8x128xf32>
    %cst_18 = arith.constant 5.000000e-01 : f32
    %34 = vector.broadcast %cst_18 : f32 to vector<8x128xf32>
    %35 = arith.addf %33, %34 : vector<8x128xf32>
    %36 = arith.mulf %25, %27 : vector<8x128xf32>
    %37 = math.tanh %36 : vector<8x128xf32>
    %38 = arith.mulf %35, %37 : vector<8x128xf32>
    %39 = vector.broadcast %16 : vector<1x128xf32> to vector<8x128xf32>
    %40 = arith.mulf %38, %39 : vector<8x128xf32>
    %cst_19 = arith.constant dense<0.000000e+00> : vector<8xf32>
    %41 = vector.multi_reduction <add>, %40, %cst_19 [1] : vector<8x128xf32> to vector<8xf32>
    %42 = vector.shape_cast %41 : vector<8xf32> to vector<8x1xf32>
    %43 = vector.extract_strided_slice %8 {offsets = [8, 0], sizes = [8, 512], strides = [1, 1]} : vector<64x512xf32> to vector<8x512xf32>
    %44 = vector.broadcast %42 : vector<8x1xf32> to vector<8x512xf32>
    %45 = vector.broadcast %13 : vector<1x512xf32> to vector<8x512xf32>
    %46 = arith.mulf %44, %45 : vector<8x512xf32>
    %47 = arith.addf %43, %46 : vector<8x512xf32>
    %48 = vector.extract_strided_slice %47 {offsets = [0, 0], sizes = [8, 128], strides = [1, 1]} : vector<8x512xf32> to vector<8x128xf32>
    %cst_20 = arith.constant 5.000000e-01 : f32
    %49 = vector.broadcast %cst_20 : f32 to vector<8x128xf32>
    %50 = arith.mulf %49, %48 : vector<8x128xf32>
    %51 = math.tanh %50 : vector<8x128xf32>
    %cst_21 = arith.constant 5.000000e-01 : f32
    %52 = vector.broadcast %cst_21 : f32 to vector<8x128xf32>
    %53 = arith.mulf %52, %51 : vector<8x128xf32>
    %cst_22 = arith.constant 5.000000e-01 : f32
    %54 = vector.broadcast %cst_22 : f32 to vector<8x128xf32>
    %55 = arith.addf %53, %54 : vector<8x128xf32>
    %56 = vector.extract_strided_slice %47 {offsets = [0, 128], sizes = [8, 128], strides = [1, 1]} : vector<8x512xf32> to vector<8x128xf32>
    %cst_23 = arith.constant 5.000000e-01 : f32
    %57 = vector.broadcast %cst_23 : f32 to vector<8x128xf32>
    %58 = arith.mulf %57, %56 : vector<8x128xf32>
    %59 = math.tanh %58 : vector<8x128xf32>
    %cst_24 = arith.constant 5.000000e-01 : f32
    %60 = vector.broadcast %cst_24 : f32 to vector<8x128xf32>
    %61 = arith.mulf %60, %59 : vector<8x128xf32>
    %cst_25 = arith.constant 5.000000e-01 : f32
    %62 = vector.broadcast %cst_25 : f32 to vector<8x128xf32>
    %63 = arith.addf %61, %62 : vector<8x128xf32>
    %64 = vector.extract_strided_slice %47 {offsets = [0, 256], sizes = [8, 128], strides = [1, 1]} : vector<8x512xf32> to vector<8x128xf32>
    %65 = math.tanh %64 : vector<8x128xf32>
    %66 = vector.extract_strided_slice %47 {offsets = [0, 384], sizes = [8, 128], strides = [1, 1]} : vector<8x512xf32> to vector<8x128xf32>
    %cst_26 = arith.constant 5.000000e-01 : f32
    %67 = vector.broadcast %cst_26 : f32 to vector<8x128xf32>
    %68 = arith.mulf %67, %66 : vector<8x128xf32>
    %69 = math.tanh %68 : vector<8x128xf32>
    %cst_27 = arith.constant 5.000000e-01 : f32
    %70 = vector.broadcast %cst_27 : f32 to vector<8x128xf32>
    %71 = arith.mulf %70, %69 : vector<8x128xf32>
    %cst_28 = arith.constant 5.000000e-01 : f32
    %72 = vector.broadcast %cst_28 : f32 to vector<8x128xf32>
    %73 = arith.addf %71, %72 : vector<8x128xf32>
    %74 = arith.mulf %63, %36 : vector<8x128xf32>
    %75 = arith.mulf %55, %65 : vector<8x128xf32>
    %76 = arith.addf %74, %75 : vector<8x128xf32>
    %77 = math.tanh %76 : vector<8x128xf32>
    %78 = arith.mulf %73, %77 : vector<8x128xf32>
    %79 = vector.broadcast %16 : vector<1x128xf32> to vector<8x128xf32>
    %80 = arith.mulf %78, %79 : vector<8x128xf32>
    %cst_29 = arith.constant dense<0.000000e+00> : vector<8xf32>
    %81 = vector.multi_reduction <add>, %80, %cst_29 [1] : vector<8x128xf32> to vector<8xf32>
    %82 = vector.shape_cast %81 : vector<8xf32> to vector<8x1xf32>
    %83 = vector.extract_strided_slice %8 {offsets = [16, 0], sizes = [8, 512], strides = [1, 1]} : vector<64x512xf32> to vector<8x512xf32>
    %84 = vector.broadcast %82 : vector<8x1xf32> to vector<8x512xf32>
    %85 = vector.broadcast %13 : vector<1x512xf32> to vector<8x512xf32>
    %86 = arith.mulf %84, %85 : vector<8x512xf32>
    %87 = arith.addf %83, %86 : vector<8x512xf32>
    %88 = vector.extract_strided_slice %87 {offsets = [0, 0], sizes = [8, 128], strides = [1, 1]} : vector<8x512xf32> to vector<8x128xf32>
    %cst_30 = arith.constant 5.000000e-01 : f32
    %89 = vector.broadcast %cst_30 : f32 to vector<8x128xf32>
    %90 = arith.mulf %89, %88 : vector<8x128xf32>
    %91 = math.tanh %90 : vector<8x128xf32>
    %cst_31 = arith.constant 5.000000e-01 : f32
    %92 = vector.broadcast %cst_31 : f32 to vector<8x128xf32>
    %93 = arith.mulf %92, %91 : vector<8x128xf32>
    %cst_32 = arith.constant 5.000000e-01 : f32
    %94 = vector.broadcast %cst_32 : f32 to vector<8x128xf32>
    %95 = arith.addf %93, %94 : vector<8x128xf32>
    %96 = vector.extract_strided_slice %87 {offsets = [0, 128], sizes = [8, 128], strides = [1, 1]} : vector<8x512xf32> to vector<8x128xf32>
    %cst_33 = arith.constant 5.000000e-01 : f32
    %97 = vector.broadcast %cst_33 : f32 to vector<8x128xf32>
    %98 = arith.mulf %97, %96 : vector<8x128xf32>
    %99 = math.tanh %98 : vector<8x128xf32>
    %cst_34 = arith.constant 5.000000e-01 : f32
    %100 = vector.broadcast %cst_34 : f32 to vector<8x128xf32>
    %101 = arith.mulf %100, %99 : vector<8x128xf32>
    %cst_35 = arith.constant 5.000000e-01 : f32
    %102 = vector.broadcast %cst_35 : f32 to vector<8x128xf32>
    %103 = arith.addf %101, %102 : vector<8x128xf32>
    %104 = vector.extract_strided_slice %87 {offsets = [0, 256], sizes = [8, 128], strides = [1, 1]} : vector<8x512xf32> to vector<8x128xf32>
    %105 = math.tanh %104 : vector<8x128xf32>
    %106 = vector.extract_strided_slice %87 {offsets = [0, 384], sizes = [8, 128], strides = [1, 1]} : vector<8x512xf32> to vector<8x128xf32>
    %cst_36 = arith.constant 5.000000e-01 : f32
    %107 = vector.broadcast %cst_36 : f32 to vector<8x128xf32>
    %108 = arith.mulf %107, %106 : vector<8x128xf32>
    %109 = math.tanh %108 : vector<8x128xf32>
    %cst_37 = arith.constant 5.000000e-01 : f32
    %110 = vector.broadcast %cst_37 : f32 to vector<8x128xf32>
    %111 = arith.mulf %110, %109 : vector<8x128xf32>
    %cst_38 = arith.constant 5.000000e-01 : f32
    %112 = vector.broadcast %cst_38 : f32 to vector<8x128xf32>
    %113 = arith.addf %111, %112 : vector<8x128xf32>
    %114 = arith.mulf %103, %76 : vector<8x128xf32>
    %115 = arith.mulf %95, %105 : vector<8x128xf32>
    %116 = arith.addf %114, %115 : vector<8x128xf32>
    %117 = math.tanh %116 : vector<8x128xf32>
    %118 = arith.mulf %113, %117 : vector<8x128xf32>
    %119 = vector.broadcast %16 : vector<1x128xf32> to vector<8x128xf32>
    %120 = arith.mulf %118, %119 : vector<8x128xf32>
    %cst_39 = arith.constant dense<0.000000e+00> : vector<8xf32>
    %121 = vector.multi_reduction <add>, %120, %cst_39 [1] : vector<8x128xf32> to vector<8xf32>
    %122 = vector.shape_cast %121 : vector<8xf32> to vector<8x1xf32>
    %123 = vector.extract_strided_slice %8 {offsets = [24, 0], sizes = [8, 512], strides = [1, 1]} : vector<64x512xf32> to vector<8x512xf32>
    %124 = vector.broadcast %122 : vector<8x1xf32> to vector<8x512xf32>
    %125 = vector.broadcast %13 : vector<1x512xf32> to vector<8x512xf32>
    %126 = arith.mulf %124, %125 : vector<8x512xf32>
    %127 = arith.addf %123, %126 : vector<8x512xf32>
    %128 = vector.extract_strided_slice %127 {offsets = [0, 0], sizes = [8, 128], strides = [1, 1]} : vector<8x512xf32> to vector<8x128xf32>
    %cst_40 = arith.constant 5.000000e-01 : f32
    %129 = vector.broadcast %cst_40 : f32 to vector<8x128xf32>
    %130 = arith.mulf %129, %128 : vector<8x128xf32>
    %131 = math.tanh %130 : vector<8x128xf32>
    %cst_41 = arith.constant 5.000000e-01 : f32
    %132 = vector.broadcast %cst_41 : f32 to vector<8x128xf32>
    %133 = arith.mulf %132, %131 : vector<8x128xf32>
    %cst_42 = arith.constant 5.000000e-01 : f32
    %134 = vector.broadcast %cst_42 : f32 to vector<8x128xf32>
    %135 = arith.addf %133, %134 : vector<8x128xf32>
    %136 = vector.extract_strided_slice %127 {offsets = [0, 128], sizes = [8, 128], strides = [1, 1]} : vector<8x512xf32> to vector<8x128xf32>
    %cst_43 = arith.constant 5.000000e-01 : f32
    %137 = vector.broadcast %cst_43 : f32 to vector<8x128xf32>
    %138 = arith.mulf %137, %136 : vector<8x128xf32>
    %139 = math.tanh %138 : vector<8x128xf32>
    %cst_44 = arith.constant 5.000000e-01 : f32
    %140 = vector.broadcast %cst_44 : f32 to vector<8x128xf32>
    %141 = arith.mulf %140, %139 : vector<8x128xf32>
    %cst_45 = arith.constant 5.000000e-01 : f32
    %142 = vector.broadcast %cst_45 : f32 to vector<8x128xf32>
    %143 = arith.addf %141, %142 : vector<8x128xf32>
    %144 = vector.extract_strided_slice %127 {offsets = [0, 256], sizes = [8, 128], strides = [1, 1]} : vector<8x512xf32> to vector<8x128xf32>
    %145 = math.tanh %144 : vector<8x128xf32>
    %146 = vector.extract_strided_slice %127 {offsets = [0, 384], sizes = [8, 128], strides = [1, 1]} : vector<8x512xf32> to vector<8x128xf32>
    %cst_46 = arith.constant 5.000000e-01 : f32
    %147 = vector.broadcast %cst_46 : f32 to vector<8x128xf32>
    %148 = arith.mulf %147, %146 : vector<8x128xf32>
    %149 = math.tanh %148 : vector<8x128xf32>
    %cst_47 = arith.constant 5.000000e-01 : f32
    %150 = vector.broadcast %cst_47 : f32 to vector<8x128xf32>
    %151 = arith.mulf %150, %149 : vector<8x128xf32>
    %cst_48 = arith.constant 5.000000e-01 : f32
    %152 = vector.broadcast %cst_48 : f32 to vector<8x128xf32>
    %153 = arith.addf %151, %152 : vector<8x128xf32>
    %154 = arith.mulf %143, %116 : vector<8x128xf32>
    %155 = arith.mulf %135, %145 : vector<8x128xf32>
    %156 = arith.addf %154, %155 : vector<8x128xf32>
    %157 = math.tanh %156 : vector<8x128xf32>
    %158 = arith.mulf %153, %157 : vector<8x128xf32>
    %159 = vector.broadcast %16 : vector<1x128xf32> to vector<8x128xf32>
    %160 = arith.mulf %158, %159 : vector<8x128xf32>
    %cst_49 = arith.constant dense<0.000000e+00> : vector<8xf32>
    %161 = vector.multi_reduction <add>, %160, %cst_49 [1] : vector<8x128xf32> to vector<8xf32>
    %162 = vector.shape_cast %161 : vector<8xf32> to vector<8x1xf32>
    %163 = vector.extract_strided_slice %8 {offsets = [32, 0], sizes = [8, 512], strides = [1, 1]} : vector<64x512xf32> to vector<8x512xf32>
    %164 = vector.broadcast %162 : vector<8x1xf32> to vector<8x512xf32>
    %165 = vector.broadcast %13 : vector<1x512xf32> to vector<8x512xf32>
    %166 = arith.mulf %164, %165 : vector<8x512xf32>
    %167 = arith.addf %163, %166 : vector<8x512xf32>
    %168 = vector.extract_strided_slice %167 {offsets = [0, 0], sizes = [8, 128], strides = [1, 1]} : vector<8x512xf32> to vector<8x128xf32>
    %cst_50 = arith.constant 5.000000e-01 : f32
    %169 = vector.broadcast %cst_50 : f32 to vector<8x128xf32>
    %170 = arith.mulf %169, %168 : vector<8x128xf32>
    %171 = math.tanh %170 : vector<8x128xf32>
    %cst_51 = arith.constant 5.000000e-01 : f32
    %172 = vector.broadcast %cst_51 : f32 to vector<8x128xf32>
    %173 = arith.mulf %172, %171 : vector<8x128xf32>
    %cst_52 = arith.constant 5.000000e-01 : f32
    %174 = vector.broadcast %cst_52 : f32 to vector<8x128xf32>
    %175 = arith.addf %173, %174 : vector<8x128xf32>
    %176 = vector.extract_strided_slice %167 {offsets = [0, 128], sizes = [8, 128], strides = [1, 1]} : vector<8x512xf32> to vector<8x128xf32>
    %cst_53 = arith.constant 5.000000e-01 : f32
    %177 = vector.broadcast %cst_53 : f32 to vector<8x128xf32>
    %178 = arith.mulf %177, %176 : vector<8x128xf32>
    %179 = math.tanh %178 : vector<8x128xf32>
    %cst_54 = arith.constant 5.000000e-01 : f32
    %180 = vector.broadcast %cst_54 : f32 to vector<8x128xf32>
    %181 = arith.mulf %180, %179 : vector<8x128xf32>
    %cst_55 = arith.constant 5.000000e-01 : f32
    %182 = vector.broadcast %cst_55 : f32 to vector<8x128xf32>
    %183 = arith.addf %181, %182 : vector<8x128xf32>
    %184 = vector.extract_strided_slice %167 {offsets = [0, 256], sizes = [8, 128], strides = [1, 1]} : vector<8x512xf32> to vector<8x128xf32>
    %185 = math.tanh %184 : vector<8x128xf32>
    %186 = vector.extract_strided_slice %167 {offsets = [0, 384], sizes = [8, 128], strides = [1, 1]} : vector<8x512xf32> to vector<8x128xf32>
    %cst_56 = arith.constant 5.000000e-01 : f32
    %187 = vector.broadcast %cst_56 : f32 to vector<8x128xf32>
    %188 = arith.mulf %187, %186 : vector<8x128xf32>
    %189 = math.tanh %188 : vector<8x128xf32>
    %cst_57 = arith.constant 5.000000e-01 : f32
    %190 = vector.broadcast %cst_57 : f32 to vector<8x128xf32>
    %191 = arith.mulf %190, %189 : vector<8x128xf32>
    %cst_58 = arith.constant 5.000000e-01 : f32
    %192 = vector.broadcast %cst_58 : f32 to vector<8x128xf32>
    %193 = arith.addf %191, %192 : vector<8x128xf32>
    %194 = arith.mulf %183, %156 : vector<8x128xf32>
    %195 = arith.mulf %175, %185 : vector<8x128xf32>
    %196 = arith.addf %194, %195 : vector<8x128xf32>
    %197 = math.tanh %196 : vector<8x128xf32>
    %198 = arith.mulf %193, %197 : vector<8x128xf32>
    %199 = vector.broadcast %16 : vector<1x128xf32> to vector<8x128xf32>
    %200 = arith.mulf %198, %199 : vector<8x128xf32>
    %cst_59 = arith.constant dense<0.000000e+00> : vector<8xf32>
    %201 = vector.multi_reduction <add>, %200, %cst_59 [1] : vector<8x128xf32> to vector<8xf32>
    %202 = vector.shape_cast %201 : vector<8xf32> to vector<8x1xf32>
    %203 = vector.extract_strided_slice %8 {offsets = [40, 0], sizes = [8, 512], strides = [1, 1]} : vector<64x512xf32> to vector<8x512xf32>
    %204 = vector.broadcast %202 : vector<8x1xf32> to vector<8x512xf32>
    %205 = vector.broadcast %13 : vector<1x512xf32> to vector<8x512xf32>
    %206 = arith.mulf %204, %205 : vector<8x512xf32>
    %207 = arith.addf %203, %206 : vector<8x512xf32>
    %208 = vector.extract_strided_slice %207 {offsets = [0, 0], sizes = [8, 128], strides = [1, 1]} : vector<8x512xf32> to vector<8x128xf32>
    %cst_60 = arith.constant 5.000000e-01 : f32
    %209 = vector.broadcast %cst_60 : f32 to vector<8x128xf32>
    %210 = arith.mulf %209, %208 : vector<8x128xf32>
    %211 = math.tanh %210 : vector<8x128xf32>
    %cst_61 = arith.constant 5.000000e-01 : f32
    %212 = vector.broadcast %cst_61 : f32 to vector<8x128xf32>
    %213 = arith.mulf %212, %211 : vector<8x128xf32>
    %cst_62 = arith.constant 5.000000e-01 : f32
    %214 = vector.broadcast %cst_62 : f32 to vector<8x128xf32>
    %215 = arith.addf %213, %214 : vector<8x128xf32>
    %216 = vector.extract_strided_slice %207 {offsets = [0, 128], sizes = [8, 128], strides = [1, 1]} : vector<8x512xf32> to vector<8x128xf32>
    %cst_63 = arith.constant 5.000000e-01 : f32
    %217 = vector.broadcast %cst_63 : f32 to vector<8x128xf32>
    %218 = arith.mulf %217, %216 : vector<8x128xf32>
    %219 = math.tanh %218 : vector<8x128xf32>
    %cst_64 = arith.constant 5.000000e-01 : f32
    %220 = vector.broadcast %cst_64 : f32 to vector<8x128xf32>
    %221 = arith.mulf %220, %219 : vector<8x128xf32>
    %cst_65 = arith.constant 5.000000e-01 : f32
    %222 = vector.broadcast %cst_65 : f32 to vector<8x128xf32>
    %223 = arith.addf %221, %222 : vector<8x128xf32>
    %224 = vector.extract_strided_slice %207 {offsets = [0, 256], sizes = [8, 128], strides = [1, 1]} : vector<8x512xf32> to vector<8x128xf32>
    %225 = math.tanh %224 : vector<8x128xf32>
    %226 = vector.extract_strided_slice %207 {offsets = [0, 384], sizes = [8, 128], strides = [1, 1]} : vector<8x512xf32> to vector<8x128xf32>
    %cst_66 = arith.constant 5.000000e-01 : f32
    %227 = vector.broadcast %cst_66 : f32 to vector<8x128xf32>
    %228 = arith.mulf %227, %226 : vector<8x128xf32>
    %229 = math.tanh %228 : vector<8x128xf32>
    %cst_67 = arith.constant 5.000000e-01 : f32
    %230 = vector.broadcast %cst_67 : f32 to vector<8x128xf32>
    %231 = arith.mulf %230, %229 : vector<8x128xf32>
    %cst_68 = arith.constant 5.000000e-01 : f32
    %232 = vector.broadcast %cst_68 : f32 to vector<8x128xf32>
    %233 = arith.addf %231, %232 : vector<8x128xf32>
    %234 = arith.mulf %223, %196 : vector<8x128xf32>
    %235 = arith.mulf %215, %225 : vector<8x128xf32>
    %236 = arith.addf %234, %235 : vector<8x128xf32>
    %237 = math.tanh %236 : vector<8x128xf32>
    %238 = arith.mulf %233, %237 : vector<8x128xf32>
    %239 = vector.broadcast %16 : vector<1x128xf32> to vector<8x128xf32>
    %240 = arith.mulf %238, %239 : vector<8x128xf32>
    %cst_69 = arith.constant dense<0.000000e+00> : vector<8xf32>
    %241 = vector.multi_reduction <add>, %240, %cst_69 [1] : vector<8x128xf32> to vector<8xf32>
    %242 = vector.shape_cast %241 : vector<8xf32> to vector<8x1xf32>
    %243 = vector.extract_strided_slice %8 {offsets = [48, 0], sizes = [8, 512], strides = [1, 1]} : vector<64x512xf32> to vector<8x512xf32>
    %244 = vector.broadcast %242 : vector<8x1xf32> to vector<8x512xf32>
    %245 = vector.broadcast %13 : vector<1x512xf32> to vector<8x512xf32>
    %246 = arith.mulf %244, %245 : vector<8x512xf32>
    %247 = arith.addf %243, %246 : vector<8x512xf32>
    %248 = vector.extract_strided_slice %247 {offsets = [0, 0], sizes = [8, 128], strides = [1, 1]} : vector<8x512xf32> to vector<8x128xf32>
    %cst_70 = arith.constant 5.000000e-01 : f32
    %249 = vector.broadcast %cst_70 : f32 to vector<8x128xf32>
    %250 = arith.mulf %249, %248 : vector<8x128xf32>
    %251 = math.tanh %250 : vector<8x128xf32>
    %cst_71 = arith.constant 5.000000e-01 : f32
    %252 = vector.broadcast %cst_71 : f32 to vector<8x128xf32>
    %253 = arith.mulf %252, %251 : vector<8x128xf32>
    %cst_72 = arith.constant 5.000000e-01 : f32
    %254 = vector.broadcast %cst_72 : f32 to vector<8x128xf32>
    %255 = arith.addf %253, %254 : vector<8x128xf32>
    %256 = vector.extract_strided_slice %247 {offsets = [0, 128], sizes = [8, 128], strides = [1, 1]} : vector<8x512xf32> to vector<8x128xf32>
    %cst_73 = arith.constant 5.000000e-01 : f32
    %257 = vector.broadcast %cst_73 : f32 to vector<8x128xf32>
    %258 = arith.mulf %257, %256 : vector<8x128xf32>
    %259 = math.tanh %258 : vector<8x128xf32>
    %cst_74 = arith.constant 5.000000e-01 : f32
    %260 = vector.broadcast %cst_74 : f32 to vector<8x128xf32>
    %261 = arith.mulf %260, %259 : vector<8x128xf32>
    %cst_75 = arith.constant 5.000000e-01 : f32
    %262 = vector.broadcast %cst_75 : f32 to vector<8x128xf32>
    %263 = arith.addf %261, %262 : vector<8x128xf32>
    %264 = vector.extract_strided_slice %247 {offsets = [0, 256], sizes = [8, 128], strides = [1, 1]} : vector<8x512xf32> to vector<8x128xf32>
    %265 = math.tanh %264 : vector<8x128xf32>
    %266 = vector.extract_strided_slice %247 {offsets = [0, 384], sizes = [8, 128], strides = [1, 1]} : vector<8x512xf32> to vector<8x128xf32>
    %cst_76 = arith.constant 5.000000e-01 : f32
    %267 = vector.broadcast %cst_76 : f32 to vector<8x128xf32>
    %268 = arith.mulf %267, %266 : vector<8x128xf32>
    %269 = math.tanh %268 : vector<8x128xf32>
    %cst_77 = arith.constant 5.000000e-01 : f32
    %270 = vector.broadcast %cst_77 : f32 to vector<8x128xf32>
    %271 = arith.mulf %270, %269 : vector<8x128xf32>
    %cst_78 = arith.constant 5.000000e-01 : f32
    %272 = vector.broadcast %cst_78 : f32 to vector<8x128xf32>
    %273 = arith.addf %271, %272 : vector<8x128xf32>
    %274 = arith.mulf %263, %236 : vector<8x128xf32>
    %275 = arith.mulf %255, %265 : vector<8x128xf32>
    %276 = arith.addf %274, %275 : vector<8x128xf32>
    %277 = math.tanh %276 : vector<8x128xf32>
    %278 = arith.mulf %273, %277 : vector<8x128xf32>
    %279 = vector.broadcast %16 : vector<1x128xf32> to vector<8x128xf32>
    %280 = arith.mulf %278, %279 : vector<8x128xf32>
    %cst_79 = arith.constant dense<0.000000e+00> : vector<8xf32>
    %281 = vector.multi_reduction <add>, %280, %cst_79 [1] : vector<8x128xf32> to vector<8xf32>
    %282 = vector.shape_cast %281 : vector<8xf32> to vector<8x1xf32>
    %283 = vector.extract_strided_slice %8 {offsets = [56, 0], sizes = [8, 512], strides = [1, 1]} : vector<64x512xf32> to vector<8x512xf32>
    %284 = vector.broadcast %282 : vector<8x1xf32> to vector<8x512xf32>
    %285 = vector.broadcast %13 : vector<1x512xf32> to vector<8x512xf32>
    %286 = arith.mulf %284, %285 : vector<8x512xf32>
    %287 = arith.addf %283, %286 : vector<8x512xf32>
    %288 = vector.extract_strided_slice %287 {offsets = [0, 0], sizes = [8, 128], strides = [1, 1]} : vector<8x512xf32> to vector<8x128xf32>
    %cst_80 = arith.constant 5.000000e-01 : f32
    %289 = vector.broadcast %cst_80 : f32 to vector<8x128xf32>
    %290 = arith.mulf %289, %288 : vector<8x128xf32>
    %291 = math.tanh %290 : vector<8x128xf32>
    %cst_81 = arith.constant 5.000000e-01 : f32
    %292 = vector.broadcast %cst_81 : f32 to vector<8x128xf32>
    %293 = arith.mulf %292, %291 : vector<8x128xf32>
    %cst_82 = arith.constant 5.000000e-01 : f32
    %294 = vector.broadcast %cst_82 : f32 to vector<8x128xf32>
    %295 = arith.addf %293, %294 : vector<8x128xf32>
    %296 = vector.extract_strided_slice %287 {offsets = [0, 128], sizes = [8, 128], strides = [1, 1]} : vector<8x512xf32> to vector<8x128xf32>
    %cst_83 = arith.constant 5.000000e-01 : f32
    %297 = vector.broadcast %cst_83 : f32 to vector<8x128xf32>
    %298 = arith.mulf %297, %296 : vector<8x128xf32>
    %299 = math.tanh %298 : vector<8x128xf32>
    %cst_84 = arith.constant 5.000000e-01 : f32
    %300 = vector.broadcast %cst_84 : f32 to vector<8x128xf32>
    %301 = arith.mulf %300, %299 : vector<8x128xf32>
    %cst_85 = arith.constant 5.000000e-01 : f32
    %302 = vector.broadcast %cst_85 : f32 to vector<8x128xf32>
    %303 = arith.addf %301, %302 : vector<8x128xf32>
    %304 = vector.extract_strided_slice %287 {offsets = [0, 256], sizes = [8, 128], strides = [1, 1]} : vector<8x512xf32> to vector<8x128xf32>
    %305 = math.tanh %304 : vector<8x128xf32>
    %306 = vector.extract_strided_slice %287 {offsets = [0, 384], sizes = [8, 128], strides = [1, 1]} : vector<8x512xf32> to vector<8x128xf32>
    %cst_86 = arith.constant 5.000000e-01 : f32
    %307 = vector.broadcast %cst_86 : f32 to vector<8x128xf32>
    %308 = arith.mulf %307, %306 : vector<8x128xf32>
    %309 = math.tanh %308 : vector<8x128xf32>
    %cst_87 = arith.constant 5.000000e-01 : f32
    %310 = vector.broadcast %cst_87 : f32 to vector<8x128xf32>
    %311 = arith.mulf %310, %309 : vector<8x128xf32>
    %cst_88 = arith.constant 5.000000e-01 : f32
    %312 = vector.broadcast %cst_88 : f32 to vector<8x128xf32>
    %313 = arith.addf %311, %312 : vector<8x128xf32>
    %314 = arith.mulf %303, %276 : vector<8x128xf32>
    %315 = arith.mulf %295, %305 : vector<8x128xf32>
    %316 = arith.addf %314, %315 : vector<8x128xf32>
    %317 = math.tanh %316 : vector<8x128xf32>
    %318 = arith.mulf %313, %317 : vector<8x128xf32>
    %319 = vector.broadcast %16 : vector<1x128xf32> to vector<8x128xf32>
    %320 = arith.mulf %318, %319 : vector<8x128xf32>
    %cst_89 = arith.constant dense<0.000000e+00> : vector<8xf32>
    %321 = vector.multi_reduction <add>, %320, %cst_89 [1] : vector<8x128xf32> to vector<8xf32>
    %322 = vector.shape_cast %321 : vector<8xf32> to vector<8x1xf32>
    %c1 = arith.constant 1 : index
    %c0_90 = arith.constant 0 : index
    %323 = vector.load %arg6[%c1, %c0_90] : memref<5x512xf32, #tpu.memory_space<vmem>>, vector<1x512xf32>
    %324 = vector.shape_cast %323 : vector<1x512xf32> to vector<512xf32>
    %325 = vector.shape_cast %324 : vector<512xf32> to vector<1x512xf32>
    %c1_91 = arith.constant 1 : index
    %c0_92 = arith.constant 0 : index
    %326 = vector.load %arg8[%c1_91, %c0_92] : memref<5x128xf32, #tpu.memory_space<vmem>>, vector<1x128xf32>
    %327 = vector.shape_cast %326 : vector<1x128xf32> to vector<128xf32>
    %328 = vector.shape_cast %327 : vector<128xf32> to vector<1x128xf32>
    %c0_93 = arith.constant 0 : index
    %c0_94 = arith.constant 0 : index
    %329 = vector.load %arg5[%c0_93, %c0_94] : memref<4x512xf32, #tpu.memory_space<vmem>>, vector<1x512xf32>
    %330 = vector.shape_cast %329 : vector<1x512xf32> to vector<512xf32>
    %331 = vector.shape_cast %330 : vector<512xf32> to vector<1x512xf32>
    %c1_95 = arith.constant 1 : index
    %c0_96 = arith.constant 0 : index
    %332 = vector.load %arg7[%c1_95, %c0_96] : memref<5x512xf32, #tpu.memory_space<vmem>>, vector<1x512xf32>
    %333 = vector.shape_cast %332 : vector<1x512xf32> to vector<512xf32>
    %334 = vector.shape_cast %333 : vector<512xf32> to vector<1x512xf32>
    %335 = vector.broadcast %42 : vector<8x1xf32> to vector<8x512xf32>
    %336 = vector.broadcast %331 : vector<1x512xf32> to vector<8x512xf32>
    %337 = arith.mulf %335, %336 : vector<8x512xf32>
    %338 = vector.broadcast %334 : vector<1x512xf32> to vector<8x512xf32>
    %339 = arith.addf %337, %338 : vector<8x512xf32>
    %340 = vector.extract_strided_slice %339 {offsets = [0, 0], sizes = [8, 128], strides = [1, 1]} : vector<8x512xf32> to vector<8x128xf32>
    %cst_97 = arith.constant 5.000000e-01 : f32
    %341 = vector.broadcast %cst_97 : f32 to vector<8x128xf32>
    %342 = arith.mulf %341, %340 : vector<8x128xf32>
    %343 = math.tanh %342 : vector<8x128xf32>
    %cst_98 = arith.constant 5.000000e-01 : f32
    %344 = vector.broadcast %cst_98 : f32 to vector<8x128xf32>
    %345 = arith.mulf %344, %343 : vector<8x128xf32>
    %cst_99 = arith.constant 5.000000e-01 : f32
    %346 = vector.broadcast %cst_99 : f32 to vector<8x128xf32>
    %347 = arith.addf %345, %346 : vector<8x128xf32>
    %348 = vector.extract_strided_slice %339 {offsets = [0, 256], sizes = [8, 128], strides = [1, 1]} : vector<8x512xf32> to vector<8x128xf32>
    %349 = math.tanh %348 : vector<8x128xf32>
    %350 = vector.extract_strided_slice %339 {offsets = [0, 384], sizes = [8, 128], strides = [1, 1]} : vector<8x512xf32> to vector<8x128xf32>
    %cst_100 = arith.constant 5.000000e-01 : f32
    %351 = vector.broadcast %cst_100 : f32 to vector<8x128xf32>
    %352 = arith.mulf %351, %350 : vector<8x128xf32>
    %353 = math.tanh %352 : vector<8x128xf32>
    %cst_101 = arith.constant 5.000000e-01 : f32
    %354 = vector.broadcast %cst_101 : f32 to vector<8x128xf32>
    %355 = arith.mulf %354, %353 : vector<8x128xf32>
    %cst_102 = arith.constant 5.000000e-01 : f32
    %356 = vector.broadcast %cst_102 : f32 to vector<8x128xf32>
    %357 = arith.addf %355, %356 : vector<8x128xf32>
    %358 = arith.mulf %347, %349 : vector<8x128xf32>
    %359 = math.tanh %358 : vector<8x128xf32>
    %360 = arith.mulf %357, %359 : vector<8x128xf32>
    %361 = vector.broadcast %328 : vector<1x128xf32> to vector<8x128xf32>
    %362 = arith.mulf %360, %361 : vector<8x128xf32>
    %cst_103 = arith.constant dense<0.000000e+00> : vector<8xf32>
    %363 = vector.multi_reduction <add>, %362, %cst_103 [1] : vector<8x128xf32> to vector<8xf32>
    %364 = vector.shape_cast %363 : vector<8xf32> to vector<8x1xf32>
    %365 = vector.broadcast %82 : vector<8x1xf32> to vector<8x512xf32>
    %366 = vector.broadcast %331 : vector<1x512xf32> to vector<8x512xf32>
    %367 = arith.mulf %365, %366 : vector<8x512xf32>
    %368 = vector.broadcast %334 : vector<1x512xf32> to vector<8x512xf32>
    %369 = arith.addf %367, %368 : vector<8x512xf32>
    %370 = vector.broadcast %364 : vector<8x1xf32> to vector<8x512xf32>
    %371 = vector.broadcast %325 : vector<1x512xf32> to vector<8x512xf32>
    %372 = arith.mulf %370, %371 : vector<8x512xf32>
    %373 = arith.addf %369, %372 : vector<8x512xf32>
    %374 = vector.extract_strided_slice %373 {offsets = [0, 0], sizes = [8, 128], strides = [1, 1]} : vector<8x512xf32> to vector<8x128xf32>
    %cst_104 = arith.constant 5.000000e-01 : f32
    %375 = vector.broadcast %cst_104 : f32 to vector<8x128xf32>
    %376 = arith.mulf %375, %374 : vector<8x128xf32>
    %377 = math.tanh %376 : vector<8x128xf32>
    %cst_105 = arith.constant 5.000000e-01 : f32
    %378 = vector.broadcast %cst_105 : f32 to vector<8x128xf32>
    %379 = arith.mulf %378, %377 : vector<8x128xf32>
    %cst_106 = arith.constant 5.000000e-01 : f32
    %380 = vector.broadcast %cst_106 : f32 to vector<8x128xf32>
    %381 = arith.addf %379, %380 : vector<8x128xf32>
    %382 = vector.extract_strided_slice %373 {offsets = [0, 128], sizes = [8, 128], strides = [1, 1]} : vector<8x512xf32> to vector<8x128xf32>
    %cst_107 = arith.constant 5.000000e-01 : f32
    %383 = vector.broadcast %cst_107 : f32 to vector<8x128xf32>
    %384 = arith.mulf %383, %382 : vector<8x128xf32>
    %385 = math.tanh %384 : vector<8x128xf32>
    %cst_108 = arith.constant 5.000000e-01 : f32
    %386 = vector.broadcast %cst_108 : f32 to vector<8x128xf32>
    %387 = arith.mulf %386, %385 : vector<8x128xf32>
    %cst_109 = arith.constant 5.000000e-01 : f32
    %388 = vector.broadcast %cst_109 : f32 to vector<8x128xf32>
    %389 = arith.addf %387, %388 : vector<8x128xf32>
    %390 = vector.extract_strided_slice %373 {offsets = [0, 256], sizes = [8, 128], strides = [1, 1]} : vector<8x512xf32> to vector<8x128xf32>
    %391 = math.tanh %390 : vector<8x128xf32>
    %392 = vector.extract_strided_slice %373 {offsets = [0, 384], sizes = [8, 128], strides = [1, 1]} : vector<8x512xf32> to vector<8x128xf32>
    %cst_110 = arith.constant 5.000000e-01 : f32
    %393 = vector.broadcast %cst_110 : f32 to vector<8x128xf32>
    %394 = arith.mulf %393, %392 : vector<8x128xf32>
    %395 = math.tanh %394 : vector<8x128xf32>
    %cst_111 = arith.constant 5.000000e-01 : f32
    %396 = vector.broadcast %cst_111 : f32 to vector<8x128xf32>
    %397 = arith.mulf %396, %395 : vector<8x128xf32>
    %cst_112 = arith.constant 5.000000e-01 : f32
    %398 = vector.broadcast %cst_112 : f32 to vector<8x128xf32>
    %399 = arith.addf %397, %398 : vector<8x128xf32>
    %400 = arith.mulf %389, %358 : vector<8x128xf32>
    %401 = arith.mulf %381, %391 : vector<8x128xf32>
    %402 = arith.addf %400, %401 : vector<8x128xf32>
    %403 = math.tanh %402 : vector<8x128xf32>
    %404 = arith.mulf %399, %403 : vector<8x128xf32>
    %405 = vector.broadcast %328 : vector<1x128xf32> to vector<8x128xf32>
    %406 = arith.mulf %404, %405 : vector<8x128xf32>
    %cst_113 = arith.constant dense<0.000000e+00> : vector<8xf32>
    %407 = vector.multi_reduction <add>, %406, %cst_113 [1] : vector<8x128xf32> to vector<8xf32>
    %408 = vector.shape_cast %407 : vector<8xf32> to vector<8x1xf32>
    %409 = vector.broadcast %122 : vector<8x1xf32> to vector<8x512xf32>
    %410 = vector.broadcast %331 : vector<1x512xf32> to vector<8x512xf32>
    %411 = arith.mulf %409, %410 : vector<8x512xf32>
    %412 = vector.broadcast %334 : vector<1x512xf32> to vector<8x512xf32>
    %413 = arith.addf %411, %412 : vector<8x512xf32>
    %414 = vector.broadcast %408 : vector<8x1xf32> to vector<8x512xf32>
    %415 = vector.broadcast %325 : vector<1x512xf32> to vector<8x512xf32>
    %416 = arith.mulf %414, %415 : vector<8x512xf32>
    %417 = arith.addf %413, %416 : vector<8x512xf32>
    %418 = vector.extract_strided_slice %417 {offsets = [0, 0], sizes = [8, 128], strides = [1, 1]} : vector<8x512xf32> to vector<8x128xf32>
    %cst_114 = arith.constant 5.000000e-01 : f32
    %419 = vector.broadcast %cst_114 : f32 to vector<8x128xf32>
    %420 = arith.mulf %419, %418 : vector<8x128xf32>
    %421 = math.tanh %420 : vector<8x128xf32>
    %cst_115 = arith.constant 5.000000e-01 : f32
    %422 = vector.broadcast %cst_115 : f32 to vector<8x128xf32>
    %423 = arith.mulf %422, %421 : vector<8x128xf32>
    %cst_116 = arith.constant 5.000000e-01 : f32
    %424 = vector.broadcast %cst_116 : f32 to vector<8x128xf32>
    %425 = arith.addf %423, %424 : vector<8x128xf32>
    %426 = vector.extract_strided_slice %417 {offsets = [0, 128], sizes = [8, 128], strides = [1, 1]} : vector<8x512xf32> to vector<8x128xf32>
    %cst_117 = arith.constant 5.000000e-01 : f32
    %427 = vector.broadcast %cst_117 : f32 to vector<8x128xf32>
    %428 = arith.mulf %427, %426 : vector<8x128xf32>
    %429 = math.tanh %428 : vector<8x128xf32>
    %cst_118 = arith.constant 5.000000e-01 : f32
    %430 = vector.broadcast %cst_118 : f32 to vector<8x128xf32>
    %431 = arith.mulf %430, %429 : vector<8x128xf32>
    %cst_119 = arith.constant 5.000000e-01 : f32
    %432 = vector.broadcast %cst_119 : f32 to vector<8x128xf32>
    %433 = arith.addf %431, %432 : vector<8x128xf32>
    %434 = vector.extract_strided_slice %417 {offsets = [0, 256], sizes = [8, 128], strides = [1, 1]} : vector<8x512xf32> to vector<8x128xf32>
    %435 = math.tanh %434 : vector<8x128xf32>
    %436 = vector.extract_strided_slice %417 {offsets = [0, 384], sizes = [8, 128], strides = [1, 1]} : vector<8x512xf32> to vector<8x128xf32>
    %cst_120 = arith.constant 5.000000e-01 : f32
    %437 = vector.broadcast %cst_120 : f32 to vector<8x128xf32>
    %438 = arith.mulf %437, %436 : vector<8x128xf32>
    %439 = math.tanh %438 : vector<8x128xf32>
    %cst_121 = arith.constant 5.000000e-01 : f32
    %440 = vector.broadcast %cst_121 : f32 to vector<8x128xf32>
    %441 = arith.mulf %440, %439 : vector<8x128xf32>
    %cst_122 = arith.constant 5.000000e-01 : f32
    %442 = vector.broadcast %cst_122 : f32 to vector<8x128xf32>
    %443 = arith.addf %441, %442 : vector<8x128xf32>
    %444 = arith.mulf %433, %402 : vector<8x128xf32>
    %445 = arith.mulf %425, %435 : vector<8x128xf32>
    %446 = arith.addf %444, %445 : vector<8x128xf32>
    %447 = math.tanh %446 : vector<8x128xf32>
    %448 = arith.mulf %443, %447 : vector<8x128xf32>
    %449 = vector.broadcast %328 : vector<1x128xf32> to vector<8x128xf32>
    %450 = arith.mulf %448, %449 : vector<8x128xf32>
    %cst_123 = arith.constant dense<0.000000e+00> : vector<8xf32>
    %451 = vector.multi_reduction <add>, %450, %cst_123 [1] : vector<8x128xf32> to vector<8xf32>
    %452 = vector.shape_cast %451 : vector<8xf32> to vector<8x1xf32>
    %453 = vector.broadcast %162 : vector<8x1xf32> to vector<8x512xf32>
    %454 = vector.broadcast %331 : vector<1x512xf32> to vector<8x512xf32>
    %455 = arith.mulf %453, %454 : vector<8x512xf32>
    %456 = vector.broadcast %334 : vector<1x512xf32> to vector<8x512xf32>
    %457 = arith.addf %455, %456 : vector<8x512xf32>
    %458 = vector.broadcast %452 : vector<8x1xf32> to vector<8x512xf32>
    %459 = vector.broadcast %325 : vector<1x512xf32> to vector<8x512xf32>
    %460 = arith.mulf %458, %459 : vector<8x512xf32>
    %461 = arith.addf %457, %460 : vector<8x512xf32>
    %462 = vector.extract_strided_slice %461 {offsets = [0, 0], sizes = [8, 128], strides = [1, 1]} : vector<8x512xf32> to vector<8x128xf32>
    %cst_124 = arith.constant 5.000000e-01 : f32
    %463 = vector.broadcast %cst_124 : f32 to vector<8x128xf32>
    %464 = arith.mulf %463, %462 : vector<8x128xf32>
    %465 = math.tanh %464 : vector<8x128xf32>
    %cst_125 = arith.constant 5.000000e-01 : f32
    %466 = vector.broadcast %cst_125 : f32 to vector<8x128xf32>
    %467 = arith.mulf %466, %465 : vector<8x128xf32>
    %cst_126 = arith.constant 5.000000e-01 : f32
    %468 = vector.broadcast %cst_126 : f32 to vector<8x128xf32>
    %469 = arith.addf %467, %468 : vector<8x128xf32>
    %470 = vector.extract_strided_slice %461 {offsets = [0, 128], sizes = [8, 128], strides = [1, 1]} : vector<8x512xf32> to vector<8x128xf32>
    %cst_127 = arith.constant 5.000000e-01 : f32
    %471 = vector.broadcast %cst_127 : f32 to vector<8x128xf32>
    %472 = arith.mulf %471, %470 : vector<8x128xf32>
    %473 = math.tanh %472 : vector<8x128xf32>
    %cst_128 = arith.constant 5.000000e-01 : f32
    %474 = vector.broadcast %cst_128 : f32 to vector<8x128xf32>
    %475 = arith.mulf %474, %473 : vector<8x128xf32>
    %cst_129 = arith.constant 5.000000e-01 : f32
    %476 = vector.broadcast %cst_129 : f32 to vector<8x128xf32>
    %477 = arith.addf %475, %476 : vector<8x128xf32>
    %478 = vector.extract_strided_slice %461 {offsets = [0, 256], sizes = [8, 128], strides = [1, 1]} : vector<8x512xf32> to vector<8x128xf32>
    %479 = math.tanh %478 : vector<8x128xf32>
    %480 = vector.extract_strided_slice %461 {offsets = [0, 384], sizes = [8, 128], strides = [1, 1]} : vector<8x512xf32> to vector<8x128xf32>
    %cst_130 = arith.constant 5.000000e-01 : f32
    %481 = vector.broadcast %cst_130 : f32 to vector<8x128xf32>
    %482 = arith.mulf %481, %480 : vector<8x128xf32>
    %483 = math.tanh %482 : vector<8x128xf32>
    %cst_131 = arith.constant 5.000000e-01 : f32
    %484 = vector.broadcast %cst_131 : f32 to vector<8x128xf32>
    %485 = arith.mulf %484, %483 : vector<8x128xf32>
    %cst_132 = arith.constant 5.000000e-01 : f32
    %486 = vector.broadcast %cst_132 : f32 to vector<8x128xf32>
    %487 = arith.addf %485, %486 : vector<8x128xf32>
    %488 = arith.mulf %477, %446 : vector<8x128xf32>
    %489 = arith.mulf %469, %479 : vector<8x128xf32>
    %490 = arith.addf %488, %489 : vector<8x128xf32>
    %491 = math.tanh %490 : vector<8x128xf32>
    %492 = arith.mulf %487, %491 : vector<8x128xf32>
    %493 = vector.broadcast %328 : vector<1x128xf32> to vector<8x128xf32>
    %494 = arith.mulf %492, %493 : vector<8x128xf32>
    %cst_133 = arith.constant dense<0.000000e+00> : vector<8xf32>
    %495 = vector.multi_reduction <add>, %494, %cst_133 [1] : vector<8x128xf32> to vector<8xf32>
    %496 = vector.shape_cast %495 : vector<8xf32> to vector<8x1xf32>
    %497 = vector.broadcast %202 : vector<8x1xf32> to vector<8x512xf32>
    %498 = vector.broadcast %331 : vector<1x512xf32> to vector<8x512xf32>
    %499 = arith.mulf %497, %498 : vector<8x512xf32>
    %500 = vector.broadcast %334 : vector<1x512xf32> to vector<8x512xf32>
    %501 = arith.addf %499, %500 : vector<8x512xf32>
    %502 = vector.broadcast %496 : vector<8x1xf32> to vector<8x512xf32>
    %503 = vector.broadcast %325 : vector<1x512xf32> to vector<8x512xf32>
    %504 = arith.mulf %502, %503 : vector<8x512xf32>
    %505 = arith.addf %501, %504 : vector<8x512xf32>
    %506 = vector.extract_strided_slice %505 {offsets = [0, 0], sizes = [8, 128], strides = [1, 1]} : vector<8x512xf32> to vector<8x128xf32>
    %cst_134 = arith.constant 5.000000e-01 : f32
    %507 = vector.broadcast %cst_134 : f32 to vector<8x128xf32>
    %508 = arith.mulf %507, %506 : vector<8x128xf32>
    %509 = math.tanh %508 : vector<8x128xf32>
    %cst_135 = arith.constant 5.000000e-01 : f32
    %510 = vector.broadcast %cst_135 : f32 to vector<8x128xf32>
    %511 = arith.mulf %510, %509 : vector<8x128xf32>
    %cst_136 = arith.constant 5.000000e-01 : f32
    %512 = vector.broadcast %cst_136 : f32 to vector<8x128xf32>
    %513 = arith.addf %511, %512 : vector<8x128xf32>
    %514 = vector.extract_strided_slice %505 {offsets = [0, 128], sizes = [8, 128], strides = [1, 1]} : vector<8x512xf32> to vector<8x128xf32>
    %cst_137 = arith.constant 5.000000e-01 : f32
    %515 = vector.broadcast %cst_137 : f32 to vector<8x128xf32>
    %516 = arith.mulf %515, %514 : vector<8x128xf32>
    %517 = math.tanh %516 : vector<8x128xf32>
    %cst_138 = arith.constant 5.000000e-01 : f32
    %518 = vector.broadcast %cst_138 : f32 to vector<8x128xf32>
    %519 = arith.mulf %518, %517 : vector<8x128xf32>
    %cst_139 = arith.constant 5.000000e-01 : f32
    %520 = vector.broadcast %cst_139 : f32 to vector<8x128xf32>
    %521 = arith.addf %519, %520 : vector<8x128xf32>
    %522 = vector.extract_strided_slice %505 {offsets = [0, 256], sizes = [8, 128], strides = [1, 1]} : vector<8x512xf32> to vector<8x128xf32>
    %523 = math.tanh %522 : vector<8x128xf32>
    %524 = vector.extract_strided_slice %505 {offsets = [0, 384], sizes = [8, 128], strides = [1, 1]} : vector<8x512xf32> to vector<8x128xf32>
    %cst_140 = arith.constant 5.000000e-01 : f32
    %525 = vector.broadcast %cst_140 : f32 to vector<8x128xf32>
    %526 = arith.mulf %525, %524 : vector<8x128xf32>
    %527 = math.tanh %526 : vector<8x128xf32>
    %cst_141 = arith.constant 5.000000e-01 : f32
    %528 = vector.broadcast %cst_141 : f32 to vector<8x128xf32>
    %529 = arith.mulf %528, %527 : vector<8x128xf32>
    %cst_142 = arith.constant 5.000000e-01 : f32
    %530 = vector.broadcast %cst_142 : f32 to vector<8x128xf32>
    %531 = arith.addf %529, %530 : vector<8x128xf32>
    %532 = arith.mulf %521, %490 : vector<8x128xf32>
    %533 = arith.mulf %513, %523 : vector<8x128xf32>
    %534 = arith.addf %532, %533 : vector<8x128xf32>
    %535 = math.tanh %534 : vector<8x128xf32>
    %536 = arith.mulf %531, %535 : vector<8x128xf32>
    %537 = vector.broadcast %328 : vector<1x128xf32> to vector<8x128xf32>
    %538 = arith.mulf %536, %537 : vector<8x128xf32>
    %cst_143 = arith.constant dense<0.000000e+00> : vector<8xf32>
    %539 = vector.multi_reduction <add>, %538, %cst_143 [1] : vector<8x128xf32> to vector<8xf32>
    %540 = vector.shape_cast %539 : vector<8xf32> to vector<8x1xf32>
    %541 = vector.broadcast %242 : vector<8x1xf32> to vector<8x512xf32>
    %542 = vector.broadcast %331 : vector<1x512xf32> to vector<8x512xf32>
    %543 = arith.mulf %541, %542 : vector<8x512xf32>
    %544 = vector.broadcast %334 : vector<1x512xf32> to vector<8x512xf32>
    %545 = arith.addf %543, %544 : vector<8x512xf32>
    %546 = vector.broadcast %540 : vector<8x1xf32> to vector<8x512xf32>
    %547 = vector.broadcast %325 : vector<1x512xf32> to vector<8x512xf32>
    %548 = arith.mulf %546, %547 : vector<8x512xf32>
    %549 = arith.addf %545, %548 : vector<8x512xf32>
    %550 = vector.extract_strided_slice %549 {offsets = [0, 0], sizes = [8, 128], strides = [1, 1]} : vector<8x512xf32> to vector<8x128xf32>
    %cst_144 = arith.constant 5.000000e-01 : f32
    %551 = vector.broadcast %cst_144 : f32 to vector<8x128xf32>
    %552 = arith.mulf %551, %550 : vector<8x128xf32>
    %553 = math.tanh %552 : vector<8x128xf32>
    %cst_145 = arith.constant 5.000000e-01 : f32
    %554 = vector.broadcast %cst_145 : f32 to vector<8x128xf32>
    %555 = arith.mulf %554, %553 : vector<8x128xf32>
    %cst_146 = arith.constant 5.000000e-01 : f32
    %556 = vector.broadcast %cst_146 : f32 to vector<8x128xf32>
    %557 = arith.addf %555, %556 : vector<8x128xf32>
    %558 = vector.extract_strided_slice %549 {offsets = [0, 128], sizes = [8, 128], strides = [1, 1]} : vector<8x512xf32> to vector<8x128xf32>
    %cst_147 = arith.constant 5.000000e-01 : f32
    %559 = vector.broadcast %cst_147 : f32 to vector<8x128xf32>
    %560 = arith.mulf %559, %558 : vector<8x128xf32>
    %561 = math.tanh %560 : vector<8x128xf32>
    %cst_148 = arith.constant 5.000000e-01 : f32
    %562 = vector.broadcast %cst_148 : f32 to vector<8x128xf32>
    %563 = arith.mulf %562, %561 : vector<8x128xf32>
    %cst_149 = arith.constant 5.000000e-01 : f32
    %564 = vector.broadcast %cst_149 : f32 to vector<8x128xf32>
    %565 = arith.addf %563, %564 : vector<8x128xf32>
    %566 = vector.extract_strided_slice %549 {offsets = [0, 256], sizes = [8, 128], strides = [1, 1]} : vector<8x512xf32> to vector<8x128xf32>
    %567 = math.tanh %566 : vector<8x128xf32>
    %568 = vector.extract_strided_slice %549 {offsets = [0, 384], sizes = [8, 128], strides = [1, 1]} : vector<8x512xf32> to vector<8x128xf32>
    %cst_150 = arith.constant 5.000000e-01 : f32
    %569 = vector.broadcast %cst_150 : f32 to vector<8x128xf32>
    %570 = arith.mulf %569, %568 : vector<8x128xf32>
    %571 = math.tanh %570 : vector<8x128xf32>
    %cst_151 = arith.constant 5.000000e-01 : f32
    %572 = vector.broadcast %cst_151 : f32 to vector<8x128xf32>
    %573 = arith.mulf %572, %571 : vector<8x128xf32>
    %cst_152 = arith.constant 5.000000e-01 : f32
    %574 = vector.broadcast %cst_152 : f32 to vector<8x128xf32>
    %575 = arith.addf %573, %574 : vector<8x128xf32>
    %576 = arith.mulf %565, %534 : vector<8x128xf32>
    %577 = arith.mulf %557, %567 : vector<8x128xf32>
    %578 = arith.addf %576, %577 : vector<8x128xf32>
    %579 = math.tanh %578 : vector<8x128xf32>
    %580 = arith.mulf %575, %579 : vector<8x128xf32>
    %581 = vector.broadcast %328 : vector<1x128xf32> to vector<8x128xf32>
    %582 = arith.mulf %580, %581 : vector<8x128xf32>
    %cst_153 = arith.constant dense<0.000000e+00> : vector<8xf32>
    %583 = vector.multi_reduction <add>, %582, %cst_153 [1] : vector<8x128xf32> to vector<8xf32>
    %584 = vector.shape_cast %583 : vector<8xf32> to vector<8x1xf32>
    %585 = vector.broadcast %282 : vector<8x1xf32> to vector<8x512xf32>
    %586 = vector.broadcast %331 : vector<1x512xf32> to vector<8x512xf32>
    %587 = arith.mulf %585, %586 : vector<8x512xf32>
    %588 = vector.broadcast %334 : vector<1x512xf32> to vector<8x512xf32>
    %589 = arith.addf %587, %588 : vector<8x512xf32>
    %590 = vector.broadcast %584 : vector<8x1xf32> to vector<8x512xf32>
    %591 = vector.broadcast %325 : vector<1x512xf32> to vector<8x512xf32>
    %592 = arith.mulf %590, %591 : vector<8x512xf32>
    %593 = arith.addf %589, %592 : vector<8x512xf32>
    %594 = vector.extract_strided_slice %593 {offsets = [0, 0], sizes = [8, 128], strides = [1, 1]} : vector<8x512xf32> to vector<8x128xf32>
    %cst_154 = arith.constant 5.000000e-01 : f32
    %595 = vector.broadcast %cst_154 : f32 to vector<8x128xf32>
    %596 = arith.mulf %595, %594 : vector<8x128xf32>
    %597 = math.tanh %596 : vector<8x128xf32>
    %cst_155 = arith.constant 5.000000e-01 : f32
    %598 = vector.broadcast %cst_155 : f32 to vector<8x128xf32>
    %599 = arith.mulf %598, %597 : vector<8x128xf32>
    %cst_156 = arith.constant 5.000000e-01 : f32
    %600 = vector.broadcast %cst_156 : f32 to vector<8x128xf32>
    %601 = arith.addf %599, %600 : vector<8x128xf32>
    %602 = vector.extract_strided_slice %593 {offsets = [0, 128], sizes = [8, 128], strides = [1, 1]} : vector<8x512xf32> to vector<8x128xf32>
    %cst_157 = arith.constant 5.000000e-01 : f32
    %603 = vector.broadcast %cst_157 : f32 to vector<8x128xf32>
    %604 = arith.mulf %603, %602 : vector<8x128xf32>
    %605 = math.tanh %604 : vector<8x128xf32>
    %cst_158 = arith.constant 5.000000e-01 : f32
    %606 = vector.broadcast %cst_158 : f32 to vector<8x128xf32>
    %607 = arith.mulf %606, %605 : vector<8x128xf32>
    %cst_159 = arith.constant 5.000000e-01 : f32
    %608 = vector.broadcast %cst_159 : f32 to vector<8x128xf32>
    %609 = arith.addf %607, %608 : vector<8x128xf32>
    %610 = vector.extract_strided_slice %593 {offsets = [0, 256], sizes = [8, 128], strides = [1, 1]} : vector<8x512xf32> to vector<8x128xf32>
    %611 = math.tanh %610 : vector<8x128xf32>
    %612 = vector.extract_strided_slice %593 {offsets = [0, 384], sizes = [8, 128], strides = [1, 1]} : vector<8x512xf32> to vector<8x128xf32>
    %cst_160 = arith.constant 5.000000e-01 : f32
    %613 = vector.broadcast %cst_160 : f32 to vector<8x128xf32>
    %614 = arith.mulf %613, %612 : vector<8x128xf32>
    %615 = math.tanh %614 : vector<8x128xf32>
    %cst_161 = arith.constant 5.000000e-01 : f32
    %616 = vector.broadcast %cst_161 : f32 to vector<8x128xf32>
    %617 = arith.mulf %616, %615 : vector<8x128xf32>
    %cst_162 = arith.constant 5.000000e-01 : f32
    %618 = vector.broadcast %cst_162 : f32 to vector<8x128xf32>
    %619 = arith.addf %617, %618 : vector<8x128xf32>
    %620 = arith.mulf %609, %578 : vector<8x128xf32>
    %621 = arith.mulf %601, %611 : vector<8x128xf32>
    %622 = arith.addf %620, %621 : vector<8x128xf32>
    %623 = math.tanh %622 : vector<8x128xf32>
    %624 = arith.mulf %619, %623 : vector<8x128xf32>
    %625 = vector.broadcast %328 : vector<1x128xf32> to vector<8x128xf32>
    %626 = arith.mulf %624, %625 : vector<8x128xf32>
    %cst_163 = arith.constant dense<0.000000e+00> : vector<8xf32>
    %627 = vector.multi_reduction <add>, %626, %cst_163 [1] : vector<8x128xf32> to vector<8xf32>
    %628 = vector.shape_cast %627 : vector<8xf32> to vector<8x1xf32>
    %629 = vector.broadcast %322 : vector<8x1xf32> to vector<8x512xf32>
    %630 = vector.broadcast %331 : vector<1x512xf32> to vector<8x512xf32>
    %631 = arith.mulf %629, %630 : vector<8x512xf32>
    %632 = vector.broadcast %334 : vector<1x512xf32> to vector<8x512xf32>
    %633 = arith.addf %631, %632 : vector<8x512xf32>
    %634 = vector.broadcast %628 : vector<8x1xf32> to vector<8x512xf32>
    %635 = vector.broadcast %325 : vector<1x512xf32> to vector<8x512xf32>
    %636 = arith.mulf %634, %635 : vector<8x512xf32>
    %637 = arith.addf %633, %636 : vector<8x512xf32>
    %638 = vector.extract_strided_slice %637 {offsets = [0, 0], sizes = [8, 128], strides = [1, 1]} : vector<8x512xf32> to vector<8x128xf32>
    %cst_164 = arith.constant 5.000000e-01 : f32
    %639 = vector.broadcast %cst_164 : f32 to vector<8x128xf32>
    %640 = arith.mulf %639, %638 : vector<8x128xf32>
    %641 = math.tanh %640 : vector<8x128xf32>
    %cst_165 = arith.constant 5.000000e-01 : f32
    %642 = vector.broadcast %cst_165 : f32 to vector<8x128xf32>
    %643 = arith.mulf %642, %641 : vector<8x128xf32>
    %cst_166 = arith.constant 5.000000e-01 : f32
    %644 = vector.broadcast %cst_166 : f32 to vector<8x128xf32>
    %645 = arith.addf %643, %644 : vector<8x128xf32>
    %646 = vector.extract_strided_slice %637 {offsets = [0, 128], sizes = [8, 128], strides = [1, 1]} : vector<8x512xf32> to vector<8x128xf32>
    %cst_167 = arith.constant 5.000000e-01 : f32
    %647 = vector.broadcast %cst_167 : f32 to vector<8x128xf32>
    %648 = arith.mulf %647, %646 : vector<8x128xf32>
    %649 = math.tanh %648 : vector<8x128xf32>
    %cst_168 = arith.constant 5.000000e-01 : f32
    %650 = vector.broadcast %cst_168 : f32 to vector<8x128xf32>
    %651 = arith.mulf %650, %649 : vector<8x128xf32>
    %cst_169 = arith.constant 5.000000e-01 : f32
    %652 = vector.broadcast %cst_169 : f32 to vector<8x128xf32>
    %653 = arith.addf %651, %652 : vector<8x128xf32>
    %654 = vector.extract_strided_slice %637 {offsets = [0, 256], sizes = [8, 128], strides = [1, 1]} : vector<8x512xf32> to vector<8x128xf32>
    %655 = math.tanh %654 : vector<8x128xf32>
    %656 = vector.extract_strided_slice %637 {offsets = [0, 384], sizes = [8, 128], strides = [1, 1]} : vector<8x512xf32> to vector<8x128xf32>
    %cst_170 = arith.constant 5.000000e-01 : f32
    %657 = vector.broadcast %cst_170 : f32 to vector<8x128xf32>
    %658 = arith.mulf %657, %656 : vector<8x128xf32>
    %659 = math.tanh %658 : vector<8x128xf32>
    %cst_171 = arith.constant 5.000000e-01 : f32
    %660 = vector.broadcast %cst_171 : f32 to vector<8x128xf32>
    %661 = arith.mulf %660, %659 : vector<8x128xf32>
    %cst_172 = arith.constant 5.000000e-01 : f32
    %662 = vector.broadcast %cst_172 : f32 to vector<8x128xf32>
    %663 = arith.addf %661, %662 : vector<8x128xf32>
    %664 = arith.mulf %653, %622 : vector<8x128xf32>
    %665 = arith.mulf %645, %655 : vector<8x128xf32>
    %666 = arith.addf %664, %665 : vector<8x128xf32>
    %667 = math.tanh %666 : vector<8x128xf32>
    %668 = arith.mulf %663, %667 : vector<8x128xf32>
    %669 = vector.broadcast %328 : vector<1x128xf32> to vector<8x128xf32>
    %670 = arith.mulf %668, %669 : vector<8x128xf32>
    %cst_173 = arith.constant dense<0.000000e+00> : vector<8xf32>
    %671 = vector.multi_reduction <add>, %670, %cst_173 [1] : vector<8x128xf32> to vector<8xf32>
    %672 = vector.shape_cast %671 : vector<8xf32> to vector<8x1xf32>
    %c2 = arith.constant 2 : index
    %c0_174 = arith.constant 0 : index
    %673 = vector.load %arg6[%c2, %c0_174] : memref<5x512xf32, #tpu.memory_space<vmem>>, vector<1x512xf32>
    %674 = vector.shape_cast %673 : vector<1x512xf32> to vector<512xf32>
    %675 = vector.shape_cast %674 : vector<512xf32> to vector<1x512xf32>
    %c2_175 = arith.constant 2 : index
    %c0_176 = arith.constant 0 : index
    %676 = vector.load %arg8[%c2_175, %c0_176] : memref<5x128xf32, #tpu.memory_space<vmem>>, vector<1x128xf32>
    %677 = vector.shape_cast %676 : vector<1x128xf32> to vector<128xf32>
    %678 = vector.shape_cast %677 : vector<128xf32> to vector<1x128xf32>
    %c1_177 = arith.constant 1 : index
    %c0_178 = arith.constant 0 : index
    %679 = vector.load %arg5[%c1_177, %c0_178] : memref<4x512xf32, #tpu.memory_space<vmem>>, vector<1x512xf32>
    %680 = vector.shape_cast %679 : vector<1x512xf32> to vector<512xf32>
    %681 = vector.shape_cast %680 : vector<512xf32> to vector<1x512xf32>
    %c2_179 = arith.constant 2 : index
    %c0_180 = arith.constant 0 : index
    %682 = vector.load %arg7[%c2_179, %c0_180] : memref<5x512xf32, #tpu.memory_space<vmem>>, vector<1x512xf32>
    %683 = vector.shape_cast %682 : vector<1x512xf32> to vector<512xf32>
    %684 = vector.shape_cast %683 : vector<512xf32> to vector<1x512xf32>
    %685 = vector.broadcast %364 : vector<8x1xf32> to vector<8x512xf32>
    %686 = vector.broadcast %681 : vector<1x512xf32> to vector<8x512xf32>
    %687 = arith.mulf %685, %686 : vector<8x512xf32>
    %688 = vector.broadcast %684 : vector<1x512xf32> to vector<8x512xf32>
    %689 = arith.addf %687, %688 : vector<8x512xf32>
    %690 = vector.extract_strided_slice %689 {offsets = [0, 0], sizes = [8, 128], strides = [1, 1]} : vector<8x512xf32> to vector<8x128xf32>
    %cst_181 = arith.constant 5.000000e-01 : f32
    %691 = vector.broadcast %cst_181 : f32 to vector<8x128xf32>
    %692 = arith.mulf %691, %690 : vector<8x128xf32>
    %693 = math.tanh %692 : vector<8x128xf32>
    %cst_182 = arith.constant 5.000000e-01 : f32
    %694 = vector.broadcast %cst_182 : f32 to vector<8x128xf32>
    %695 = arith.mulf %694, %693 : vector<8x128xf32>
    %cst_183 = arith.constant 5.000000e-01 : f32
    %696 = vector.broadcast %cst_183 : f32 to vector<8x128xf32>
    %697 = arith.addf %695, %696 : vector<8x128xf32>
    %698 = vector.extract_strided_slice %689 {offsets = [0, 256], sizes = [8, 128], strides = [1, 1]} : vector<8x512xf32> to vector<8x128xf32>
    %699 = math.tanh %698 : vector<8x128xf32>
    %700 = vector.extract_strided_slice %689 {offsets = [0, 384], sizes = [8, 128], strides = [1, 1]} : vector<8x512xf32> to vector<8x128xf32>
    %cst_184 = arith.constant 5.000000e-01 : f32
    %701 = vector.broadcast %cst_184 : f32 to vector<8x128xf32>
    %702 = arith.mulf %701, %700 : vector<8x128xf32>
    %703 = math.tanh %702 : vector<8x128xf32>
    %cst_185 = arith.constant 5.000000e-01 : f32
    %704 = vector.broadcast %cst_185 : f32 to vector<8x128xf32>
    %705 = arith.mulf %704, %703 : vector<8x128xf32>
    %cst_186 = arith.constant 5.000000e-01 : f32
    %706 = vector.broadcast %cst_186 : f32 to vector<8x128xf32>
    %707 = arith.addf %705, %706 : vector<8x128xf32>
    %708 = arith.mulf %697, %699 : vector<8x128xf32>
    %709 = math.tanh %708 : vector<8x128xf32>
    %710 = arith.mulf %707, %709 : vector<8x128xf32>
    %711 = vector.broadcast %678 : vector<1x128xf32> to vector<8x128xf32>
    %712 = arith.mulf %710, %711 : vector<8x128xf32>
    %cst_187 = arith.constant dense<0.000000e+00> : vector<8xf32>
    %713 = vector.multi_reduction <add>, %712, %cst_187 [1] : vector<8x128xf32> to vector<8xf32>
    %714 = vector.shape_cast %713 : vector<8xf32> to vector<8x1xf32>
    %715 = vector.broadcast %408 : vector<8x1xf32> to vector<8x512xf32>
    %716 = vector.broadcast %681 : vector<1x512xf32> to vector<8x512xf32>
    %717 = arith.mulf %715, %716 : vector<8x512xf32>
    %718 = vector.broadcast %684 : vector<1x512xf32> to vector<8x512xf32>
    %719 = arith.addf %717, %718 : vector<8x512xf32>
    %720 = vector.broadcast %714 : vector<8x1xf32> to vector<8x512xf32>
    %721 = vector.broadcast %675 : vector<1x512xf32> to vector<8x512xf32>
    %722 = arith.mulf %720, %721 : vector<8x512xf32>
    %723 = arith.addf %719, %722 : vector<8x512xf32>
    %724 = vector.extract_strided_slice %723 {offsets = [0, 0], sizes = [8, 128], strides = [1, 1]} : vector<8x512xf32> to vector<8x128xf32>
    %cst_188 = arith.constant 5.000000e-01 : f32
    %725 = vector.broadcast %cst_188 : f32 to vector<8x128xf32>
    %726 = arith.mulf %725, %724 : vector<8x128xf32>
    %727 = math.tanh %726 : vector<8x128xf32>
    %cst_189 = arith.constant 5.000000e-01 : f32
    %728 = vector.broadcast %cst_189 : f32 to vector<8x128xf32>
    %729 = arith.mulf %728, %727 : vector<8x128xf32>
    %cst_190 = arith.constant 5.000000e-01 : f32
    %730 = vector.broadcast %cst_190 : f32 to vector<8x128xf32>
    %731 = arith.addf %729, %730 : vector<8x128xf32>
    %732 = vector.extract_strided_slice %723 {offsets = [0, 128], sizes = [8, 128], strides = [1, 1]} : vector<8x512xf32> to vector<8x128xf32>
    %cst_191 = arith.constant 5.000000e-01 : f32
    %733 = vector.broadcast %cst_191 : f32 to vector<8x128xf32>
    %734 = arith.mulf %733, %732 : vector<8x128xf32>
    %735 = math.tanh %734 : vector<8x128xf32>
    %cst_192 = arith.constant 5.000000e-01 : f32
    %736 = vector.broadcast %cst_192 : f32 to vector<8x128xf32>
    %737 = arith.mulf %736, %735 : vector<8x128xf32>
    %cst_193 = arith.constant 5.000000e-01 : f32
    %738 = vector.broadcast %cst_193 : f32 to vector<8x128xf32>
    %739 = arith.addf %737, %738 : vector<8x128xf32>
    %740 = vector.extract_strided_slice %723 {offsets = [0, 256], sizes = [8, 128], strides = [1, 1]} : vector<8x512xf32> to vector<8x128xf32>
    %741 = math.tanh %740 : vector<8x128xf32>
    %742 = vector.extract_strided_slice %723 {offsets = [0, 384], sizes = [8, 128], strides = [1, 1]} : vector<8x512xf32> to vector<8x128xf32>
    %cst_194 = arith.constant 5.000000e-01 : f32
    %743 = vector.broadcast %cst_194 : f32 to vector<8x128xf32>
    %744 = arith.mulf %743, %742 : vector<8x128xf32>
    %745 = math.tanh %744 : vector<8x128xf32>
    %cst_195 = arith.constant 5.000000e-01 : f32
    %746 = vector.broadcast %cst_195 : f32 to vector<8x128xf32>
    %747 = arith.mulf %746, %745 : vector<8x128xf32>
    %cst_196 = arith.constant 5.000000e-01 : f32
    %748 = vector.broadcast %cst_196 : f32 to vector<8x128xf32>
    %749 = arith.addf %747, %748 : vector<8x128xf32>
    %750 = arith.mulf %739, %708 : vector<8x128xf32>
    %751 = arith.mulf %731, %741 : vector<8x128xf32>
    %752 = arith.addf %750, %751 : vector<8x128xf32>
    %753 = math.tanh %752 : vector<8x128xf32>
    %754 = arith.mulf %749, %753 : vector<8x128xf32>
    %755 = vector.broadcast %678 : vector<1x128xf32> to vector<8x128xf32>
    %756 = arith.mulf %754, %755 : vector<8x128xf32>
    %cst_197 = arith.constant dense<0.000000e+00> : vector<8xf32>
    %757 = vector.multi_reduction <add>, %756, %cst_197 [1] : vector<8x128xf32> to vector<8xf32>
    %758 = vector.shape_cast %757 : vector<8xf32> to vector<8x1xf32>
    %759 = vector.broadcast %452 : vector<8x1xf32> to vector<8x512xf32>
    %760 = vector.broadcast %681 : vector<1x512xf32> to vector<8x512xf32>
    %761 = arith.mulf %759, %760 : vector<8x512xf32>
    %762 = vector.broadcast %684 : vector<1x512xf32> to vector<8x512xf32>
    %763 = arith.addf %761, %762 : vector<8x512xf32>
    %764 = vector.broadcast %758 : vector<8x1xf32> to vector<8x512xf32>
    %765 = vector.broadcast %675 : vector<1x512xf32> to vector<8x512xf32>
    %766 = arith.mulf %764, %765 : vector<8x512xf32>
    %767 = arith.addf %763, %766 : vector<8x512xf32>
    %768 = vector.extract_strided_slice %767 {offsets = [0, 0], sizes = [8, 128], strides = [1, 1]} : vector<8x512xf32> to vector<8x128xf32>
    %cst_198 = arith.constant 5.000000e-01 : f32
    %769 = vector.broadcast %cst_198 : f32 to vector<8x128xf32>
    %770 = arith.mulf %769, %768 : vector<8x128xf32>
    %771 = math.tanh %770 : vector<8x128xf32>
    %cst_199 = arith.constant 5.000000e-01 : f32
    %772 = vector.broadcast %cst_199 : f32 to vector<8x128xf32>
    %773 = arith.mulf %772, %771 : vector<8x128xf32>
    %cst_200 = arith.constant 5.000000e-01 : f32
    %774 = vector.broadcast %cst_200 : f32 to vector<8x128xf32>
    %775 = arith.addf %773, %774 : vector<8x128xf32>
    %776 = vector.extract_strided_slice %767 {offsets = [0, 128], sizes = [8, 128], strides = [1, 1]} : vector<8x512xf32> to vector<8x128xf32>
    %cst_201 = arith.constant 5.000000e-01 : f32
    %777 = vector.broadcast %cst_201 : f32 to vector<8x128xf32>
    %778 = arith.mulf %777, %776 : vector<8x128xf32>
    %779 = math.tanh %778 : vector<8x128xf32>
    %cst_202 = arith.constant 5.000000e-01 : f32
    %780 = vector.broadcast %cst_202 : f32 to vector<8x128xf32>
    %781 = arith.mulf %780, %779 : vector<8x128xf32>
    %cst_203 = arith.constant 5.000000e-01 : f32
    %782 = vector.broadcast %cst_203 : f32 to vector<8x128xf32>
    %783 = arith.addf %781, %782 : vector<8x128xf32>
    %784 = vector.extract_strided_slice %767 {offsets = [0, 256], sizes = [8, 128], strides = [1, 1]} : vector<8x512xf32> to vector<8x128xf32>
    %785 = math.tanh %784 : vector<8x128xf32>
    %786 = vector.extract_strided_slice %767 {offsets = [0, 384], sizes = [8, 128], strides = [1, 1]} : vector<8x512xf32> to vector<8x128xf32>
    %cst_204 = arith.constant 5.000000e-01 : f32
    %787 = vector.broadcast %cst_204 : f32 to vector<8x128xf32>
    %788 = arith.mulf %787, %786 : vector<8x128xf32>
    %789 = math.tanh %788 : vector<8x128xf32>
    %cst_205 = arith.constant 5.000000e-01 : f32
    %790 = vector.broadcast %cst_205 : f32 to vector<8x128xf32>
    %791 = arith.mulf %790, %789 : vector<8x128xf32>
    %cst_206 = arith.constant 5.000000e-01 : f32
    %792 = vector.broadcast %cst_206 : f32 to vector<8x128xf32>
    %793 = arith.addf %791, %792 : vector<8x128xf32>
    %794 = arith.mulf %783, %752 : vector<8x128xf32>
    %795 = arith.mulf %775, %785 : vector<8x128xf32>
    %796 = arith.addf %794, %795 : vector<8x128xf32>
    %797 = math.tanh %796 : vector<8x128xf32>
    %798 = arith.mulf %793, %797 : vector<8x128xf32>
    %799 = vector.broadcast %678 : vector<1x128xf32> to vector<8x128xf32>
    %800 = arith.mulf %798, %799 : vector<8x128xf32>
    %cst_207 = arith.constant dense<0.000000e+00> : vector<8xf32>
    %801 = vector.multi_reduction <add>, %800, %cst_207 [1] : vector<8x128xf32> to vector<8xf32>
    %802 = vector.shape_cast %801 : vector<8xf32> to vector<8x1xf32>
    %803 = vector.broadcast %496 : vector<8x1xf32> to vector<8x512xf32>
    %804 = vector.broadcast %681 : vector<1x512xf32> to vector<8x512xf32>
    %805 = arith.mulf %803, %804 : vector<8x512xf32>
    %806 = vector.broadcast %684 : vector<1x512xf32> to vector<8x512xf32>
    %807 = arith.addf %805, %806 : vector<8x512xf32>
    %808 = vector.broadcast %802 : vector<8x1xf32> to vector<8x512xf32>
    %809 = vector.broadcast %675 : vector<1x512xf32> to vector<8x512xf32>
    %810 = arith.mulf %808, %809 : vector<8x512xf32>
    %811 = arith.addf %807, %810 : vector<8x512xf32>
    %812 = vector.extract_strided_slice %811 {offsets = [0, 0], sizes = [8, 128], strides = [1, 1]} : vector<8x512xf32> to vector<8x128xf32>
    %cst_208 = arith.constant 5.000000e-01 : f32
    %813 = vector.broadcast %cst_208 : f32 to vector<8x128xf32>
    %814 = arith.mulf %813, %812 : vector<8x128xf32>
    %815 = math.tanh %814 : vector<8x128xf32>
    %cst_209 = arith.constant 5.000000e-01 : f32
    %816 = vector.broadcast %cst_209 : f32 to vector<8x128xf32>
    %817 = arith.mulf %816, %815 : vector<8x128xf32>
    %cst_210 = arith.constant 5.000000e-01 : f32
    %818 = vector.broadcast %cst_210 : f32 to vector<8x128xf32>
    %819 = arith.addf %817, %818 : vector<8x128xf32>
    %820 = vector.extract_strided_slice %811 {offsets = [0, 128], sizes = [8, 128], strides = [1, 1]} : vector<8x512xf32> to vector<8x128xf32>
    %cst_211 = arith.constant 5.000000e-01 : f32
    %821 = vector.broadcast %cst_211 : f32 to vector<8x128xf32>
    %822 = arith.mulf %821, %820 : vector<8x128xf32>
    %823 = math.tanh %822 : vector<8x128xf32>
    %cst_212 = arith.constant 5.000000e-01 : f32
    %824 = vector.broadcast %cst_212 : f32 to vector<8x128xf32>
    %825 = arith.mulf %824, %823 : vector<8x128xf32>
    %cst_213 = arith.constant 5.000000e-01 : f32
    %826 = vector.broadcast %cst_213 : f32 to vector<8x128xf32>
    %827 = arith.addf %825, %826 : vector<8x128xf32>
    %828 = vector.extract_strided_slice %811 {offsets = [0, 256], sizes = [8, 128], strides = [1, 1]} : vector<8x512xf32> to vector<8x128xf32>
    %829 = math.tanh %828 : vector<8x128xf32>
    %830 = vector.extract_strided_slice %811 {offsets = [0, 384], sizes = [8, 128], strides = [1, 1]} : vector<8x512xf32> to vector<8x128xf32>
    %cst_214 = arith.constant 5.000000e-01 : f32
    %831 = vector.broadcast %cst_214 : f32 to vector<8x128xf32>
    %832 = arith.mulf %831, %830 : vector<8x128xf32>
    %833 = math.tanh %832 : vector<8x128xf32>
    %cst_215 = arith.constant 5.000000e-01 : f32
    %834 = vector.broadcast %cst_215 : f32 to vector<8x128xf32>
    %835 = arith.mulf %834, %833 : vector<8x128xf32>
    %cst_216 = arith.constant 5.000000e-01 : f32
    %836 = vector.broadcast %cst_216 : f32 to vector<8x128xf32>
    %837 = arith.addf %835, %836 : vector<8x128xf32>
    %838 = arith.mulf %827, %796 : vector<8x128xf32>
    %839 = arith.mulf %819, %829 : vector<8x128xf32>
    %840 = arith.addf %838, %839 : vector<8x128xf32>
    %841 = math.tanh %840 : vector<8x128xf32>
    %842 = arith.mulf %837, %841 : vector<8x128xf32>
    %843 = vector.broadcast %678 : vector<1x128xf32> to vector<8x128xf32>
    %844 = arith.mulf %842, %843 : vector<8x128xf32>
    %cst_217 = arith.constant dense<0.000000e+00> : vector<8xf32>
    %845 = vector.multi_reduction <add>, %844, %cst_217 [1] : vector<8x128xf32> to vector<8xf32>
    %846 = vector.shape_cast %845 : vector<8xf32> to vector<8x1xf32>
    %847 = vector.broadcast %540 : vector<8x1xf32> to vector<8x512xf32>
    %848 = vector.broadcast %681 : vector<1x512xf32> to vector<8x512xf32>
    %849 = arith.mulf %847, %848 : vector<8x512xf32>
    %850 = vector.broadcast %684 : vector<1x512xf32> to vector<8x512xf32>
    %851 = arith.addf %849, %850 : vector<8x512xf32>
    %852 = vector.broadcast %846 : vector<8x1xf32> to vector<8x512xf32>
    %853 = vector.broadcast %675 : vector<1x512xf32> to vector<8x512xf32>
    %854 = arith.mulf %852, %853 : vector<8x512xf32>
    %855 = arith.addf %851, %854 : vector<8x512xf32>
    %856 = vector.extract_strided_slice %855 {offsets = [0, 0], sizes = [8, 128], strides = [1, 1]} : vector<8x512xf32> to vector<8x128xf32>
    %cst_218 = arith.constant 5.000000e-01 : f32
    %857 = vector.broadcast %cst_218 : f32 to vector<8x128xf32>
    %858 = arith.mulf %857, %856 : vector<8x128xf32>
    %859 = math.tanh %858 : vector<8x128xf32>
    %cst_219 = arith.constant 5.000000e-01 : f32
    %860 = vector.broadcast %cst_219 : f32 to vector<8x128xf32>
    %861 = arith.mulf %860, %859 : vector<8x128xf32>
    %cst_220 = arith.constant 5.000000e-01 : f32
    %862 = vector.broadcast %cst_220 : f32 to vector<8x128xf32>
    %863 = arith.addf %861, %862 : vector<8x128xf32>
    %864 = vector.extract_strided_slice %855 {offsets = [0, 128], sizes = [8, 128], strides = [1, 1]} : vector<8x512xf32> to vector<8x128xf32>
    %cst_221 = arith.constant 5.000000e-01 : f32
    %865 = vector.broadcast %cst_221 : f32 to vector<8x128xf32>
    %866 = arith.mulf %865, %864 : vector<8x128xf32>
    %867 = math.tanh %866 : vector<8x128xf32>
    %cst_222 = arith.constant 5.000000e-01 : f32
    %868 = vector.broadcast %cst_222 : f32 to vector<8x128xf32>
    %869 = arith.mulf %868, %867 : vector<8x128xf32>
    %cst_223 = arith.constant 5.000000e-01 : f32
    %870 = vector.broadcast %cst_223 : f32 to vector<8x128xf32>
    %871 = arith.addf %869, %870 : vector<8x128xf32>
    %872 = vector.extract_strided_slice %855 {offsets = [0, 256], sizes = [8, 128], strides = [1, 1]} : vector<8x512xf32> to vector<8x128xf32>
    %873 = math.tanh %872 : vector<8x128xf32>
    %874 = vector.extract_strided_slice %855 {offsets = [0, 384], sizes = [8, 128], strides = [1, 1]} : vector<8x512xf32> to vector<8x128xf32>
    %cst_224 = arith.constant 5.000000e-01 : f32
    %875 = vector.broadcast %cst_224 : f32 to vector<8x128xf32>
    %876 = arith.mulf %875, %874 : vector<8x128xf32>
    %877 = math.tanh %876 : vector<8x128xf32>
    %cst_225 = arith.constant 5.000000e-01 : f32
    %878 = vector.broadcast %cst_225 : f32 to vector<8x128xf32>
    %879 = arith.mulf %878, %877 : vector<8x128xf32>
    %cst_226 = arith.constant 5.000000e-01 : f32
    %880 = vector.broadcast %cst_226 : f32 to vector<8x128xf32>
    %881 = arith.addf %879, %880 : vector<8x128xf32>
    %882 = arith.mulf %871, %840 : vector<8x128xf32>
    %883 = arith.mulf %863, %873 : vector<8x128xf32>
    %884 = arith.addf %882, %883 : vector<8x128xf32>
    %885 = math.tanh %884 : vector<8x128xf32>
    %886 = arith.mulf %881, %885 : vector<8x128xf32>
    %887 = vector.broadcast %678 : vector<1x128xf32> to vector<8x128xf32>
    %888 = arith.mulf %886, %887 : vector<8x128xf32>
    %cst_227 = arith.constant dense<0.000000e+00> : vector<8xf32>
    %889 = vector.multi_reduction <add>, %888, %cst_227 [1] : vector<8x128xf32> to vector<8xf32>
    %890 = vector.shape_cast %889 : vector<8xf32> to vector<8x1xf32>
    %891 = vector.broadcast %584 : vector<8x1xf32> to vector<8x512xf32>
    %892 = vector.broadcast %681 : vector<1x512xf32> to vector<8x512xf32>
    %893 = arith.mulf %891, %892 : vector<8x512xf32>
    %894 = vector.broadcast %684 : vector<1x512xf32> to vector<8x512xf32>
    %895 = arith.addf %893, %894 : vector<8x512xf32>
    %896 = vector.broadcast %890 : vector<8x1xf32> to vector<8x512xf32>
    %897 = vector.broadcast %675 : vector<1x512xf32> to vector<8x512xf32>
    %898 = arith.mulf %896, %897 : vector<8x512xf32>
    %899 = arith.addf %895, %898 : vector<8x512xf32>
    %900 = vector.extract_strided_slice %899 {offsets = [0, 0], sizes = [8, 128], strides = [1, 1]} : vector<8x512xf32> to vector<8x128xf32>
    %cst_228 = arith.constant 5.000000e-01 : f32
    %901 = vector.broadcast %cst_228 : f32 to vector<8x128xf32>
    %902 = arith.mulf %901, %900 : vector<8x128xf32>
    %903 = math.tanh %902 : vector<8x128xf32>
    %cst_229 = arith.constant 5.000000e-01 : f32
    %904 = vector.broadcast %cst_229 : f32 to vector<8x128xf32>
    %905 = arith.mulf %904, %903 : vector<8x128xf32>
    %cst_230 = arith.constant 5.000000e-01 : f32
    %906 = vector.broadcast %cst_230 : f32 to vector<8x128xf32>
    %907 = arith.addf %905, %906 : vector<8x128xf32>
    %908 = vector.extract_strided_slice %899 {offsets = [0, 128], sizes = [8, 128], strides = [1, 1]} : vector<8x512xf32> to vector<8x128xf32>
    %cst_231 = arith.constant 5.000000e-01 : f32
    %909 = vector.broadcast %cst_231 : f32 to vector<8x128xf32>
    %910 = arith.mulf %909, %908 : vector<8x128xf32>
    %911 = math.tanh %910 : vector<8x128xf32>
    %cst_232 = arith.constant 5.000000e-01 : f32
    %912 = vector.broadcast %cst_232 : f32 to vector<8x128xf32>
    %913 = arith.mulf %912, %911 : vector<8x128xf32>
    %cst_233 = arith.constant 5.000000e-01 : f32
    %914 = vector.broadcast %cst_233 : f32 to vector<8x128xf32>
    %915 = arith.addf %913, %914 : vector<8x128xf32>
    %916 = vector.extract_strided_slice %899 {offsets = [0, 256], sizes = [8, 128], strides = [1, 1]} : vector<8x512xf32> to vector<8x128xf32>
    %917 = math.tanh %916 : vector<8x128xf32>
    %918 = vector.extract_strided_slice %899 {offsets = [0, 384], sizes = [8, 128], strides = [1, 1]} : vector<8x512xf32> to vector<8x128xf32>
    %cst_234 = arith.constant 5.000000e-01 : f32
    %919 = vector.broadcast %cst_234 : f32 to vector<8x128xf32>
    %920 = arith.mulf %919, %918 : vector<8x128xf32>
    %921 = math.tanh %920 : vector<8x128xf32>
    %cst_235 = arith.constant 5.000000e-01 : f32
    %922 = vector.broadcast %cst_235 : f32 to vector<8x128xf32>
    %923 = arith.mulf %922, %921 : vector<8x128xf32>
    %cst_236 = arith.constant 5.000000e-01 : f32
    %924 = vector.broadcast %cst_236 : f32 to vector<8x128xf32>
    %925 = arith.addf %923, %924 : vector<8x128xf32>
    %926 = arith.mulf %915, %884 : vector<8x128xf32>
    %927 = arith.mulf %907, %917 : vector<8x128xf32>
    %928 = arith.addf %926, %927 : vector<8x128xf32>
    %929 = math.tanh %928 : vector<8x128xf32>
    %930 = arith.mulf %925, %929 : vector<8x128xf32>
    %931 = vector.broadcast %678 : vector<1x128xf32> to vector<8x128xf32>
    %932 = arith.mulf %930, %931 : vector<8x128xf32>
    %cst_237 = arith.constant dense<0.000000e+00> : vector<8xf32>
    %933 = vector.multi_reduction <add>, %932, %cst_237 [1] : vector<8x128xf32> to vector<8xf32>
    %934 = vector.shape_cast %933 : vector<8xf32> to vector<8x1xf32>
    %935 = vector.broadcast %628 : vector<8x1xf32> to vector<8x512xf32>
    %936 = vector.broadcast %681 : vector<1x512xf32> to vector<8x512xf32>
    %937 = arith.mulf %935, %936 : vector<8x512xf32>
    %938 = vector.broadcast %684 : vector<1x512xf32> to vector<8x512xf32>
    %939 = arith.addf %937, %938 : vector<8x512xf32>
    %940 = vector.broadcast %934 : vector<8x1xf32> to vector<8x512xf32>
    %941 = vector.broadcast %675 : vector<1x512xf32> to vector<8x512xf32>
    %942 = arith.mulf %940, %941 : vector<8x512xf32>
    %943 = arith.addf %939, %942 : vector<8x512xf32>
    %944 = vector.extract_strided_slice %943 {offsets = [0, 0], sizes = [8, 128], strides = [1, 1]} : vector<8x512xf32> to vector<8x128xf32>
    %cst_238 = arith.constant 5.000000e-01 : f32
    %945 = vector.broadcast %cst_238 : f32 to vector<8x128xf32>
    %946 = arith.mulf %945, %944 : vector<8x128xf32>
    %947 = math.tanh %946 : vector<8x128xf32>
    %cst_239 = arith.constant 5.000000e-01 : f32
    %948 = vector.broadcast %cst_239 : f32 to vector<8x128xf32>
    %949 = arith.mulf %948, %947 : vector<8x128xf32>
    %cst_240 = arith.constant 5.000000e-01 : f32
    %950 = vector.broadcast %cst_240 : f32 to vector<8x128xf32>
    %951 = arith.addf %949, %950 : vector<8x128xf32>
    %952 = vector.extract_strided_slice %943 {offsets = [0, 128], sizes = [8, 128], strides = [1, 1]} : vector<8x512xf32> to vector<8x128xf32>
    %cst_241 = arith.constant 5.000000e-01 : f32
    %953 = vector.broadcast %cst_241 : f32 to vector<8x128xf32>
    %954 = arith.mulf %953, %952 : vector<8x128xf32>
    %955 = math.tanh %954 : vector<8x128xf32>
    %cst_242 = arith.constant 5.000000e-01 : f32
    %956 = vector.broadcast %cst_242 : f32 to vector<8x128xf32>
    %957 = arith.mulf %956, %955 : vector<8x128xf32>
    %cst_243 = arith.constant 5.000000e-01 : f32
    %958 = vector.broadcast %cst_243 : f32 to vector<8x128xf32>
    %959 = arith.addf %957, %958 : vector<8x128xf32>
    %960 = vector.extract_strided_slice %943 {offsets = [0, 256], sizes = [8, 128], strides = [1, 1]} : vector<8x512xf32> to vector<8x128xf32>
    %961 = math.tanh %960 : vector<8x128xf32>
    %962 = vector.extract_strided_slice %943 {offsets = [0, 384], sizes = [8, 128], strides = [1, 1]} : vector<8x512xf32> to vector<8x128xf32>
    %cst_244 = arith.constant 5.000000e-01 : f32
    %963 = vector.broadcast %cst_244 : f32 to vector<8x128xf32>
    %964 = arith.mulf %963, %962 : vector<8x128xf32>
    %965 = math.tanh %964 : vector<8x128xf32>
    %cst_245 = arith.constant 5.000000e-01 : f32
    %966 = vector.broadcast %cst_245 : f32 to vector<8x128xf32>
    %967 = arith.mulf %966, %965 : vector<8x128xf32>
    %cst_246 = arith.constant 5.000000e-01 : f32
    %968 = vector.broadcast %cst_246 : f32 to vector<8x128xf32>
    %969 = arith.addf %967, %968 : vector<8x128xf32>
    %970 = arith.mulf %959, %928 : vector<8x128xf32>
    %971 = arith.mulf %951, %961 : vector<8x128xf32>
    %972 = arith.addf %970, %971 : vector<8x128xf32>
    %973 = math.tanh %972 : vector<8x128xf32>
    %974 = arith.mulf %969, %973 : vector<8x128xf32>
    %975 = vector.broadcast %678 : vector<1x128xf32> to vector<8x128xf32>
    %976 = arith.mulf %974, %975 : vector<8x128xf32>
    %cst_247 = arith.constant dense<0.000000e+00> : vector<8xf32>
    %977 = vector.multi_reduction <add>, %976, %cst_247 [1] : vector<8x128xf32> to vector<8xf32>
    %978 = vector.shape_cast %977 : vector<8xf32> to vector<8x1xf32>
    %979 = vector.broadcast %672 : vector<8x1xf32> to vector<8x512xf32>
    %980 = vector.broadcast %681 : vector<1x512xf32> to vector<8x512xf32>
    %981 = arith.mulf %979, %980 : vector<8x512xf32>
    %982 = vector.broadcast %684 : vector<1x512xf32> to vector<8x512xf32>
    %983 = arith.addf %981, %982 : vector<8x512xf32>
    %984 = vector.broadcast %978 : vector<8x1xf32> to vector<8x512xf32>
    %985 = vector.broadcast %675 : vector<1x512xf32> to vector<8x512xf32>
    %986 = arith.mulf %984, %985 : vector<8x512xf32>
    %987 = arith.addf %983, %986 : vector<8x512xf32>
    %988 = vector.extract_strided_slice %987 {offsets = [0, 0], sizes = [8, 128], strides = [1, 1]} : vector<8x512xf32> to vector<8x128xf32>
    %cst_248 = arith.constant 5.000000e-01 : f32
    %989 = vector.broadcast %cst_248 : f32 to vector<8x128xf32>
    %990 = arith.mulf %989, %988 : vector<8x128xf32>
    %991 = math.tanh %990 : vector<8x128xf32>
    %cst_249 = arith.constant 5.000000e-01 : f32
    %992 = vector.broadcast %cst_249 : f32 to vector<8x128xf32>
    %993 = arith.mulf %992, %991 : vector<8x128xf32>
    %cst_250 = arith.constant 5.000000e-01 : f32
    %994 = vector.broadcast %cst_250 : f32 to vector<8x128xf32>
    %995 = arith.addf %993, %994 : vector<8x128xf32>
    %996 = vector.extract_strided_slice %987 {offsets = [0, 128], sizes = [8, 128], strides = [1, 1]} : vector<8x512xf32> to vector<8x128xf32>
    %cst_251 = arith.constant 5.000000e-01 : f32
    %997 = vector.broadcast %cst_251 : f32 to vector<8x128xf32>
    %998 = arith.mulf %997, %996 : vector<8x128xf32>
    %999 = math.tanh %998 : vector<8x128xf32>
    %cst_252 = arith.constant 5.000000e-01 : f32
    %1000 = vector.broadcast %cst_252 : f32 to vector<8x128xf32>
    %1001 = arith.mulf %1000, %999 : vector<8x128xf32>
    %cst_253 = arith.constant 5.000000e-01 : f32
    %1002 = vector.broadcast %cst_253 : f32 to vector<8x128xf32>
    %1003 = arith.addf %1001, %1002 : vector<8x128xf32>
    %1004 = vector.extract_strided_slice %987 {offsets = [0, 256], sizes = [8, 128], strides = [1, 1]} : vector<8x512xf32> to vector<8x128xf32>
    %1005 = math.tanh %1004 : vector<8x128xf32>
    %1006 = vector.extract_strided_slice %987 {offsets = [0, 384], sizes = [8, 128], strides = [1, 1]} : vector<8x512xf32> to vector<8x128xf32>
    %cst_254 = arith.constant 5.000000e-01 : f32
    %1007 = vector.broadcast %cst_254 : f32 to vector<8x128xf32>
    %1008 = arith.mulf %1007, %1006 : vector<8x128xf32>
    %1009 = math.tanh %1008 : vector<8x128xf32>
    %cst_255 = arith.constant 5.000000e-01 : f32
    %1010 = vector.broadcast %cst_255 : f32 to vector<8x128xf32>
    %1011 = arith.mulf %1010, %1009 : vector<8x128xf32>
    %cst_256 = arith.constant 5.000000e-01 : f32
    %1012 = vector.broadcast %cst_256 : f32 to vector<8x128xf32>
    %1013 = arith.addf %1011, %1012 : vector<8x128xf32>
    %1014 = arith.mulf %1003, %972 : vector<8x128xf32>
    %1015 = arith.mulf %995, %1005 : vector<8x128xf32>
    %1016 = arith.addf %1014, %1015 : vector<8x128xf32>
    %1017 = math.tanh %1016 : vector<8x128xf32>
    %1018 = arith.mulf %1013, %1017 : vector<8x128xf32>
    %1019 = vector.broadcast %678 : vector<1x128xf32> to vector<8x128xf32>
    %1020 = arith.mulf %1018, %1019 : vector<8x128xf32>
    %cst_257 = arith.constant dense<0.000000e+00> : vector<8xf32>
    %1021 = vector.multi_reduction <add>, %1020, %cst_257 [1] : vector<8x128xf32> to vector<8xf32>
    %1022 = vector.shape_cast %1021 : vector<8xf32> to vector<8x1xf32>
    %c3 = arith.constant 3 : index
    %c0_258 = arith.constant 0 : index
    %1023 = vector.load %arg6[%c3, %c0_258] : memref<5x512xf32, #tpu.memory_space<vmem>>, vector<1x512xf32>
    %1024 = vector.shape_cast %1023 : vector<1x512xf32> to vector<512xf32>
    %1025 = vector.shape_cast %1024 : vector<512xf32> to vector<1x512xf32>
    %c3_259 = arith.constant 3 : index
    %c0_260 = arith.constant 0 : index
    %1026 = vector.load %arg8[%c3_259, %c0_260] : memref<5x128xf32, #tpu.memory_space<vmem>>, vector<1x128xf32>
    %1027 = vector.shape_cast %1026 : vector<1x128xf32> to vector<128xf32>
    %1028 = vector.shape_cast %1027 : vector<128xf32> to vector<1x128xf32>
    %c2_261 = arith.constant 2 : index
    %c0_262 = arith.constant 0 : index
    %1029 = vector.load %arg5[%c2_261, %c0_262] : memref<4x512xf32, #tpu.memory_space<vmem>>, vector<1x512xf32>
    %1030 = vector.shape_cast %1029 : vector<1x512xf32> to vector<512xf32>
    %1031 = vector.shape_cast %1030 : vector<512xf32> to vector<1x512xf32>
    %c3_263 = arith.constant 3 : index
    %c0_264 = arith.constant 0 : index
    %1032 = vector.load %arg7[%c3_263, %c0_264] : memref<5x512xf32, #tpu.memory_space<vmem>>, vector<1x512xf32>
    %1033 = vector.shape_cast %1032 : vector<1x512xf32> to vector<512xf32>
    %1034 = vector.shape_cast %1033 : vector<512xf32> to vector<1x512xf32>
    %1035 = vector.broadcast %714 : vector<8x1xf32> to vector<8x512xf32>
    %1036 = vector.broadcast %1031 : vector<1x512xf32> to vector<8x512xf32>
    %1037 = arith.mulf %1035, %1036 : vector<8x512xf32>
    %1038 = vector.broadcast %1034 : vector<1x512xf32> to vector<8x512xf32>
    %1039 = arith.addf %1037, %1038 : vector<8x512xf32>
    %1040 = vector.extract_strided_slice %1039 {offsets = [0, 0], sizes = [8, 128], strides = [1, 1]} : vector<8x512xf32> to vector<8x128xf32>
    %cst_265 = arith.constant 5.000000e-01 : f32
    %1041 = vector.broadcast %cst_265 : f32 to vector<8x128xf32>
    %1042 = arith.mulf %1041, %1040 : vector<8x128xf32>
    %1043 = math.tanh %1042 : vector<8x128xf32>
    %cst_266 = arith.constant 5.000000e-01 : f32
    %1044 = vector.broadcast %cst_266 : f32 to vector<8x128xf32>
    %1045 = arith.mulf %1044, %1043 : vector<8x128xf32>
    %cst_267 = arith.constant 5.000000e-01 : f32
    %1046 = vector.broadcast %cst_267 : f32 to vector<8x128xf32>
    %1047 = arith.addf %1045, %1046 : vector<8x128xf32>
    %1048 = vector.extract_strided_slice %1039 {offsets = [0, 256], sizes = [8, 128], strides = [1, 1]} : vector<8x512xf32> to vector<8x128xf32>
    %1049 = math.tanh %1048 : vector<8x128xf32>
    %1050 = vector.extract_strided_slice %1039 {offsets = [0, 384], sizes = [8, 128], strides = [1, 1]} : vector<8x512xf32> to vector<8x128xf32>
    %cst_268 = arith.constant 5.000000e-01 : f32
    %1051 = vector.broadcast %cst_268 : f32 to vector<8x128xf32>
    %1052 = arith.mulf %1051, %1050 : vector<8x128xf32>
    %1053 = math.tanh %1052 : vector<8x128xf32>
    %cst_269 = arith.constant 5.000000e-01 : f32
    %1054 = vector.broadcast %cst_269 : f32 to vector<8x128xf32>
    %1055 = arith.mulf %1054, %1053 : vector<8x128xf32>
    %cst_270 = arith.constant 5.000000e-01 : f32
    %1056 = vector.broadcast %cst_270 : f32 to vector<8x128xf32>
    %1057 = arith.addf %1055, %1056 : vector<8x128xf32>
    %1058 = arith.mulf %1047, %1049 : vector<8x128xf32>
    %1059 = math.tanh %1058 : vector<8x128xf32>
    %1060 = arith.mulf %1057, %1059 : vector<8x128xf32>
    %1061 = vector.broadcast %1028 : vector<1x128xf32> to vector<8x128xf32>
    %1062 = arith.mulf %1060, %1061 : vector<8x128xf32>
    %cst_271 = arith.constant dense<0.000000e+00> : vector<8xf32>
    %1063 = vector.multi_reduction <add>, %1062, %cst_271 [1] : vector<8x128xf32> to vector<8xf32>
    %1064 = vector.shape_cast %1063 : vector<8xf32> to vector<8x1xf32>
    %1065 = vector.broadcast %758 : vector<8x1xf32> to vector<8x512xf32>
    %1066 = vector.broadcast %1031 : vector<1x512xf32> to vector<8x512xf32>
    %1067 = arith.mulf %1065, %1066 : vector<8x512xf32>
    %1068 = vector.broadcast %1034 : vector<1x512xf32> to vector<8x512xf32>
    %1069 = arith.addf %1067, %1068 : vector<8x512xf32>
    %1070 = vector.broadcast %1064 : vector<8x1xf32> to vector<8x512xf32>
    %1071 = vector.broadcast %1025 : vector<1x512xf32> to vector<8x512xf32>
    %1072 = arith.mulf %1070, %1071 : vector<8x512xf32>
    %1073 = arith.addf %1069, %1072 : vector<8x512xf32>
    %1074 = vector.extract_strided_slice %1073 {offsets = [0, 0], sizes = [8, 128], strides = [1, 1]} : vector<8x512xf32> to vector<8x128xf32>
    %cst_272 = arith.constant 5.000000e-01 : f32
    %1075 = vector.broadcast %cst_272 : f32 to vector<8x128xf32>
    %1076 = arith.mulf %1075, %1074 : vector<8x128xf32>
    %1077 = math.tanh %1076 : vector<8x128xf32>
    %cst_273 = arith.constant 5.000000e-01 : f32
    %1078 = vector.broadcast %cst_273 : f32 to vector<8x128xf32>
    %1079 = arith.mulf %1078, %1077 : vector<8x128xf32>
    %cst_274 = arith.constant 5.000000e-01 : f32
    %1080 = vector.broadcast %cst_274 : f32 to vector<8x128xf32>
    %1081 = arith.addf %1079, %1080 : vector<8x128xf32>
    %1082 = vector.extract_strided_slice %1073 {offsets = [0, 128], sizes = [8, 128], strides = [1, 1]} : vector<8x512xf32> to vector<8x128xf32>
    %cst_275 = arith.constant 5.000000e-01 : f32
    %1083 = vector.broadcast %cst_275 : f32 to vector<8x128xf32>
    %1084 = arith.mulf %1083, %1082 : vector<8x128xf32>
    %1085 = math.tanh %1084 : vector<8x128xf32>
    %cst_276 = arith.constant 5.000000e-01 : f32
    %1086 = vector.broadcast %cst_276 : f32 to vector<8x128xf32>
    %1087 = arith.mulf %1086, %1085 : vector<8x128xf32>
    %cst_277 = arith.constant 5.000000e-01 : f32
    %1088 = vector.broadcast %cst_277 : f32 to vector<8x128xf32>
    %1089 = arith.addf %1087, %1088 : vector<8x128xf32>
    %1090 = vector.extract_strided_slice %1073 {offsets = [0, 256], sizes = [8, 128], strides = [1, 1]} : vector<8x512xf32> to vector<8x128xf32>
    %1091 = math.tanh %1090 : vector<8x128xf32>
    %1092 = vector.extract_strided_slice %1073 {offsets = [0, 384], sizes = [8, 128], strides = [1, 1]} : vector<8x512xf32> to vector<8x128xf32>
    %cst_278 = arith.constant 5.000000e-01 : f32
    %1093 = vector.broadcast %cst_278 : f32 to vector<8x128xf32>
    %1094 = arith.mulf %1093, %1092 : vector<8x128xf32>
    %1095 = math.tanh %1094 : vector<8x128xf32>
    %cst_279 = arith.constant 5.000000e-01 : f32
    %1096 = vector.broadcast %cst_279 : f32 to vector<8x128xf32>
    %1097 = arith.mulf %1096, %1095 : vector<8x128xf32>
    %cst_280 = arith.constant 5.000000e-01 : f32
    %1098 = vector.broadcast %cst_280 : f32 to vector<8x128xf32>
    %1099 = arith.addf %1097, %1098 : vector<8x128xf32>
    %1100 = arith.mulf %1089, %1058 : vector<8x128xf32>
    %1101 = arith.mulf %1081, %1091 : vector<8x128xf32>
    %1102 = arith.addf %1100, %1101 : vector<8x128xf32>
    %1103 = math.tanh %1102 : vector<8x128xf32>
    %1104 = arith.mulf %1099, %1103 : vector<8x128xf32>
    %1105 = vector.broadcast %1028 : vector<1x128xf32> to vector<8x128xf32>
    %1106 = arith.mulf %1104, %1105 : vector<8x128xf32>
    %cst_281 = arith.constant dense<0.000000e+00> : vector<8xf32>
    %1107 = vector.multi_reduction <add>, %1106, %cst_281 [1] : vector<8x128xf32> to vector<8xf32>
    %1108 = vector.shape_cast %1107 : vector<8xf32> to vector<8x1xf32>
    %1109 = vector.broadcast %802 : vector<8x1xf32> to vector<8x512xf32>
    %1110 = vector.broadcast %1031 : vector<1x512xf32> to vector<8x512xf32>
    %1111 = arith.mulf %1109, %1110 : vector<8x512xf32>
    %1112 = vector.broadcast %1034 : vector<1x512xf32> to vector<8x512xf32>
    %1113 = arith.addf %1111, %1112 : vector<8x512xf32>
    %1114 = vector.broadcast %1108 : vector<8x1xf32> to vector<8x512xf32>
    %1115 = vector.broadcast %1025 : vector<1x512xf32> to vector<8x512xf32>
    %1116 = arith.mulf %1114, %1115 : vector<8x512xf32>
    %1117 = arith.addf %1113, %1116 : vector<8x512xf32>
    %1118 = vector.extract_strided_slice %1117 {offsets = [0, 0], sizes = [8, 128], strides = [1, 1]} : vector<8x512xf32> to vector<8x128xf32>
    %cst_282 = arith.constant 5.000000e-01 : f32
    %1119 = vector.broadcast %cst_282 : f32 to vector<8x128xf32>
    %1120 = arith.mulf %1119, %1118 : vector<8x128xf32>
    %1121 = math.tanh %1120 : vector<8x128xf32>
    %cst_283 = arith.constant 5.000000e-01 : f32
    %1122 = vector.broadcast %cst_283 : f32 to vector<8x128xf32>
    %1123 = arith.mulf %1122, %1121 : vector<8x128xf32>
    %cst_284 = arith.constant 5.000000e-01 : f32
    %1124 = vector.broadcast %cst_284 : f32 to vector<8x128xf32>
    %1125 = arith.addf %1123, %1124 : vector<8x128xf32>
    %1126 = vector.extract_strided_slice %1117 {offsets = [0, 128], sizes = [8, 128], strides = [1, 1]} : vector<8x512xf32> to vector<8x128xf32>
    %cst_285 = arith.constant 5.000000e-01 : f32
    %1127 = vector.broadcast %cst_285 : f32 to vector<8x128xf32>
    %1128 = arith.mulf %1127, %1126 : vector<8x128xf32>
    %1129 = math.tanh %1128 : vector<8x128xf32>
    %cst_286 = arith.constant 5.000000e-01 : f32
    %1130 = vector.broadcast %cst_286 : f32 to vector<8x128xf32>
    %1131 = arith.mulf %1130, %1129 : vector<8x128xf32>
    %cst_287 = arith.constant 5.000000e-01 : f32
    %1132 = vector.broadcast %cst_287 : f32 to vector<8x128xf32>
    %1133 = arith.addf %1131, %1132 : vector<8x128xf32>
    %1134 = vector.extract_strided_slice %1117 {offsets = [0, 256], sizes = [8, 128], strides = [1, 1]} : vector<8x512xf32> to vector<8x128xf32>
    %1135 = math.tanh %1134 : vector<8x128xf32>
    %1136 = vector.extract_strided_slice %1117 {offsets = [0, 384], sizes = [8, 128], strides = [1, 1]} : vector<8x512xf32> to vector<8x128xf32>
    %cst_288 = arith.constant 5.000000e-01 : f32
    %1137 = vector.broadcast %cst_288 : f32 to vector<8x128xf32>
    %1138 = arith.mulf %1137, %1136 : vector<8x128xf32>
    %1139 = math.tanh %1138 : vector<8x128xf32>
    %cst_289 = arith.constant 5.000000e-01 : f32
    %1140 = vector.broadcast %cst_289 : f32 to vector<8x128xf32>
    %1141 = arith.mulf %1140, %1139 : vector<8x128xf32>
    %cst_290 = arith.constant 5.000000e-01 : f32
    %1142 = vector.broadcast %cst_290 : f32 to vector<8x128xf32>
    %1143 = arith.addf %1141, %1142 : vector<8x128xf32>
    %1144 = arith.mulf %1133, %1102 : vector<8x128xf32>
    %1145 = arith.mulf %1125, %1135 : vector<8x128xf32>
    %1146 = arith.addf %1144, %1145 : vector<8x128xf32>
    %1147 = math.tanh %1146 : vector<8x128xf32>
    %1148 = arith.mulf %1143, %1147 : vector<8x128xf32>
    %1149 = vector.broadcast %1028 : vector<1x128xf32> to vector<8x128xf32>
    %1150 = arith.mulf %1148, %1149 : vector<8x128xf32>
    %cst_291 = arith.constant dense<0.000000e+00> : vector<8xf32>
    %1151 = vector.multi_reduction <add>, %1150, %cst_291 [1] : vector<8x128xf32> to vector<8xf32>
    %1152 = vector.shape_cast %1151 : vector<8xf32> to vector<8x1xf32>
    %1153 = vector.broadcast %846 : vector<8x1xf32> to vector<8x512xf32>
    %1154 = vector.broadcast %1031 : vector<1x512xf32> to vector<8x512xf32>
    %1155 = arith.mulf %1153, %1154 : vector<8x512xf32>
    %1156 = vector.broadcast %1034 : vector<1x512xf32> to vector<8x512xf32>
    %1157 = arith.addf %1155, %1156 : vector<8x512xf32>
    %1158 = vector.broadcast %1152 : vector<8x1xf32> to vector<8x512xf32>
    %1159 = vector.broadcast %1025 : vector<1x512xf32> to vector<8x512xf32>
    %1160 = arith.mulf %1158, %1159 : vector<8x512xf32>
    %1161 = arith.addf %1157, %1160 : vector<8x512xf32>
    %1162 = vector.extract_strided_slice %1161 {offsets = [0, 0], sizes = [8, 128], strides = [1, 1]} : vector<8x512xf32> to vector<8x128xf32>
    %cst_292 = arith.constant 5.000000e-01 : f32
    %1163 = vector.broadcast %cst_292 : f32 to vector<8x128xf32>
    %1164 = arith.mulf %1163, %1162 : vector<8x128xf32>
    %1165 = math.tanh %1164 : vector<8x128xf32>
    %cst_293 = arith.constant 5.000000e-01 : f32
    %1166 = vector.broadcast %cst_293 : f32 to vector<8x128xf32>
    %1167 = arith.mulf %1166, %1165 : vector<8x128xf32>
    %cst_294 = arith.constant 5.000000e-01 : f32
    %1168 = vector.broadcast %cst_294 : f32 to vector<8x128xf32>
    %1169 = arith.addf %1167, %1168 : vector<8x128xf32>
    %1170 = vector.extract_strided_slice %1161 {offsets = [0, 128], sizes = [8, 128], strides = [1, 1]} : vector<8x512xf32> to vector<8x128xf32>
    %cst_295 = arith.constant 5.000000e-01 : f32
    %1171 = vector.broadcast %cst_295 : f32 to vector<8x128xf32>
    %1172 = arith.mulf %1171, %1170 : vector<8x128xf32>
    %1173 = math.tanh %1172 : vector<8x128xf32>
    %cst_296 = arith.constant 5.000000e-01 : f32
    %1174 = vector.broadcast %cst_296 : f32 to vector<8x128xf32>
    %1175 = arith.mulf %1174, %1173 : vector<8x128xf32>
    %cst_297 = arith.constant 5.000000e-01 : f32
    %1176 = vector.broadcast %cst_297 : f32 to vector<8x128xf32>
    %1177 = arith.addf %1175, %1176 : vector<8x128xf32>
    %1178 = vector.extract_strided_slice %1161 {offsets = [0, 256], sizes = [8, 128], strides = [1, 1]} : vector<8x512xf32> to vector<8x128xf32>
    %1179 = math.tanh %1178 : vector<8x128xf32>
    %1180 = vector.extract_strided_slice %1161 {offsets = [0, 384], sizes = [8, 128], strides = [1, 1]} : vector<8x512xf32> to vector<8x128xf32>
    %cst_298 = arith.constant 5.000000e-01 : f32
    %1181 = vector.broadcast %cst_298 : f32 to vector<8x128xf32>
    %1182 = arith.mulf %1181, %1180 : vector<8x128xf32>
    %1183 = math.tanh %1182 : vector<8x128xf32>
    %cst_299 = arith.constant 5.000000e-01 : f32
    %1184 = vector.broadcast %cst_299 : f32 to vector<8x128xf32>
    %1185 = arith.mulf %1184, %1183 : vector<8x128xf32>
    %cst_300 = arith.constant 5.000000e-01 : f32
    %1186 = vector.broadcast %cst_300 : f32 to vector<8x128xf32>
    %1187 = arith.addf %1185, %1186 : vector<8x128xf32>
    %1188 = arith.mulf %1177, %1146 : vector<8x128xf32>
    %1189 = arith.mulf %1169, %1179 : vector<8x128xf32>
    %1190 = arith.addf %1188, %1189 : vector<8x128xf32>
    %1191 = math.tanh %1190 : vector<8x128xf32>
    %1192 = arith.mulf %1187, %1191 : vector<8x128xf32>
    %1193 = vector.broadcast %1028 : vector<1x128xf32> to vector<8x128xf32>
    %1194 = arith.mulf %1192, %1193 : vector<8x128xf32>
    %cst_301 = arith.constant dense<0.000000e+00> : vector<8xf32>
    %1195 = vector.multi_reduction <add>, %1194, %cst_301 [1] : vector<8x128xf32> to vector<8xf32>
    %1196 = vector.shape_cast %1195 : vector<8xf32> to vector<8x1xf32>
    %1197 = vector.broadcast %890 : vector<8x1xf32> to vector<8x512xf32>
    %1198 = vector.broadcast %1031 : vector<1x512xf32> to vector<8x512xf32>
    %1199 = arith.mulf %1197, %1198 : vector<8x512xf32>
    %1200 = vector.broadcast %1034 : vector<1x512xf32> to vector<8x512xf32>
    %1201 = arith.addf %1199, %1200 : vector<8x512xf32>
    %1202 = vector.broadcast %1196 : vector<8x1xf32> to vector<8x512xf32>
    %1203 = vector.broadcast %1025 : vector<1x512xf32> to vector<8x512xf32>
    %1204 = arith.mulf %1202, %1203 : vector<8x512xf32>
    %1205 = arith.addf %1201, %1204 : vector<8x512xf32>
    %1206 = vector.extract_strided_slice %1205 {offsets = [0, 0], sizes = [8, 128], strides = [1, 1]} : vector<8x512xf32> to vector<8x128xf32>
    %cst_302 = arith.constant 5.000000e-01 : f32
    %1207 = vector.broadcast %cst_302 : f32 to vector<8x128xf32>
    %1208 = arith.mulf %1207, %1206 : vector<8x128xf32>
    %1209 = math.tanh %1208 : vector<8x128xf32>
    %cst_303 = arith.constant 5.000000e-01 : f32
    %1210 = vector.broadcast %cst_303 : f32 to vector<8x128xf32>
    %1211 = arith.mulf %1210, %1209 : vector<8x128xf32>
    %cst_304 = arith.constant 5.000000e-01 : f32
    %1212 = vector.broadcast %cst_304 : f32 to vector<8x128xf32>
    %1213 = arith.addf %1211, %1212 : vector<8x128xf32>
    %1214 = vector.extract_strided_slice %1205 {offsets = [0, 128], sizes = [8, 128], strides = [1, 1]} : vector<8x512xf32> to vector<8x128xf32>
    %cst_305 = arith.constant 5.000000e-01 : f32
    %1215 = vector.broadcast %cst_305 : f32 to vector<8x128xf32>
    %1216 = arith.mulf %1215, %1214 : vector<8x128xf32>
    %1217 = math.tanh %1216 : vector<8x128xf32>
    %cst_306 = arith.constant 5.000000e-01 : f32
    %1218 = vector.broadcast %cst_306 : f32 to vector<8x128xf32>
    %1219 = arith.mulf %1218, %1217 : vector<8x128xf32>
    %cst_307 = arith.constant 5.000000e-01 : f32
    %1220 = vector.broadcast %cst_307 : f32 to vector<8x128xf32>
    %1221 = arith.addf %1219, %1220 : vector<8x128xf32>
    %1222 = vector.extract_strided_slice %1205 {offsets = [0, 256], sizes = [8, 128], strides = [1, 1]} : vector<8x512xf32> to vector<8x128xf32>
    %1223 = math.tanh %1222 : vector<8x128xf32>
    %1224 = vector.extract_strided_slice %1205 {offsets = [0, 384], sizes = [8, 128], strides = [1, 1]} : vector<8x512xf32> to vector<8x128xf32>
    %cst_308 = arith.constant 5.000000e-01 : f32
    %1225 = vector.broadcast %cst_308 : f32 to vector<8x128xf32>
    %1226 = arith.mulf %1225, %1224 : vector<8x128xf32>
    %1227 = math.tanh %1226 : vector<8x128xf32>
    %cst_309 = arith.constant 5.000000e-01 : f32
    %1228 = vector.broadcast %cst_309 : f32 to vector<8x128xf32>
    %1229 = arith.mulf %1228, %1227 : vector<8x128xf32>
    %cst_310 = arith.constant 5.000000e-01 : f32
    %1230 = vector.broadcast %cst_310 : f32 to vector<8x128xf32>
    %1231 = arith.addf %1229, %1230 : vector<8x128xf32>
    %1232 = arith.mulf %1221, %1190 : vector<8x128xf32>
    %1233 = arith.mulf %1213, %1223 : vector<8x128xf32>
    %1234 = arith.addf %1232, %1233 : vector<8x128xf32>
    %1235 = math.tanh %1234 : vector<8x128xf32>
    %1236 = arith.mulf %1231, %1235 : vector<8x128xf32>
    %1237 = vector.broadcast %1028 : vector<1x128xf32> to vector<8x128xf32>
    %1238 = arith.mulf %1236, %1237 : vector<8x128xf32>
    %cst_311 = arith.constant dense<0.000000e+00> : vector<8xf32>
    %1239 = vector.multi_reduction <add>, %1238, %cst_311 [1] : vector<8x128xf32> to vector<8xf32>
    %1240 = vector.shape_cast %1239 : vector<8xf32> to vector<8x1xf32>
    %1241 = vector.broadcast %934 : vector<8x1xf32> to vector<8x512xf32>
    %1242 = vector.broadcast %1031 : vector<1x512xf32> to vector<8x512xf32>
    %1243 = arith.mulf %1241, %1242 : vector<8x512xf32>
    %1244 = vector.broadcast %1034 : vector<1x512xf32> to vector<8x512xf32>
    %1245 = arith.addf %1243, %1244 : vector<8x512xf32>
    %1246 = vector.broadcast %1240 : vector<8x1xf32> to vector<8x512xf32>
    %1247 = vector.broadcast %1025 : vector<1x512xf32> to vector<8x512xf32>
    %1248 = arith.mulf %1246, %1247 : vector<8x512xf32>
    %1249 = arith.addf %1245, %1248 : vector<8x512xf32>
    %1250 = vector.extract_strided_slice %1249 {offsets = [0, 0], sizes = [8, 128], strides = [1, 1]} : vector<8x512xf32> to vector<8x128xf32>
    %cst_312 = arith.constant 5.000000e-01 : f32
    %1251 = vector.broadcast %cst_312 : f32 to vector<8x128xf32>
    %1252 = arith.mulf %1251, %1250 : vector<8x128xf32>
    %1253 = math.tanh %1252 : vector<8x128xf32>
    %cst_313 = arith.constant 5.000000e-01 : f32
    %1254 = vector.broadcast %cst_313 : f32 to vector<8x128xf32>
    %1255 = arith.mulf %1254, %1253 : vector<8x128xf32>
    %cst_314 = arith.constant 5.000000e-01 : f32
    %1256 = vector.broadcast %cst_314 : f32 to vector<8x128xf32>
    %1257 = arith.addf %1255, %1256 : vector<8x128xf32>
    %1258 = vector.extract_strided_slice %1249 {offsets = [0, 128], sizes = [8, 128], strides = [1, 1]} : vector<8x512xf32> to vector<8x128xf32>
    %cst_315 = arith.constant 5.000000e-01 : f32
    %1259 = vector.broadcast %cst_315 : f32 to vector<8x128xf32>
    %1260 = arith.mulf %1259, %1258 : vector<8x128xf32>
    %1261 = math.tanh %1260 : vector<8x128xf32>
    %cst_316 = arith.constant 5.000000e-01 : f32
    %1262 = vector.broadcast %cst_316 : f32 to vector<8x128xf32>
    %1263 = arith.mulf %1262, %1261 : vector<8x128xf32>
    %cst_317 = arith.constant 5.000000e-01 : f32
    %1264 = vector.broadcast %cst_317 : f32 to vector<8x128xf32>
    %1265 = arith.addf %1263, %1264 : vector<8x128xf32>
    %1266 = vector.extract_strided_slice %1249 {offsets = [0, 256], sizes = [8, 128], strides = [1, 1]} : vector<8x512xf32> to vector<8x128xf32>
    %1267 = math.tanh %1266 : vector<8x128xf32>
    %1268 = vector.extract_strided_slice %1249 {offsets = [0, 384], sizes = [8, 128], strides = [1, 1]} : vector<8x512xf32> to vector<8x128xf32>
    %cst_318 = arith.constant 5.000000e-01 : f32
    %1269 = vector.broadcast %cst_318 : f32 to vector<8x128xf32>
    %1270 = arith.mulf %1269, %1268 : vector<8x128xf32>
    %1271 = math.tanh %1270 : vector<8x128xf32>
    %cst_319 = arith.constant 5.000000e-01 : f32
    %1272 = vector.broadcast %cst_319 : f32 to vector<8x128xf32>
    %1273 = arith.mulf %1272, %1271 : vector<8x128xf32>
    %cst_320 = arith.constant 5.000000e-01 : f32
    %1274 = vector.broadcast %cst_320 : f32 to vector<8x128xf32>
    %1275 = arith.addf %1273, %1274 : vector<8x128xf32>
    %1276 = arith.mulf %1265, %1234 : vector<8x128xf32>
    %1277 = arith.mulf %1257, %1267 : vector<8x128xf32>
    %1278 = arith.addf %1276, %1277 : vector<8x128xf32>
    %1279 = math.tanh %1278 : vector<8x128xf32>
    %1280 = arith.mulf %1275, %1279 : vector<8x128xf32>
    %1281 = vector.broadcast %1028 : vector<1x128xf32> to vector<8x128xf32>
    %1282 = arith.mulf %1280, %1281 : vector<8x128xf32>
    %cst_321 = arith.constant dense<0.000000e+00> : vector<8xf32>
    %1283 = vector.multi_reduction <add>, %1282, %cst_321 [1] : vector<8x128xf32> to vector<8xf32>
    %1284 = vector.shape_cast %1283 : vector<8xf32> to vector<8x1xf32>
    %1285 = vector.broadcast %978 : vector<8x1xf32> to vector<8x512xf32>
    %1286 = vector.broadcast %1031 : vector<1x512xf32> to vector<8x512xf32>
    %1287 = arith.mulf %1285, %1286 : vector<8x512xf32>
    %1288 = vector.broadcast %1034 : vector<1x512xf32> to vector<8x512xf32>
    %1289 = arith.addf %1287, %1288 : vector<8x512xf32>
    %1290 = vector.broadcast %1284 : vector<8x1xf32> to vector<8x512xf32>
    %1291 = vector.broadcast %1025 : vector<1x512xf32> to vector<8x512xf32>
    %1292 = arith.mulf %1290, %1291 : vector<8x512xf32>
    %1293 = arith.addf %1289, %1292 : vector<8x512xf32>
    %1294 = vector.extract_strided_slice %1293 {offsets = [0, 0], sizes = [8, 128], strides = [1, 1]} : vector<8x512xf32> to vector<8x128xf32>
    %cst_322 = arith.constant 5.000000e-01 : f32
    %1295 = vector.broadcast %cst_322 : f32 to vector<8x128xf32>
    %1296 = arith.mulf %1295, %1294 : vector<8x128xf32>
    %1297 = math.tanh %1296 : vector<8x128xf32>
    %cst_323 = arith.constant 5.000000e-01 : f32
    %1298 = vector.broadcast %cst_323 : f32 to vector<8x128xf32>
    %1299 = arith.mulf %1298, %1297 : vector<8x128xf32>
    %cst_324 = arith.constant 5.000000e-01 : f32
    %1300 = vector.broadcast %cst_324 : f32 to vector<8x128xf32>
    %1301 = arith.addf %1299, %1300 : vector<8x128xf32>
    %1302 = vector.extract_strided_slice %1293 {offsets = [0, 128], sizes = [8, 128], strides = [1, 1]} : vector<8x512xf32> to vector<8x128xf32>
    %cst_325 = arith.constant 5.000000e-01 : f32
    %1303 = vector.broadcast %cst_325 : f32 to vector<8x128xf32>
    %1304 = arith.mulf %1303, %1302 : vector<8x128xf32>
    %1305 = math.tanh %1304 : vector<8x128xf32>
    %cst_326 = arith.constant 5.000000e-01 : f32
    %1306 = vector.broadcast %cst_326 : f32 to vector<8x128xf32>
    %1307 = arith.mulf %1306, %1305 : vector<8x128xf32>
    %cst_327 = arith.constant 5.000000e-01 : f32
    %1308 = vector.broadcast %cst_327 : f32 to vector<8x128xf32>
    %1309 = arith.addf %1307, %1308 : vector<8x128xf32>
    %1310 = vector.extract_strided_slice %1293 {offsets = [0, 256], sizes = [8, 128], strides = [1, 1]} : vector<8x512xf32> to vector<8x128xf32>
    %1311 = math.tanh %1310 : vector<8x128xf32>
    %1312 = vector.extract_strided_slice %1293 {offsets = [0, 384], sizes = [8, 128], strides = [1, 1]} : vector<8x512xf32> to vector<8x128xf32>
    %cst_328 = arith.constant 5.000000e-01 : f32
    %1313 = vector.broadcast %cst_328 : f32 to vector<8x128xf32>
    %1314 = arith.mulf %1313, %1312 : vector<8x128xf32>
    %1315 = math.tanh %1314 : vector<8x128xf32>
    %cst_329 = arith.constant 5.000000e-01 : f32
    %1316 = vector.broadcast %cst_329 : f32 to vector<8x128xf32>
    %1317 = arith.mulf %1316, %1315 : vector<8x128xf32>
    %cst_330 = arith.constant 5.000000e-01 : f32
    %1318 = vector.broadcast %cst_330 : f32 to vector<8x128xf32>
    %1319 = arith.addf %1317, %1318 : vector<8x128xf32>
    %1320 = arith.mulf %1309, %1278 : vector<8x128xf32>
    %1321 = arith.mulf %1301, %1311 : vector<8x128xf32>
    %1322 = arith.addf %1320, %1321 : vector<8x128xf32>
    %1323 = math.tanh %1322 : vector<8x128xf32>
    %1324 = arith.mulf %1319, %1323 : vector<8x128xf32>
    %1325 = vector.broadcast %1028 : vector<1x128xf32> to vector<8x128xf32>
    %1326 = arith.mulf %1324, %1325 : vector<8x128xf32>
    %cst_331 = arith.constant dense<0.000000e+00> : vector<8xf32>
    %1327 = vector.multi_reduction <add>, %1326, %cst_331 [1] : vector<8x128xf32> to vector<8xf32>
    %1328 = vector.shape_cast %1327 : vector<8xf32> to vector<8x1xf32>
    %1329 = vector.broadcast %1022 : vector<8x1xf32> to vector<8x512xf32>
    %1330 = vector.broadcast %1031 : vector<1x512xf32> to vector<8x512xf32>
    %1331 = arith.mulf %1329, %1330 : vector<8x512xf32>
    %1332 = vector.broadcast %1034 : vector<1x512xf32> to vector<8x512xf32>
    %1333 = arith.addf %1331, %1332 : vector<8x512xf32>
    %1334 = vector.broadcast %1328 : vector<8x1xf32> to vector<8x512xf32>
    %1335 = vector.broadcast %1025 : vector<1x512xf32> to vector<8x512xf32>
    %1336 = arith.mulf %1334, %1335 : vector<8x512xf32>
    %1337 = arith.addf %1333, %1336 : vector<8x512xf32>
    %1338 = vector.extract_strided_slice %1337 {offsets = [0, 0], sizes = [8, 128], strides = [1, 1]} : vector<8x512xf32> to vector<8x128xf32>
    %cst_332 = arith.constant 5.000000e-01 : f32
    %1339 = vector.broadcast %cst_332 : f32 to vector<8x128xf32>
    %1340 = arith.mulf %1339, %1338 : vector<8x128xf32>
    %1341 = math.tanh %1340 : vector<8x128xf32>
    %cst_333 = arith.constant 5.000000e-01 : f32
    %1342 = vector.broadcast %cst_333 : f32 to vector<8x128xf32>
    %1343 = arith.mulf %1342, %1341 : vector<8x128xf32>
    %cst_334 = arith.constant 5.000000e-01 : f32
    %1344 = vector.broadcast %cst_334 : f32 to vector<8x128xf32>
    %1345 = arith.addf %1343, %1344 : vector<8x128xf32>
    %1346 = vector.extract_strided_slice %1337 {offsets = [0, 128], sizes = [8, 128], strides = [1, 1]} : vector<8x512xf32> to vector<8x128xf32>
    %cst_335 = arith.constant 5.000000e-01 : f32
    %1347 = vector.broadcast %cst_335 : f32 to vector<8x128xf32>
    %1348 = arith.mulf %1347, %1346 : vector<8x128xf32>
    %1349 = math.tanh %1348 : vector<8x128xf32>
    %cst_336 = arith.constant 5.000000e-01 : f32
    %1350 = vector.broadcast %cst_336 : f32 to vector<8x128xf32>
    %1351 = arith.mulf %1350, %1349 : vector<8x128xf32>
    %cst_337 = arith.constant 5.000000e-01 : f32
    %1352 = vector.broadcast %cst_337 : f32 to vector<8x128xf32>
    %1353 = arith.addf %1351, %1352 : vector<8x128xf32>
    %1354 = vector.extract_strided_slice %1337 {offsets = [0, 256], sizes = [8, 128], strides = [1, 1]} : vector<8x512xf32> to vector<8x128xf32>
    %1355 = math.tanh %1354 : vector<8x128xf32>
    %1356 = vector.extract_strided_slice %1337 {offsets = [0, 384], sizes = [8, 128], strides = [1, 1]} : vector<8x512xf32> to vector<8x128xf32>
    %cst_338 = arith.constant 5.000000e-01 : f32
    %1357 = vector.broadcast %cst_338 : f32 to vector<8x128xf32>
    %1358 = arith.mulf %1357, %1356 : vector<8x128xf32>
    %1359 = math.tanh %1358 : vector<8x128xf32>
    %cst_339 = arith.constant 5.000000e-01 : f32
    %1360 = vector.broadcast %cst_339 : f32 to vector<8x128xf32>
    %1361 = arith.mulf %1360, %1359 : vector<8x128xf32>
    %cst_340 = arith.constant 5.000000e-01 : f32
    %1362 = vector.broadcast %cst_340 : f32 to vector<8x128xf32>
    %1363 = arith.addf %1361, %1362 : vector<8x128xf32>
    %1364 = arith.mulf %1353, %1322 : vector<8x128xf32>
    %1365 = arith.mulf %1345, %1355 : vector<8x128xf32>
    %1366 = arith.addf %1364, %1365 : vector<8x128xf32>
    %1367 = math.tanh %1366 : vector<8x128xf32>
    %1368 = arith.mulf %1363, %1367 : vector<8x128xf32>
    %1369 = vector.broadcast %1028 : vector<1x128xf32> to vector<8x128xf32>
    %1370 = arith.mulf %1368, %1369 : vector<8x128xf32>
    %cst_341 = arith.constant dense<0.000000e+00> : vector<8xf32>
    %1371 = vector.multi_reduction <add>, %1370, %cst_341 [1] : vector<8x128xf32> to vector<8xf32>
    %1372 = vector.shape_cast %1371 : vector<8xf32> to vector<8x1xf32>
    %c4 = arith.constant 4 : index
    %c0_342 = arith.constant 0 : index
    %1373 = vector.load %arg6[%c4, %c0_342] : memref<5x512xf32, #tpu.memory_space<vmem>>, vector<1x512xf32>
    %1374 = vector.shape_cast %1373 : vector<1x512xf32> to vector<512xf32>
    %1375 = vector.shape_cast %1374 : vector<512xf32> to vector<1x512xf32>
    %c4_343 = arith.constant 4 : index
    %c0_344 = arith.constant 0 : index
    %1376 = vector.load %arg8[%c4_343, %c0_344] : memref<5x128xf32, #tpu.memory_space<vmem>>, vector<1x128xf32>
    %1377 = vector.shape_cast %1376 : vector<1x128xf32> to vector<128xf32>
    %1378 = vector.shape_cast %1377 : vector<128xf32> to vector<1x128xf32>
    %c3_345 = arith.constant 3 : index
    %c0_346 = arith.constant 0 : index
    %1379 = vector.load %arg5[%c3_345, %c0_346] : memref<4x512xf32, #tpu.memory_space<vmem>>, vector<1x512xf32>
    %1380 = vector.shape_cast %1379 : vector<1x512xf32> to vector<512xf32>
    %1381 = vector.shape_cast %1380 : vector<512xf32> to vector<1x512xf32>
    %c4_347 = arith.constant 4 : index
    %c0_348 = arith.constant 0 : index
    %1382 = vector.load %arg7[%c4_347, %c0_348] : memref<5x512xf32, #tpu.memory_space<vmem>>, vector<1x512xf32>
    %1383 = vector.shape_cast %1382 : vector<1x512xf32> to vector<512xf32>
    %1384 = vector.shape_cast %1383 : vector<512xf32> to vector<1x512xf32>
    %1385 = vector.broadcast %1064 : vector<8x1xf32> to vector<8x512xf32>
    %1386 = vector.broadcast %1381 : vector<1x512xf32> to vector<8x512xf32>
    %1387 = arith.mulf %1385, %1386 : vector<8x512xf32>
    %1388 = vector.broadcast %1384 : vector<1x512xf32> to vector<8x512xf32>
    %1389 = arith.addf %1387, %1388 : vector<8x512xf32>
    %1390 = vector.extract_strided_slice %1389 {offsets = [0, 0], sizes = [8, 128], strides = [1, 1]} : vector<8x512xf32> to vector<8x128xf32>
    %cst_349 = arith.constant 5.000000e-01 : f32
    %1391 = vector.broadcast %cst_349 : f32 to vector<8x128xf32>
    %1392 = arith.mulf %1391, %1390 : vector<8x128xf32>
    %1393 = math.tanh %1392 : vector<8x128xf32>
    %cst_350 = arith.constant 5.000000e-01 : f32
    %1394 = vector.broadcast %cst_350 : f32 to vector<8x128xf32>
    %1395 = arith.mulf %1394, %1393 : vector<8x128xf32>
    %cst_351 = arith.constant 5.000000e-01 : f32
    %1396 = vector.broadcast %cst_351 : f32 to vector<8x128xf32>
    %1397 = arith.addf %1395, %1396 : vector<8x128xf32>
    %1398 = vector.extract_strided_slice %1389 {offsets = [0, 256], sizes = [8, 128], strides = [1, 1]} : vector<8x512xf32> to vector<8x128xf32>
    %1399 = math.tanh %1398 : vector<8x128xf32>
    %1400 = vector.extract_strided_slice %1389 {offsets = [0, 384], sizes = [8, 128], strides = [1, 1]} : vector<8x512xf32> to vector<8x128xf32>
    %cst_352 = arith.constant 5.000000e-01 : f32
    %1401 = vector.broadcast %cst_352 : f32 to vector<8x128xf32>
    %1402 = arith.mulf %1401, %1400 : vector<8x128xf32>
    %1403 = math.tanh %1402 : vector<8x128xf32>
    %cst_353 = arith.constant 5.000000e-01 : f32
    %1404 = vector.broadcast %cst_353 : f32 to vector<8x128xf32>
    %1405 = arith.mulf %1404, %1403 : vector<8x128xf32>
    %cst_354 = arith.constant 5.000000e-01 : f32
    %1406 = vector.broadcast %cst_354 : f32 to vector<8x128xf32>
    %1407 = arith.addf %1405, %1406 : vector<8x128xf32>
    %1408 = arith.mulf %1397, %1399 : vector<8x128xf32>
    %1409 = math.tanh %1408 : vector<8x128xf32>
    %1410 = arith.mulf %1407, %1409 : vector<8x128xf32>
    %1411 = vector.broadcast %1378 : vector<1x128xf32> to vector<8x128xf32>
    %1412 = arith.mulf %1410, %1411 : vector<8x128xf32>
    %cst_355 = arith.constant dense<0.000000e+00> : vector<8xf32>
    %1413 = vector.multi_reduction <add>, %1412, %cst_355 [1] : vector<8x128xf32> to vector<8xf32>
    %1414 = vector.shape_cast %1413 : vector<8xf32> to vector<8x1xf32>
    %1415 = vector.extract_strided_slice %9 {offsets = [0, 0], sizes = [1, 64], strides = [1, 1]} : vector<11x64xf32> to vector<1x64xf32>
    %1416 = vector.shape_cast %1415 : vector<1x64xf32> to vector<64xf32>
    %1417 = vector.shape_cast %1416 : vector<64xf32> to vector<1x64xf32>
    %1418 = vector.broadcast %1414 : vector<8x1xf32> to vector<8x64xf32>
    %1419 = vector.broadcast %1417 : vector<1x64xf32> to vector<8x64xf32>
    %1420 = arith.mulf %1418, %1419 : vector<8x64xf32>
    %1421 = arith.addf %10, %1420 : vector<8x64xf32>
    %1422 = vector.broadcast %1108 : vector<8x1xf32> to vector<8x512xf32>
    %1423 = vector.broadcast %1381 : vector<1x512xf32> to vector<8x512xf32>
    %1424 = arith.mulf %1422, %1423 : vector<8x512xf32>
    %1425 = vector.broadcast %1384 : vector<1x512xf32> to vector<8x512xf32>
    %1426 = arith.addf %1424, %1425 : vector<8x512xf32>
    %1427 = vector.broadcast %1414 : vector<8x1xf32> to vector<8x512xf32>
    %1428 = vector.broadcast %1375 : vector<1x512xf32> to vector<8x512xf32>
    %1429 = arith.mulf %1427, %1428 : vector<8x512xf32>
    %1430 = arith.addf %1426, %1429 : vector<8x512xf32>
    %1431 = vector.extract_strided_slice %1430 {offsets = [0, 0], sizes = [8, 128], strides = [1, 1]} : vector<8x512xf32> to vector<8x128xf32>
    %cst_356 = arith.constant 5.000000e-01 : f32
    %1432 = vector.broadcast %cst_356 : f32 to vector<8x128xf32>
    %1433 = arith.mulf %1432, %1431 : vector<8x128xf32>
    %1434 = math.tanh %1433 : vector<8x128xf32>
    %cst_357 = arith.constant 5.000000e-01 : f32
    %1435 = vector.broadcast %cst_357 : f32 to vector<8x128xf32>
    %1436 = arith.mulf %1435, %1434 : vector<8x128xf32>
    %cst_358 = arith.constant 5.000000e-01 : f32
    %1437 = vector.broadcast %cst_358 : f32 to vector<8x128xf32>
    %1438 = arith.addf %1436, %1437 : vector<8x128xf32>
    %1439 = vector.extract_strided_slice %1430 {offsets = [0, 128], sizes = [8, 128], strides = [1, 1]} : vector<8x512xf32> to vector<8x128xf32>
    %cst_359 = arith.constant 5.000000e-01 : f32
    %1440 = vector.broadcast %cst_359 : f32 to vector<8x128xf32>
    %1441 = arith.mulf %1440, %1439 : vector<8x128xf32>
    %1442 = math.tanh %1441 : vector<8x128xf32>
    %cst_360 = arith.constant 5.000000e-01 : f32
    %1443 = vector.broadcast %cst_360 : f32 to vector<8x128xf32>
    %1444 = arith.mulf %1443, %1442 : vector<8x128xf32>
    %cst_361 = arith.constant 5.000000e-01 : f32
    %1445 = vector.broadcast %cst_361 : f32 to vector<8x128xf32>
    %1446 = arith.addf %1444, %1445 : vector<8x128xf32>
    %1447 = vector.extract_strided_slice %1430 {offsets = [0, 256], sizes = [8, 128], strides = [1, 1]} : vector<8x512xf32> to vector<8x128xf32>
    %1448 = math.tanh %1447 : vector<8x128xf32>
    %1449 = vector.extract_strided_slice %1430 {offsets = [0, 384], sizes = [8, 128], strides = [1, 1]} : vector<8x512xf32> to vector<8x128xf32>
    %cst_362 = arith.constant 5.000000e-01 : f32
    %1450 = vector.broadcast %cst_362 : f32 to vector<8x128xf32>
    %1451 = arith.mulf %1450, %1449 : vector<8x128xf32>
    %1452 = math.tanh %1451 : vector<8x128xf32>
    %cst_363 = arith.constant 5.000000e-01 : f32
    %1453 = vector.broadcast %cst_363 : f32 to vector<8x128xf32>
    %1454 = arith.mulf %1453, %1452 : vector<8x128xf32>
    %cst_364 = arith.constant 5.000000e-01 : f32
    %1455 = vector.broadcast %cst_364 : f32 to vector<8x128xf32>
    %1456 = arith.addf %1454, %1455 : vector<8x128xf32>
    %1457 = arith.mulf %1446, %1408 : vector<8x128xf32>
    %1458 = arith.mulf %1438, %1448 : vector<8x128xf32>
    %1459 = arith.addf %1457, %1458 : vector<8x128xf32>
    %1460 = math.tanh %1459 : vector<8x128xf32>
    %1461 = arith.mulf %1456, %1460 : vector<8x128xf32>
    %1462 = vector.broadcast %1378 : vector<1x128xf32> to vector<8x128xf32>
    %1463 = arith.mulf %1461, %1462 : vector<8x128xf32>
    %cst_365 = arith.constant dense<0.000000e+00> : vector<8xf32>
    %1464 = vector.multi_reduction <add>, %1463, %cst_365 [1] : vector<8x128xf32> to vector<8xf32>
    %1465 = vector.shape_cast %1464 : vector<8xf32> to vector<8x1xf32>
    %1466 = vector.extract_strided_slice %9 {offsets = [1, 0], sizes = [1, 64], strides = [1, 1]} : vector<11x64xf32> to vector<1x64xf32>
    %1467 = vector.shape_cast %1466 : vector<1x64xf32> to vector<64xf32>
    %1468 = vector.shape_cast %1467 : vector<64xf32> to vector<1x64xf32>
    %1469 = vector.broadcast %1465 : vector<8x1xf32> to vector<8x64xf32>
    %1470 = vector.broadcast %1468 : vector<1x64xf32> to vector<8x64xf32>
    %1471 = arith.mulf %1469, %1470 : vector<8x64xf32>
    %1472 = arith.addf %1421, %1471 : vector<8x64xf32>
    %1473 = vector.broadcast %1152 : vector<8x1xf32> to vector<8x512xf32>
    %1474 = vector.broadcast %1381 : vector<1x512xf32> to vector<8x512xf32>
    %1475 = arith.mulf %1473, %1474 : vector<8x512xf32>
    %1476 = vector.broadcast %1384 : vector<1x512xf32> to vector<8x512xf32>
    %1477 = arith.addf %1475, %1476 : vector<8x512xf32>
    %1478 = vector.broadcast %1465 : vector<8x1xf32> to vector<8x512xf32>
    %1479 = vector.broadcast %1375 : vector<1x512xf32> to vector<8x512xf32>
    %1480 = arith.mulf %1478, %1479 : vector<8x512xf32>
    %1481 = arith.addf %1477, %1480 : vector<8x512xf32>
    %1482 = vector.extract_strided_slice %1481 {offsets = [0, 0], sizes = [8, 128], strides = [1, 1]} : vector<8x512xf32> to vector<8x128xf32>
    %cst_366 = arith.constant 5.000000e-01 : f32
    %1483 = vector.broadcast %cst_366 : f32 to vector<8x128xf32>
    %1484 = arith.mulf %1483, %1482 : vector<8x128xf32>
    %1485 = math.tanh %1484 : vector<8x128xf32>
    %cst_367 = arith.constant 5.000000e-01 : f32
    %1486 = vector.broadcast %cst_367 : f32 to vector<8x128xf32>
    %1487 = arith.mulf %1486, %1485 : vector<8x128xf32>
    %cst_368 = arith.constant 5.000000e-01 : f32
    %1488 = vector.broadcast %cst_368 : f32 to vector<8x128xf32>
    %1489 = arith.addf %1487, %1488 : vector<8x128xf32>
    %1490 = vector.extract_strided_slice %1481 {offsets = [0, 128], sizes = [8, 128], strides = [1, 1]} : vector<8x512xf32> to vector<8x128xf32>
    %cst_369 = arith.constant 5.000000e-01 : f32
    %1491 = vector.broadcast %cst_369 : f32 to vector<8x128xf32>
    %1492 = arith.mulf %1491, %1490 : vector<8x128xf32>
    %1493 = math.tanh %1492 : vector<8x128xf32>
    %cst_370 = arith.constant 5.000000e-01 : f32
    %1494 = vector.broadcast %cst_370 : f32 to vector<8x128xf32>
    %1495 = arith.mulf %1494, %1493 : vector<8x128xf32>
    %cst_371 = arith.constant 5.000000e-01 : f32
    %1496 = vector.broadcast %cst_371 : f32 to vector<8x128xf32>
    %1497 = arith.addf %1495, %1496 : vector<8x128xf32>
    %1498 = vector.extract_strided_slice %1481 {offsets = [0, 256], sizes = [8, 128], strides = [1, 1]} : vector<8x512xf32> to vector<8x128xf32>
    %1499 = math.tanh %1498 : vector<8x128xf32>
    %1500 = vector.extract_strided_slice %1481 {offsets = [0, 384], sizes = [8, 128], strides = [1, 1]} : vector<8x512xf32> to vector<8x128xf32>
    %cst_372 = arith.constant 5.000000e-01 : f32
    %1501 = vector.broadcast %cst_372 : f32 to vector<8x128xf32>
    %1502 = arith.mulf %1501, %1500 : vector<8x128xf32>
    %1503 = math.tanh %1502 : vector<8x128xf32>
    %cst_373 = arith.constant 5.000000e-01 : f32
    %1504 = vector.broadcast %cst_373 : f32 to vector<8x128xf32>
    %1505 = arith.mulf %1504, %1503 : vector<8x128xf32>
    %cst_374 = arith.constant 5.000000e-01 : f32
    %1506 = vector.broadcast %cst_374 : f32 to vector<8x128xf32>
    %1507 = arith.addf %1505, %1506 : vector<8x128xf32>
    %1508 = arith.mulf %1497, %1459 : vector<8x128xf32>
    %1509 = arith.mulf %1489, %1499 : vector<8x128xf32>
    %1510 = arith.addf %1508, %1509 : vector<8x128xf32>
    %1511 = math.tanh %1510 : vector<8x128xf32>
    %1512 = arith.mulf %1507, %1511 : vector<8x128xf32>
    %1513 = vector.broadcast %1378 : vector<1x128xf32> to vector<8x128xf32>
    %1514 = arith.mulf %1512, %1513 : vector<8x128xf32>
    %cst_375 = arith.constant dense<0.000000e+00> : vector<8xf32>
    %1515 = vector.multi_reduction <add>, %1514, %cst_375 [1] : vector<8x128xf32> to vector<8xf32>
    %1516 = vector.shape_cast %1515 : vector<8xf32> to vector<8x1xf32>
    %1517 = vector.extract_strided_slice %9 {offsets = [2, 0], sizes = [1, 64], strides = [1, 1]} : vector<11x64xf32> to vector<1x64xf32>
    %1518 = vector.shape_cast %1517 : vector<1x64xf32> to vector<64xf32>
    %1519 = vector.shape_cast %1518 : vector<64xf32> to vector<1x64xf32>
    %1520 = vector.broadcast %1516 : vector<8x1xf32> to vector<8x64xf32>
    %1521 = vector.broadcast %1519 : vector<1x64xf32> to vector<8x64xf32>
    %1522 = arith.mulf %1520, %1521 : vector<8x64xf32>
    %1523 = arith.addf %1472, %1522 : vector<8x64xf32>
    %1524 = vector.broadcast %1196 : vector<8x1xf32> to vector<8x512xf32>
    %1525 = vector.broadcast %1381 : vector<1x512xf32> to vector<8x512xf32>
    %1526 = arith.mulf %1524, %1525 : vector<8x512xf32>
    %1527 = vector.broadcast %1384 : vector<1x512xf32> to vector<8x512xf32>
    %1528 = arith.addf %1526, %1527 : vector<8x512xf32>
    %1529 = vector.broadcast %1516 : vector<8x1xf32> to vector<8x512xf32>
    %1530 = vector.broadcast %1375 : vector<1x512xf32> to vector<8x512xf32>
    %1531 = arith.mulf %1529, %1530 : vector<8x512xf32>
    %1532 = arith.addf %1528, %1531 : vector<8x512xf32>
    %1533 = vector.extract_strided_slice %1532 {offsets = [0, 0], sizes = [8, 128], strides = [1, 1]} : vector<8x512xf32> to vector<8x128xf32>
    %cst_376 = arith.constant 5.000000e-01 : f32
    %1534 = vector.broadcast %cst_376 : f32 to vector<8x128xf32>
    %1535 = arith.mulf %1534, %1533 : vector<8x128xf32>
    %1536 = math.tanh %1535 : vector<8x128xf32>
    %cst_377 = arith.constant 5.000000e-01 : f32
    %1537 = vector.broadcast %cst_377 : f32 to vector<8x128xf32>
    %1538 = arith.mulf %1537, %1536 : vector<8x128xf32>
    %cst_378 = arith.constant 5.000000e-01 : f32
    %1539 = vector.broadcast %cst_378 : f32 to vector<8x128xf32>
    %1540 = arith.addf %1538, %1539 : vector<8x128xf32>
    %1541 = vector.extract_strided_slice %1532 {offsets = [0, 128], sizes = [8, 128], strides = [1, 1]} : vector<8x512xf32> to vector<8x128xf32>
    %cst_379 = arith.constant 5.000000e-01 : f32
    %1542 = vector.broadcast %cst_379 : f32 to vector<8x128xf32>
    %1543 = arith.mulf %1542, %1541 : vector<8x128xf32>
    %1544 = math.tanh %1543 : vector<8x128xf32>
    %cst_380 = arith.constant 5.000000e-01 : f32
    %1545 = vector.broadcast %cst_380 : f32 to vector<8x128xf32>
    %1546 = arith.mulf %1545, %1544 : vector<8x128xf32>
    %cst_381 = arith.constant 5.000000e-01 : f32
    %1547 = vector.broadcast %cst_381 : f32 to vector<8x128xf32>
    %1548 = arith.addf %1546, %1547 : vector<8x128xf32>
    %1549 = vector.extract_strided_slice %1532 {offsets = [0, 256], sizes = [8, 128], strides = [1, 1]} : vector<8x512xf32> to vector<8x128xf32>
    %1550 = math.tanh %1549 : vector<8x128xf32>
    %1551 = vector.extract_strided_slice %1532 {offsets = [0, 384], sizes = [8, 128], strides = [1, 1]} : vector<8x512xf32> to vector<8x128xf32>
    %cst_382 = arith.constant 5.000000e-01 : f32
    %1552 = vector.broadcast %cst_382 : f32 to vector<8x128xf32>
    %1553 = arith.mulf %1552, %1551 : vector<8x128xf32>
    %1554 = math.tanh %1553 : vector<8x128xf32>
    %cst_383 = arith.constant 5.000000e-01 : f32
    %1555 = vector.broadcast %cst_383 : f32 to vector<8x128xf32>
    %1556 = arith.mulf %1555, %1554 : vector<8x128xf32>
    %cst_384 = arith.constant 5.000000e-01 : f32
    %1557 = vector.broadcast %cst_384 : f32 to vector<8x128xf32>
    %1558 = arith.addf %1556, %1557 : vector<8x128xf32>
    %1559 = arith.mulf %1548, %1510 : vector<8x128xf32>
    %1560 = arith.mulf %1540, %1550 : vector<8x128xf32>
    %1561 = arith.addf %1559, %1560 : vector<8x128xf32>
    %1562 = math.tanh %1561 : vector<8x128xf32>
    %1563 = arith.mulf %1558, %1562 : vector<8x128xf32>
    %1564 = vector.broadcast %1378 : vector<1x128xf32> to vector<8x128xf32>
    %1565 = arith.mulf %1563, %1564 : vector<8x128xf32>
    %cst_385 = arith.constant dense<0.000000e+00> : vector<8xf32>
    %1566 = vector.multi_reduction <add>, %1565, %cst_385 [1] : vector<8x128xf32> to vector<8xf32>
    %1567 = vector.shape_cast %1566 : vector<8xf32> to vector<8x1xf32>
    %1568 = vector.extract_strided_slice %9 {offsets = [3, 0], sizes = [1, 64], strides = [1, 1]} : vector<11x64xf32> to vector<1x64xf32>
    %1569 = vector.shape_cast %1568 : vector<1x64xf32> to vector<64xf32>
    %1570 = vector.shape_cast %1569 : vector<64xf32> to vector<1x64xf32>
    %1571 = vector.broadcast %1567 : vector<8x1xf32> to vector<8x64xf32>
    %1572 = vector.broadcast %1570 : vector<1x64xf32> to vector<8x64xf32>
    %1573 = arith.mulf %1571, %1572 : vector<8x64xf32>
    %1574 = arith.addf %1523, %1573 : vector<8x64xf32>
    %1575 = vector.broadcast %1240 : vector<8x1xf32> to vector<8x512xf32>
    %1576 = vector.broadcast %1381 : vector<1x512xf32> to vector<8x512xf32>
    %1577 = arith.mulf %1575, %1576 : vector<8x512xf32>
    %1578 = vector.broadcast %1384 : vector<1x512xf32> to vector<8x512xf32>
    %1579 = arith.addf %1577, %1578 : vector<8x512xf32>
    %1580 = vector.broadcast %1567 : vector<8x1xf32> to vector<8x512xf32>
    %1581 = vector.broadcast %1375 : vector<1x512xf32> to vector<8x512xf32>
    %1582 = arith.mulf %1580, %1581 : vector<8x512xf32>
    %1583 = arith.addf %1579, %1582 : vector<8x512xf32>
    %1584 = vector.extract_strided_slice %1583 {offsets = [0, 0], sizes = [8, 128], strides = [1, 1]} : vector<8x512xf32> to vector<8x128xf32>
    %cst_386 = arith.constant 5.000000e-01 : f32
    %1585 = vector.broadcast %cst_386 : f32 to vector<8x128xf32>
    %1586 = arith.mulf %1585, %1584 : vector<8x128xf32>
    %1587 = math.tanh %1586 : vector<8x128xf32>
    %cst_387 = arith.constant 5.000000e-01 : f32
    %1588 = vector.broadcast %cst_387 : f32 to vector<8x128xf32>
    %1589 = arith.mulf %1588, %1587 : vector<8x128xf32>
    %cst_388 = arith.constant 5.000000e-01 : f32
    %1590 = vector.broadcast %cst_388 : f32 to vector<8x128xf32>
    %1591 = arith.addf %1589, %1590 : vector<8x128xf32>
    %1592 = vector.extract_strided_slice %1583 {offsets = [0, 128], sizes = [8, 128], strides = [1, 1]} : vector<8x512xf32> to vector<8x128xf32>
    %cst_389 = arith.constant 5.000000e-01 : f32
    %1593 = vector.broadcast %cst_389 : f32 to vector<8x128xf32>
    %1594 = arith.mulf %1593, %1592 : vector<8x128xf32>
    %1595 = math.tanh %1594 : vector<8x128xf32>
    %cst_390 = arith.constant 5.000000e-01 : f32
    %1596 = vector.broadcast %cst_390 : f32 to vector<8x128xf32>
    %1597 = arith.mulf %1596, %1595 : vector<8x128xf32>
    %cst_391 = arith.constant 5.000000e-01 : f32
    %1598 = vector.broadcast %cst_391 : f32 to vector<8x128xf32>
    %1599 = arith.addf %1597, %1598 : vector<8x128xf32>
    %1600 = vector.extract_strided_slice %1583 {offsets = [0, 256], sizes = [8, 128], strides = [1, 1]} : vector<8x512xf32> to vector<8x128xf32>
    %1601 = math.tanh %1600 : vector<8x128xf32>
    %1602 = vector.extract_strided_slice %1583 {offsets = [0, 384], sizes = [8, 128], strides = [1, 1]} : vector<8x512xf32> to vector<8x128xf32>
    %cst_392 = arith.constant 5.000000e-01 : f32
    %1603 = vector.broadcast %cst_392 : f32 to vector<8x128xf32>
    %1604 = arith.mulf %1603, %1602 : vector<8x128xf32>
    %1605 = math.tanh %1604 : vector<8x128xf32>
    %cst_393 = arith.constant 5.000000e-01 : f32
    %1606 = vector.broadcast %cst_393 : f32 to vector<8x128xf32>
    %1607 = arith.mulf %1606, %1605 : vector<8x128xf32>
    %cst_394 = arith.constant 5.000000e-01 : f32
    %1608 = vector.broadcast %cst_394 : f32 to vector<8x128xf32>
    %1609 = arith.addf %1607, %1608 : vector<8x128xf32>
    %1610 = arith.mulf %1599, %1561 : vector<8x128xf32>
    %1611 = arith.mulf %1591, %1601 : vector<8x128xf32>
    %1612 = arith.addf %1610, %1611 : vector<8x128xf32>
    %1613 = math.tanh %1612 : vector<8x128xf32>
    %1614 = arith.mulf %1609, %1613 : vector<8x128xf32>
    %1615 = vector.broadcast %1378 : vector<1x128xf32> to vector<8x128xf32>
    %1616 = arith.mulf %1614, %1615 : vector<8x128xf32>
    %cst_395 = arith.constant dense<0.000000e+00> : vector<8xf32>
    %1617 = vector.multi_reduction <add>, %1616, %cst_395 [1] : vector<8x128xf32> to vector<8xf32>
    %1618 = vector.shape_cast %1617 : vector<8xf32> to vector<8x1xf32>
    %1619 = vector.extract_strided_slice %9 {offsets = [4, 0], sizes = [1, 64], strides = [1, 1]} : vector<11x64xf32> to vector<1x64xf32>
    %1620 = vector.shape_cast %1619 : vector<1x64xf32> to vector<64xf32>
    %1621 = vector.shape_cast %1620 : vector<64xf32> to vector<1x64xf32>
    %1622 = vector.broadcast %1618 : vector<8x1xf32> to vector<8x64xf32>
    %1623 = vector.broadcast %1621 : vector<1x64xf32> to vector<8x64xf32>
    %1624 = arith.mulf %1622, %1623 : vector<8x64xf32>
    %1625 = arith.addf %1574, %1624 : vector<8x64xf32>
    %1626 = vector.broadcast %1284 : vector<8x1xf32> to vector<8x512xf32>
    %1627 = vector.broadcast %1381 : vector<1x512xf32> to vector<8x512xf32>
    %1628 = arith.mulf %1626, %1627 : vector<8x512xf32>
    %1629 = vector.broadcast %1384 : vector<1x512xf32> to vector<8x512xf32>
    %1630 = arith.addf %1628, %1629 : vector<8x512xf32>
    %1631 = vector.broadcast %1618 : vector<8x1xf32> to vector<8x512xf32>
    %1632 = vector.broadcast %1375 : vector<1x512xf32> to vector<8x512xf32>
    %1633 = arith.mulf %1631, %1632 : vector<8x512xf32>
    %1634 = arith.addf %1630, %1633 : vector<8x512xf32>
    %1635 = vector.extract_strided_slice %1634 {offsets = [0, 0], sizes = [8, 128], strides = [1, 1]} : vector<8x512xf32> to vector<8x128xf32>
    %cst_396 = arith.constant 5.000000e-01 : f32
    %1636 = vector.broadcast %cst_396 : f32 to vector<8x128xf32>
    %1637 = arith.mulf %1636, %1635 : vector<8x128xf32>
    %1638 = math.tanh %1637 : vector<8x128xf32>
    %cst_397 = arith.constant 5.000000e-01 : f32
    %1639 = vector.broadcast %cst_397 : f32 to vector<8x128xf32>
    %1640 = arith.mulf %1639, %1638 : vector<8x128xf32>
    %cst_398 = arith.constant 5.000000e-01 : f32
    %1641 = vector.broadcast %cst_398 : f32 to vector<8x128xf32>
    %1642 = arith.addf %1640, %1641 : vector<8x128xf32>
    %1643 = vector.extract_strided_slice %1634 {offsets = [0, 128], sizes = [8, 128], strides = [1, 1]} : vector<8x512xf32> to vector<8x128xf32>
    %cst_399 = arith.constant 5.000000e-01 : f32
    %1644 = vector.broadcast %cst_399 : f32 to vector<8x128xf32>
    %1645 = arith.mulf %1644, %1643 : vector<8x128xf32>
    %1646 = math.tanh %1645 : vector<8x128xf32>
    %cst_400 = arith.constant 5.000000e-01 : f32
    %1647 = vector.broadcast %cst_400 : f32 to vector<8x128xf32>
    %1648 = arith.mulf %1647, %1646 : vector<8x128xf32>
    %cst_401 = arith.constant 5.000000e-01 : f32
    %1649 = vector.broadcast %cst_401 : f32 to vector<8x128xf32>
    %1650 = arith.addf %1648, %1649 : vector<8x128xf32>
    %1651 = vector.extract_strided_slice %1634 {offsets = [0, 256], sizes = [8, 128], strides = [1, 1]} : vector<8x512xf32> to vector<8x128xf32>
    %1652 = math.tanh %1651 : vector<8x128xf32>
    %1653 = vector.extract_strided_slice %1634 {offsets = [0, 384], sizes = [8, 128], strides = [1, 1]} : vector<8x512xf32> to vector<8x128xf32>
    %cst_402 = arith.constant 5.000000e-01 : f32
    %1654 = vector.broadcast %cst_402 : f32 to vector<8x128xf32>
    %1655 = arith.mulf %1654, %1653 : vector<8x128xf32>
    %1656 = math.tanh %1655 : vector<8x128xf32>
    %cst_403 = arith.constant 5.000000e-01 : f32
    %1657 = vector.broadcast %cst_403 : f32 to vector<8x128xf32>
    %1658 = arith.mulf %1657, %1656 : vector<8x128xf32>
    %cst_404 = arith.constant 5.000000e-01 : f32
    %1659 = vector.broadcast %cst_404 : f32 to vector<8x128xf32>
    %1660 = arith.addf %1658, %1659 : vector<8x128xf32>
    %1661 = arith.mulf %1650, %1612 : vector<8x128xf32>
    %1662 = arith.mulf %1642, %1652 : vector<8x128xf32>
    %1663 = arith.addf %1661, %1662 : vector<8x128xf32>
    %1664 = math.tanh %1663 : vector<8x128xf32>
    %1665 = arith.mulf %1660, %1664 : vector<8x128xf32>
    %1666 = vector.broadcast %1378 : vector<1x128xf32> to vector<8x128xf32>
    %1667 = arith.mulf %1665, %1666 : vector<8x128xf32>
    %cst_405 = arith.constant dense<0.000000e+00> : vector<8xf32>
    %1668 = vector.multi_reduction <add>, %1667, %cst_405 [1] : vector<8x128xf32> to vector<8xf32>
    %1669 = vector.shape_cast %1668 : vector<8xf32> to vector<8x1xf32>
    %1670 = vector.extract_strided_slice %9 {offsets = [5, 0], sizes = [1, 64], strides = [1, 1]} : vector<11x64xf32> to vector<1x64xf32>
    %1671 = vector.shape_cast %1670 : vector<1x64xf32> to vector<64xf32>
    %1672 = vector.shape_cast %1671 : vector<64xf32> to vector<1x64xf32>
    %1673 = vector.broadcast %1669 : vector<8x1xf32> to vector<8x64xf32>
    %1674 = vector.broadcast %1672 : vector<1x64xf32> to vector<8x64xf32>
    %1675 = arith.mulf %1673, %1674 : vector<8x64xf32>
    %1676 = arith.addf %1625, %1675 : vector<8x64xf32>
    %1677 = vector.broadcast %1328 : vector<8x1xf32> to vector<8x512xf32>
    %1678 = vector.broadcast %1381 : vector<1x512xf32> to vector<8x512xf32>
    %1679 = arith.mulf %1677, %1678 : vector<8x512xf32>
    %1680 = vector.broadcast %1384 : vector<1x512xf32> to vector<8x512xf32>
    %1681 = arith.addf %1679, %1680 : vector<8x512xf32>
    %1682 = vector.broadcast %1669 : vector<8x1xf32> to vector<8x512xf32>
    %1683 = vector.broadcast %1375 : vector<1x512xf32> to vector<8x512xf32>
    %1684 = arith.mulf %1682, %1683 : vector<8x512xf32>
    %1685 = arith.addf %1681, %1684 : vector<8x512xf32>
    %1686 = vector.extract_strided_slice %1685 {offsets = [0, 0], sizes = [8, 128], strides = [1, 1]} : vector<8x512xf32> to vector<8x128xf32>
    %cst_406 = arith.constant 5.000000e-01 : f32
    %1687 = vector.broadcast %cst_406 : f32 to vector<8x128xf32>
    %1688 = arith.mulf %1687, %1686 : vector<8x128xf32>
    %1689 = math.tanh %1688 : vector<8x128xf32>
    %cst_407 = arith.constant 5.000000e-01 : f32
    %1690 = vector.broadcast %cst_407 : f32 to vector<8x128xf32>
    %1691 = arith.mulf %1690, %1689 : vector<8x128xf32>
    %cst_408 = arith.constant 5.000000e-01 : f32
    %1692 = vector.broadcast %cst_408 : f32 to vector<8x128xf32>
    %1693 = arith.addf %1691, %1692 : vector<8x128xf32>
    %1694 = vector.extract_strided_slice %1685 {offsets = [0, 128], sizes = [8, 128], strides = [1, 1]} : vector<8x512xf32> to vector<8x128xf32>
    %cst_409 = arith.constant 5.000000e-01 : f32
    %1695 = vector.broadcast %cst_409 : f32 to vector<8x128xf32>
    %1696 = arith.mulf %1695, %1694 : vector<8x128xf32>
    %1697 = math.tanh %1696 : vector<8x128xf32>
    %cst_410 = arith.constant 5.000000e-01 : f32
    %1698 = vector.broadcast %cst_410 : f32 to vector<8x128xf32>
    %1699 = arith.mulf %1698, %1697 : vector<8x128xf32>
    %cst_411 = arith.constant 5.000000e-01 : f32
    %1700 = vector.broadcast %cst_411 : f32 to vector<8x128xf32>
    %1701 = arith.addf %1699, %1700 : vector<8x128xf32>
    %1702 = vector.extract_strided_slice %1685 {offsets = [0, 256], sizes = [8, 128], strides = [1, 1]} : vector<8x512xf32> to vector<8x128xf32>
    %1703 = math.tanh %1702 : vector<8x128xf32>
    %1704 = vector.extract_strided_slice %1685 {offsets = [0, 384], sizes = [8, 128], strides = [1, 1]} : vector<8x512xf32> to vector<8x128xf32>
    %cst_412 = arith.constant 5.000000e-01 : f32
    %1705 = vector.broadcast %cst_412 : f32 to vector<8x128xf32>
    %1706 = arith.mulf %1705, %1704 : vector<8x128xf32>
    %1707 = math.tanh %1706 : vector<8x128xf32>
    %cst_413 = arith.constant 5.000000e-01 : f32
    %1708 = vector.broadcast %cst_413 : f32 to vector<8x128xf32>
    %1709 = arith.mulf %1708, %1707 : vector<8x128xf32>
    %cst_414 = arith.constant 5.000000e-01 : f32
    %1710 = vector.broadcast %cst_414 : f32 to vector<8x128xf32>
    %1711 = arith.addf %1709, %1710 : vector<8x128xf32>
    %1712 = arith.mulf %1701, %1663 : vector<8x128xf32>
    %1713 = arith.mulf %1693, %1703 : vector<8x128xf32>
    %1714 = arith.addf %1712, %1713 : vector<8x128xf32>
    %1715 = math.tanh %1714 : vector<8x128xf32>
    %1716 = arith.mulf %1711, %1715 : vector<8x128xf32>
    %1717 = vector.broadcast %1378 : vector<1x128xf32> to vector<8x128xf32>
    %1718 = arith.mulf %1716, %1717 : vector<8x128xf32>
    %cst_415 = arith.constant dense<0.000000e+00> : vector<8xf32>
    %1719 = vector.multi_reduction <add>, %1718, %cst_415 [1] : vector<8x128xf32> to vector<8xf32>
    %1720 = vector.shape_cast %1719 : vector<8xf32> to vector<8x1xf32>
    %1721 = vector.extract_strided_slice %9 {offsets = [6, 0], sizes = [1, 64], strides = [1, 1]} : vector<11x64xf32> to vector<1x64xf32>
    %1722 = vector.shape_cast %1721 : vector<1x64xf32> to vector<64xf32>
    %1723 = vector.shape_cast %1722 : vector<64xf32> to vector<1x64xf32>
    %1724 = vector.broadcast %1720 : vector<8x1xf32> to vector<8x64xf32>
    %1725 = vector.broadcast %1723 : vector<1x64xf32> to vector<8x64xf32>
    %1726 = arith.mulf %1724, %1725 : vector<8x64xf32>
    %1727 = arith.addf %1676, %1726 : vector<8x64xf32>
    %1728 = vector.broadcast %1372 : vector<8x1xf32> to vector<8x512xf32>
    %1729 = vector.broadcast %1381 : vector<1x512xf32> to vector<8x512xf32>
    %1730 = arith.mulf %1728, %1729 : vector<8x512xf32>
    %1731 = vector.broadcast %1384 : vector<1x512xf32> to vector<8x512xf32>
    %1732 = arith.addf %1730, %1731 : vector<8x512xf32>
    %1733 = vector.broadcast %1720 : vector<8x1xf32> to vector<8x512xf32>
    %1734 = vector.broadcast %1375 : vector<1x512xf32> to vector<8x512xf32>
    %1735 = arith.mulf %1733, %1734 : vector<8x512xf32>
    %1736 = arith.addf %1732, %1735 : vector<8x512xf32>
    %1737 = vector.extract_strided_slice %1736 {offsets = [0, 0], sizes = [8, 128], strides = [1, 1]} : vector<8x512xf32> to vector<8x128xf32>
    %cst_416 = arith.constant 5.000000e-01 : f32
    %1738 = vector.broadcast %cst_416 : f32 to vector<8x128xf32>
    %1739 = arith.mulf %1738, %1737 : vector<8x128xf32>
    %1740 = math.tanh %1739 : vector<8x128xf32>
    %cst_417 = arith.constant 5.000000e-01 : f32
    %1741 = vector.broadcast %cst_417 : f32 to vector<8x128xf32>
    %1742 = arith.mulf %1741, %1740 : vector<8x128xf32>
    %cst_418 = arith.constant 5.000000e-01 : f32
    %1743 = vector.broadcast %cst_418 : f32 to vector<8x128xf32>
    %1744 = arith.addf %1742, %1743 : vector<8x128xf32>
    %1745 = vector.extract_strided_slice %1736 {offsets = [0, 128], sizes = [8, 128], strides = [1, 1]} : vector<8x512xf32> to vector<8x128xf32>
    %cst_419 = arith.constant 5.000000e-01 : f32
    %1746 = vector.broadcast %cst_419 : f32 to vector<8x128xf32>
    %1747 = arith.mulf %1746, %1745 : vector<8x128xf32>
    %1748 = math.tanh %1747 : vector<8x128xf32>
    %cst_420 = arith.constant 5.000000e-01 : f32
    %1749 = vector.broadcast %cst_420 : f32 to vector<8x128xf32>
    %1750 = arith.mulf %1749, %1748 : vector<8x128xf32>
    %cst_421 = arith.constant 5.000000e-01 : f32
    %1751 = vector.broadcast %cst_421 : f32 to vector<8x128xf32>
    %1752 = arith.addf %1750, %1751 : vector<8x128xf32>
    %1753 = vector.extract_strided_slice %1736 {offsets = [0, 256], sizes = [8, 128], strides = [1, 1]} : vector<8x512xf32> to vector<8x128xf32>
    %1754 = math.tanh %1753 : vector<8x128xf32>
    %1755 = vector.extract_strided_slice %1736 {offsets = [0, 384], sizes = [8, 128], strides = [1, 1]} : vector<8x512xf32> to vector<8x128xf32>
    %cst_422 = arith.constant 5.000000e-01 : f32
    %1756 = vector.broadcast %cst_422 : f32 to vector<8x128xf32>
    %1757 = arith.mulf %1756, %1755 : vector<8x128xf32>
    %1758 = math.tanh %1757 : vector<8x128xf32>
    %cst_423 = arith.constant 5.000000e-01 : f32
    %1759 = vector.broadcast %cst_423 : f32 to vector<8x128xf32>
    %1760 = arith.mulf %1759, %1758 : vector<8x128xf32>
    %cst_424 = arith.constant 5.000000e-01 : f32
    %1761 = vector.broadcast %cst_424 : f32 to vector<8x128xf32>
    %1762 = arith.addf %1760, %1761 : vector<8x128xf32>
    %1763 = arith.mulf %1752, %1714 : vector<8x128xf32>
    %1764 = arith.mulf %1744, %1754 : vector<8x128xf32>
    %1765 = arith.addf %1763, %1764 : vector<8x128xf32>
    %1766 = math.tanh %1765 : vector<8x128xf32>
    %1767 = arith.mulf %1762, %1766 : vector<8x128xf32>
    %1768 = vector.broadcast %1378 : vector<1x128xf32> to vector<8x128xf32>
    %1769 = arith.mulf %1767, %1768 : vector<8x128xf32>
    %cst_425 = arith.constant dense<0.000000e+00> : vector<8xf32>
    %1770 = vector.multi_reduction <add>, %1769, %cst_425 [1] : vector<8x128xf32> to vector<8xf32>
    %1771 = vector.shape_cast %1770 : vector<8xf32> to vector<8x1xf32>
    %1772 = vector.extract_strided_slice %9 {offsets = [7, 0], sizes = [1, 64], strides = [1, 1]} : vector<11x64xf32> to vector<1x64xf32>
    %1773 = vector.shape_cast %1772 : vector<1x64xf32> to vector<64xf32>
    %1774 = vector.shape_cast %1773 : vector<64xf32> to vector<1x64xf32>
    %1775 = vector.broadcast %1771 : vector<8x1xf32> to vector<8x64xf32>
    %1776 = vector.broadcast %1774 : vector<1x64xf32> to vector<8x64xf32>
    %1777 = arith.mulf %1775, %1776 : vector<8x64xf32>
    %1778 = arith.addf %1727, %1777 : vector<8x64xf32>
    %c0_426 = arith.constant 0 : index
    %c0_427 = arith.constant 0 : index
    %1779 = vector.load %arg2[%c0_426, %c0_427] : memref<8x2xf32, #tpu.memory_space<vmem>>, vector<8x2xf32>
    %c0_428 = arith.constant 0 : index
    %c0_429 = arith.constant 0 : index
    %1780 = vector.load %arg3[%c0_428, %c0_429] : memref<8x1xf32, #tpu.memory_space<vmem>>, vector<8x1xf32>
    %1781 = vector.extract_strided_slice %1779 {offsets = [0, 0], sizes = [8, 1], strides = [1, 1]} : vector<8x2xf32> to vector<8x1xf32>
    %1782 = vector.extract_strided_slice %9 {offsets = [8, 0], sizes = [1, 64], strides = [1, 1]} : vector<11x64xf32> to vector<1x64xf32>
    %1783 = vector.shape_cast %1782 : vector<1x64xf32> to vector<64xf32>
    %1784 = vector.shape_cast %1783 : vector<64xf32> to vector<1x64xf32>
    %1785 = vector.broadcast %1781 : vector<8x1xf32> to vector<8x64xf32>
    %1786 = vector.broadcast %1784 : vector<1x64xf32> to vector<8x64xf32>
    %1787 = arith.mulf %1785, %1786 : vector<8x64xf32>
    %1788 = arith.addf %1778, %1787 : vector<8x64xf32>
    %1789 = vector.extract_strided_slice %1779 {offsets = [0, 1], sizes = [8, 1], strides = [1, 1]} : vector<8x2xf32> to vector<8x1xf32>
    %1790 = vector.extract_strided_slice %9 {offsets = [9, 0], sizes = [1, 64], strides = [1, 1]} : vector<11x64xf32> to vector<1x64xf32>
    %1791 = vector.shape_cast %1790 : vector<1x64xf32> to vector<64xf32>
    %1792 = vector.shape_cast %1791 : vector<64xf32> to vector<1x64xf32>
    %1793 = vector.broadcast %1789 : vector<8x1xf32> to vector<8x64xf32>
    %1794 = vector.broadcast %1792 : vector<1x64xf32> to vector<8x64xf32>
    %1795 = arith.mulf %1793, %1794 : vector<8x64xf32>
    %1796 = arith.addf %1788, %1795 : vector<8x64xf32>
    %1797 = vector.extract_strided_slice %9 {offsets = [10, 0], sizes = [1, 64], strides = [1, 1]} : vector<11x64xf32> to vector<1x64xf32>
    %1798 = vector.shape_cast %1797 : vector<1x64xf32> to vector<64xf32>
    %1799 = vector.shape_cast %1798 : vector<64xf32> to vector<1x64xf32>
    %1800 = vector.broadcast %1780 : vector<8x1xf32> to vector<8x64xf32>
    %1801 = vector.broadcast %1799 : vector<1x64xf32> to vector<8x64xf32>
    %1802 = arith.mulf %1800, %1801 : vector<8x64xf32>
    %1803 = arith.addf %1796, %1802 : vector<8x64xf32>
    %c0_430 = arith.constant 0 : index
    %c0_431 = arith.constant 0 : index
    %1804 = vector.load %arg10[%c0_430, %c0_431] : memref<1x64xf32, #tpu.memory_space<vmem>>, vector<1x64xf32>
    %1805 = vector.broadcast %1804 : vector<1x64xf32> to vector<8x64xf32>
    %1806 = arith.addf %1803, %1805 : vector<8x64xf32>
    %cst_432 = arith.constant 0.000000e+00 : f32
    %1807 = vector.broadcast %cst_432 : f32 to vector<8x64xf32>
    %1808 = arith.maximumf %1806, %1807 : vector<8x64xf32>
    %c0_433 = arith.constant 0 : index
    %c0_434 = arith.constant 0 : index
    %1809 = vector.load %arg11[%c0_433, %c0_434] : memref<1x64xf32, #tpu.memory_space<vmem>>, vector<1x64xf32>
    %1810 = vector.broadcast %1809 : vector<1x64xf32> to vector<8x64xf32>
    %1811 = arith.mulf %1808, %1810 : vector<8x64xf32>
    %cst_435 = arith.constant dense<0.000000e+00> : vector<8xf32>
    %1812 = vector.multi_reduction <add>, %1811, %cst_435 [1] : vector<8x64xf32> to vector<8xf32>
    %1813 = vector.shape_cast %1812 : vector<8xf32> to vector<8x1xf32>
    %c0_436 = arith.constant 0 : index
    %c0_437 = arith.constant 0 : index
    %1814 = vector.load %arg12[%c0_436, %c0_437] : memref<1x1xf32, #tpu.memory_space<vmem>>, vector<1x1xf32>
    %1815 = vector.broadcast %1814 : vector<1x1xf32> to vector<8x1xf32>
    %1816 = arith.addf %1813, %1815 : vector<8x1xf32>
    %c0_438 = arith.constant 0 : index
    %c0_439 = arith.constant 0 : index
    %1817 = vector.load %arg13[%c0_438, %c0_439] : memref<8x1xf32, #tpu.memory_space<vmem>>, vector<8x1xf32>
    tpu.vector_store %arg13[%c0_438, %c0_439], %1816 {strides = array<i32>} : memref<8x1xf32, #tpu.memory_space<vmem>>, vector<8x1xf32>,
    return
  }
  func.func @transform_0(%arg0: i32) -> (i32, i32, i32) {
    %c0_i32 = arith.constant 0 : i32
    %c0_i32_0 = arith.constant 0 : i32
    %c0_i32_1 = arith.constant 0 : i32
    return %c0_i32, %arg0, %c0_i32_0 : i32, i32, i32
  }
  func.func @transform_1(%arg0: i32) -> (i32, i32) {
    %c0_i32 = arith.constant 0 : i32
    %c0_i32_0 = arith.constant 0 : i32
    return %arg0, %c0_i32 : i32, i32
  }
  func.func @transform_2(%arg0: i32) -> (i32, i32) {
    %c0_i32 = arith.constant 0 : i32
    %c0_i32_0 = arith.constant 0 : i32
    return %arg0, %c0_i32 : i32, i32
  }
  func.func @transform_3(%arg0: i32) -> (i32, i32) {
    %c0_i32 = arith.constant 0 : i32
    %c0_i32_0 = arith.constant 0 : i32
    %c0_i32_1 = arith.constant 0 : i32
    return %c0_i32, %c0_i32_0 : i32, i32
  }
  func.func @transform_4(%arg0: i32) -> (i32, i32) {
    %c0_i32 = arith.constant 0 : i32
    %c0_i32_0 = arith.constant 0 : i32
    %c0_i32_1 = arith.constant 0 : i32
    return %c0_i32, %c0_i32_0 : i32, i32
  }
  func.func @transform_5(%arg0: i32) -> (i32, i32) {
    %c0_i32 = arith.constant 0 : i32
    %c0_i32_0 = arith.constant 0 : i32
    %c0_i32_1 = arith.constant 0 : i32
    return %c0_i32, %c0_i32_0 : i32, i32
  }
  func.func @transform_6(%arg0: i32) -> (i32, i32) {
    %c0_i32 = arith.constant 0 : i32
    %c0_i32_0 = arith.constant 0 : i32
    %c0_i32_1 = arith.constant 0 : i32
    return %c0_i32, %c0_i32_0 : i32, i32
  }
  func.func @transform_7(%arg0: i32) -> (i32, i32) {
    %c0_i32 = arith.constant 0 : i32
    %c0_i32_0 = arith.constant 0 : i32
    %c0_i32_1 = arith.constant 0 : i32
    return %c0_i32, %c0_i32_0 : i32, i32
  }
  func.func @transform_8(%arg0: i32) -> (i32, i32) {
    %c0_i32 = arith.constant 0 : i32
    %c0_i32_0 = arith.constant 0 : i32
    %c0_i32_1 = arith.constant 0 : i32
    return %c0_i32, %c0_i32_0 : i32, i32
  }
  func.func @transform_9(%arg0: i32) -> (i32, i32) {
    %c0_i32 = arith.constant 0 : i32
    %c0_i32_0 = arith.constant 0 : i32
    %c0_i32_1 = arith.constant 0 : i32
    return %c0_i32, %c0_i32_0 : i32, i32
  }
  func.func @transform_10(%arg0: i32) -> (i32, i32) {
    %c0_i32 = arith.constant 0 : i32
    %c0_i32_0 = arith.constant 0 : i32
    %c0_i32_1 = arith.constant 0 : i32
    return %c0_i32, %c0_i32_0 : i32, i32
  }
  func.func @transform_11(%arg0: i32) -> (i32, i32) {
    %c0_i32 = arith.constant 0 : i32
    %c0_i32_0 = arith.constant 0 : i32
    %c0_i32_1 = arith.constant 0 : i32
    return %c0_i32, %c0_i32_0 : i32, i32
  }
  func.func @transform_12(%arg0: i32) -> (i32, i32) {
    %c0_i32 = arith.constant 0 : i32
    %c0_i32_0 = arith.constant 0 : i32
    return %arg0, %c0_i32 : i32, i32
  }
}

</mosaic_0001>

<bundles_post_ra>
// kernel: taxi_lstm_forward.1
= control target key start
LH: loop header
LB: loop body
LE: loop exit
PB: predicated region body
PF: predicated region fallthrough
CT: control target
= control target key end

     0   :  { %v4067_v3 = vmov 0.0   ;;  %vm126_vm0 = vcmask 1040384   ;;  %vm101_vm1 = vcmask 400384   ;;  %v81_v44 = vlaneseq  ;;  %s4054_s3 = inlined_call_operand.vmem [shape: f32[49,512], index: 3, kind: input, shape index: {}]   ;;  %s4055_s0 = inlined_call_operand.vmem [shape: f32[8,8,49], index: 0, kind: input, shape index: {}]   ;;  %s4056_s6 = inlined_call_operand.vmem [shape: f32[5,512], index: 6, kind: input, shape index: {}]   ;;  %s4057_s7 = inlined_call_operand.vmem [shape: f32[5,128], index: 7, kind: input, shape index: {}]   ;;  %s4058_s4 = inlined_call_operand.vmem [shape: f32[4,512], index: 4, kind: input, shape index: {}]   ;;  %s4059_s5 = inlined_call_operand.vmem [shape: f32[5,512], index: 5, kind: input, shape index: {}]   ;;  %s4060_s1 = inlined_call_operand.vmem [shape: f32[8,2], index: 1, kind: input, shape index: {}]   ;;  %s4061_s2 = inlined_call_operand.vmem [shape: f32[8,1], index: 2, kind: input, shape index: {}]   ;;  %s4062_s11 = inlined_call_operand.<no memory space> [shape: f32[1,1], index: 11, kind: input, shape index: {}]   ;;  %s4063_s8 = inlined_call_operand.vmem [shape: f32[11,64], index: 8, kind: input, shape index: {}]   ;;  %s4064_s9 = inlined_call_operand.vmem [shape: f32[1,64], index: 9, kind: input, shape index: {}]   ;;  %s4065_s10 = inlined_call_operand.vmem [shape: f32[1,64], index: 10, kind: input, shape index: {}]   ;;  %s4066_s12 = inlined_call_operand.vmem [shape: f32[8,1], index: 12, kind: output, shape index: {}]  }
   0x1   :  { %v52_v0 = vld [vmem:[%s4054_s3 + $0x8] sm:$0xff]  ;;  %v51_v2 = vld [vmem:[%s4054_s3] sm:$0xff]  ;;  %203 = vmatprep.mubr.f32.mxu0 %v4067_v3  ;;  %315 = vmatprep.mubr.f32.mxu1 %v4067_v3  ;;  %v54_v12 = vld [vmem:[%s4054_s3 + $0x18] sm:$0xff]  ;;  %vm2125_vm2 = vcmask 523264   ;;  %vm2137_vm3 = vcmask 7168  }
   0x2   :  { %v56_v1 = vld [vmem:[%s4054_s3 + $0x28] sm:$0xff]  ;;  %v55_v5 = vld [vmem:[%s4054_s3 + $0x20] sm:$0xff]  ;;  %v58_v13 = vld [vmem:[%s4054_s3 + $0x38] sm:$0xff]  ;;  %v2790_v45 = vshrl.u32 %v81_v44, 7 }
   0x3   :  { %v2182_v4 = vpack.c.bf16 %v56_v1, %v52_v0  ;;  %v60_v6 = vld [vmem:[%s4054_s3 + $0x48] sm:$0xff]  ;;  %v2184_v8 = vpack.c.bf16 %v55_v5, %v51_v2  ;;  %v59_v10 = vld [vmem:[%s4054_s3 + $0x40] sm:$0xff]  ;;  %v53_v14 = vld [vmem:[%s4054_s3 + $0x10] sm:$0xff]  ;;  %v2194_v17 = vpack.c.bf16 %v58_v13, %v54_v12 }
   0x4   :  { %v64_v7 = vld [vmem:[%s4054_s3 + $0x68] sm:$0xff]  ;;  %v63_v11 = vld [vmem:[%s4054_s3 + $0x60] sm:$0xff]  ;;  %v57_v15 = vld [vmem:[%s4054_s3 + $0x30] sm:$0xff]  ;;  %4198 = vst [vmem:[#allocation3_spill] sm:$0xff] %v2790_v45  ;;  %v2793_v46 = vsub.s32 0, %v2790_v45  ;;  %v2799_v48 = vsub.s32 2, %v2790_v45 }
   0x5   :  { %v2186_v9 = vpack.c.bf16 %v64_v7, %v60_v6  ;;  %2183 = vmatprep.subr.bf16.mxu0 %v2182_v4  ;;  %v2188_v16 = vpack.c.bf16 %v63_v11, %v59_v10  ;;  %v2196_v18 = vpack.c.bf16 %v57_v15, %v53_v14  ;;  %v68_v19 = vld [vmem:[%s4054_s3 + $0x88] sm:$0xff]  ;;  %v67_v21 = vld [vmem:[%s4054_s3 + $0x80] sm:$0xff]  ;;  %v62_v24 = vld [vmem:[%s4054_s3 + $0x58] sm:$0xff]  ;;  %2195 = vmatprep.subr.bf16.mxu1 %v2194_v17  ;;  %v2805_v50 = vsub.s32 3, %v2790_v45 }
   0x6   :  { %2185 = vmatpush1.bf16.msra.mxu0 %v2184_v8  ;;  %v72_v20 = vld [vmem:[%s4054_s3 + $0xa8] sm:$0xff]  ;;  %v71_v23 = vld [vmem:[%s4054_s3 + $0xa0] sm:$0xff]  ;;  %v66_v25 = vld [vmem:[%s4054_s3 + $0x78] sm:$0xff]  ;;  %4199 = vst [vmem:[#allocation4_spill] sm:$0xff] %v2793_v46  ;;  %v2835_v17 = vsub.s32 1, %v2790_v45 }
   0x7   :  { %2187 = vmatprep.subr.bf16.mxu0 %v2186_v9  ;;  %v2190_v22 = vpack.c.bf16 %v72_v20, %v68_v19  ;;  %v2198_v26 = vpack.c.bf16 %v66_v25, %v62_v24  ;;  %v61_v27 = vld [vmem:[%s4054_s3 + $0x50] sm:$0xff]  ;;  %2197 = vmatpush1.bf16.msra.mxu1 %v2196_v18  ;;  %v70_v30 = vld [vmem:[%s4054_s3 + $0x98] sm:$0xff]  ;;  %v2192_v32 = vpack.c.bf16 %v71_v23, %v67_v21  ;;  %v76_v36 = vld [vmem:[%s4054_s3 + $0xc8] sm:$0x1] }
   0x8   :  { %v65_v28 = vld [vmem:[%s4054_s3 + $0x70] sm:$0xff]  ;;  %v74_v31 = vld [vmem:[%s4054_s3 + $0xb8] sm:$0xff]  ;;  %v75_v38 = vld [vmem:[%s4054_s3 + $0xc0] sm:$0x1]  ;;  %4200 = vst [vmem:[#allocation5_spill] sm:$0xff] %v2799_v48 }
   0x9   :  { %v2200_v29 = vpack.c.bf16 %v65_v28, %v61_v27  ;;  %2199 = vmatprep.subr.bf16.mxu1 %v2198_v26  ;;  %v2202_v33 = vpack.c.bf16 %v74_v31, %v70_v30  ;;  %v69_v34 = vld [vmem:[%s4054_s3 + $0x90] sm:$0xff]  ;;  %v78_v39 = vld [vmem:[%s4054_s3 + $0xd8] sm:$0x1]  ;;  %v43_v40 = vld [vmem:[%s4055_s0] sm:$0xff]  ;;  %4202 = vst [vmem:[#allocation7_spill] sm:$0xff] %v2805_v50 }
   0xa   :  { %2189 = vmatpush1.bf16.msra.mxu0 %v2188_v16  ;;  %v73_v35 = vld [vmem:[%s4054_s3 + $0xb0] sm:$0xff]  ;;  %v44_v42 = vld [vmem:[%s4055_s0 + $0x8] sm:$0xff]  ;;  %v2822_v12 = vld [vmem:[%s4057_s7] ss:$0 sm:$0xff]  ;;  %4205 = vst [vmem:[#allocation10_spill] sm:$0xff] %v2835_v17 }
   0xb   :  { %2191 = vmatprep.subr.bf16.mxu0 %v2190_v22  ;;  %2201 = vmatpush1.bf16.msra.mxu1 %v2200_v29  ;;  %v2204_v37 = vpack.c.bf16 %v73_v35, %v69_v34  ;;  %v77_v41 = vld [vmem:[%s4054_s3 + $0xd0] sm:$0x1]  ;;  %v46_v15 = vld [vmem:[%s4055_s0 + $0x18] sm:$0xff]  ;;  %v2843_v19 = vld [vmem:[%s4058_s4] ss:$4 sm:$0xf] }
   0xc   :  { %2203 = vmatprep.subr.bf16.mxu1 %v2202_v33  ;;  %v45_v43 = vld [vmem:[%s4055_s0 + $0x10] sm:$0xff]  ;;  %v2861_v24 = vrot.slane %v2843_v19, %v2793_v46  ;;  %v2874_v30 = vrot.slane %v2843_v19, %v2799_v48  ;;  %v2882_v35 = vrot.slane %v2843_v19, %v2805_v50 }
   0xd   :  { %v79_v47 = vld [vmem:[%s4056_s6] ss:$8 sm:$0xf]  ;;  %v2851_v21 = vld [vmem:[%s4056_s6 + $0x1] ss:$8 sm:$0xf] }
   0xe   :  { %2193 = vmatpush1.bf16.msra.mxu0 %v2192_v32  ;;  %v2802_v49 = vrot.slane %v79_v47, %v2793_v46  ;;  %v2808_v52 = vrot.slane %v79_v47, %v2799_v48  ;;  %v2812_v55 = vrot.slane %v79_v47, %v2805_v50  ;;  %v366_v18 = vld [vmem:[%s4059_s5] ss:$8 sm:$0xf]  ;;  %v2846_v20 = vrot.slane %v79_v47, %v2835_v17 }
   0xf   :  { %2143 = vmatprep.subr.msk.mxu0 %vm126_vm0, %v76_v36  ;;  %2205 = vmatpush1.bf16.msra.mxu1 %v2204_v37  ;;  %v2854_v22 = vrot.slane %v366_v18, %v2793_v46  ;;  %v2857_v23 = vrot.slane %v366_v18, %v2835_v17  ;;  %4209 = vst [vmem:[#allocation14_spill] sm:$0xff] %v2861_v24  ;;  %4212 = vst [vmem:[#allocation17_spill] sm:$0xff] %v2874_v30 }
  0x10   :  { %2153 = vmatprep.subr.msk.mxu1 %vm126_vm0, %v78_v39  ;;  %4201 = vst [vmem:[#allocation6_spill] sm:$0xff] %v2802_v49  ;;  %4203 = vst [vmem:[#allocation8_spill] sm:$0xff] %v2808_v52  ;;  %v2866_v27 = vrot.slane %v366_v18, %v2799_v48  ;;  %v2870_v28 = vrot.slane %v2851_v21, %v2793_v46  ;;  %v2885_v36 = vrot.slane %v366_v18, %v2805_v50 }
  0x11   :  { %4204 = vst [vmem:[#allocation9_spill] sm:$0xff] %v2812_v55  ;;  %4206 = vst [vmem:[#allocation11_spill] sm:$0xff] %v2846_v20 }
  0x12   :  { %2144 = vmatpush1.msk.msra.mxu0 %vm126_vm0, %v75_v38  ;;  %4207 = vst [vmem:[#allocation12_spill] sm:$0xff] %v2854_v22  ;;  %4208 = vst [vmem:[#allocation13_spill] sm:$0xff] %v2857_v23 }
  0x13   :  { %2145 = vmatmul.mubr.msk.f32.vlgmr.msra.gmra.mrb[0].mxu0 %vm101_vm1, %v43_v40  ;;  %2154 = vmatpush1.msk.msra.mxu1 %vm126_vm0, %v77_v41  ;;  %4210 = vst [vmem:[#allocation15_spill] sm:$0xff] %v2866_v27  ;;  %4211 = vst [vmem:[#allocation16_spill] sm:$0xff] %v2870_v28  ;;  %v2891_v41 = vrot.slane %v2851_v21, %v2799_v48 }
  0x14   :  { %208 = vmatprep.mubr.f32.mxu0 %v4067_v3  ;;  %2155 = vmatmul.mubr.msk.f32.vlgmr.msra.gmra.mrb[0].mxu1 %vm101_vm1, %v43_v40  ;;  %4213 = vst [vmem:[#allocation18_spill] sm:$0xff] %v2882_v35  ;;  %4214 = vst [vmem:[#allocation19_spill] sm:$0xff] %v2885_v36 }
  0x15   :  { %321 = vmatprep.mubr.f32.mxu1 %v4067_v3  ;;  %4215 = vst [vmem:[#allocation20_spill] sm:$0xff] %v2891_v41 }
  0x17   :  { %2146 = vmatmul.mubr.msk.f32.gmra.mrb[2].mxu0 %vm101_vm1, %v44_v42 }
  0x18   :  { %214 = vmatprep.mubr.f32.mxu0 %v4067_v3  ;;  %2156 = vmatmul.mubr.msk.f32.gmra.mrb[2].mxu1 %vm101_vm1, %v44_v42 }
  0x19   :  { %327 = vmatprep.mubr.f32.mxu1 %v4067_v3 }
  0x1b   :  { %2147 = vmatmul.mubr.msk.f32.gmra.mrb[4].mxu0 %vm101_vm1, %v45_v43 }
  0x1c   :  { %2157 = vmatmul.mubr.msk.f32.gmra.mrb[4].mxu1 %vm101_vm1, %v45_v43  ;;  %220 = vmatprep.mubr.f32.mxu0 %v4067_v3 }
  0x1d   :  { %333 = vmatprep.mubr.f32.mxu1 %v4067_v3 }
  0x1f   :  { %2148 = vmatmul.mubr.msk.f32.gmra.mrb[6].mxu0 %vm101_vm1, %v46_v15 }
  0x20   :  { %2158 = vmatmul.mubr.msk.f32.gmra.mrb[6].mxu1 %vm101_vm1, %v46_v15  ;;  %226 = vmatprep.mubr.f32.mxu0 %v4067_v3 }
  0x21   :  { %339 = vmatprep.mubr.f32.mxu1 %v4067_v3 }
  0xe6   :  { %v205_v51 = vpop.f32.mrb[0].mxu0 }
  0xe7   :  { %v206_v53 = vadd.f32 %v205_v51, %v2802_v49  ;;  %v207_v54 = vpop.f32.mrb[1].mxu0  ;;  %v317_v57 = vpop.f32.mrb[0].mxu1 }
  0xe8   :  { %v318_v58 = vadd.f32 %v317_v57, %v2808_v52  ;;  %v319_v59 = vpop.f32.mrb[1].mxu1 }
  0xe9   :  { %v368_v56 = vmul.f32 0.5, %v206_v53  ;;  %v320_v62 = vadd.f32 %v319_v59, %v2812_v55  ;;  %v2897_v53 = vrot.slane %v2851_v21, %v2805_v50 }
  0xea   :  { %v210_v60 = vpop.f32.mrb[2].mxu0 }
  0xeb   :  { %2212 = vtanh.f32 %v368_v56  ;;  %v212_v61 = vpop.f32.mrb[3].mxu0  ;;  %v323_v63 = vpop.f32.mrb[2].mxu1  ;;  %v373_v1 = vmul.f32 0.5, %v320_v62  ;;  %v211_v25 = vadd.f32 %v210_v60, %v2802_v49  ;;  %4216 = vst [vmem:[#allocation21_spill] sm:$0xff] %v2897_v53 }
  0xec   :  { %2214 = vtanh.f32 %v318_v58  ;;  %v325_v0 = vpop.f32.mrb[3].mxu1  ;;  %v213_v26 = vadd.f32 %v212_v61, %v2846_v20  ;;  %v324_v34 = vadd.f32 %v323_v63, %v2808_v52 }
  0xed   :  { %2216 = vtanh.f32 %v373_v1  ;;  %v326_v54 = vadd.f32 %v325_v0, %v2812_v55 }
  0xee   :  { %v2832_v16 = vpop.f32.mrb[4].mxu0 }
  0xf5   :  { %v2213_v2 = vpop.eup %2212 }
  0xf6   :  { %v370_v4 = vmul.f32 0.5, %v2213_v2  ;;  %v2215_v5 = vpop.eup %2214 }
  0xf7   :  { %v2217_v8 = vpop.eup %2216 }
  0xf8   :  { %v371_v6 = vadd.f32 0.5, %v370_v4  ;;  %v375_v9 = vmul.f32 0.5, %v2217_v8 }
  0xfa   :  { %v2816_v7 = vmul.f32 %v2215_v5, %v371_v6  ;;  %v376_v10 = vadd.f32 0.5, %v375_v9 }
  0xfc   :  { %2218 = vtanh.f32 %v2816_v7 }
 0x106   :  { %v2219_v11 = vpop.eup %2218 }
 0x107   :  { %v379_v13 = vmul.f32 %v2219_v11, %v376_v10 }
 0x109   :  { %v384_v14 = vmul.f32 %v2822_v12, %v379_v13 }
 0x10b   :  { %385 = vadd.xlane.f32.xlu0 %v384_v14 }
 0x198   :  { %v386_v29 = vpop.xlane.xlu0 %385 }
 0x199   :  { %v408_v31 = vmul.f32 %v2854_v22, %v386_v29  ;;  %v409_v32 = vmul.f32 %v2857_v23, %v386_v29  ;;  %v638_v33 = vmul.f32 %v2861_v24, %v386_v29  ;;  %v410_v37 = vmul.f32 %v2866_v27, %v386_v29 }
 0x19a   :  { %v639_v44 = vmul.f32 %v2874_v30, %v386_v29  ;;  %v640_v51 = vmul.f32 %v2882_v35, %v386_v29  ;;  %v411_v57 = vmul.f32 %v2885_v36, %v386_v29 }
 0x19b   :  { %v412_v38 = vadd.f32 %v408_v31, %v211_v25  ;;  %v413_v39 = vadd.f32 %v409_v32, %v213_v26  ;;  %v662_v40 = vadd.f32 %v2870_v28, %v638_v33  ;;  %v414_v56 = vadd.f32 %v410_v37, %v324_v34  ;;  %v2913_v34 = vld [vmem:[%s4057_s7 + $0x1] ss:$0 sm:$0xff] }
 0x19c   :  { %v663_v58 = vadd.f32 %v2891_v41, %v639_v44  ;;  %v664_v59 = vadd.f32 %v2897_v53, %v640_v51  ;;  %v415_v60 = vadd.f32 %v411_v57, %v326_v54  ;;  %v329_v44 = vpop.f32.mrb[4].mxu1  ;;  %v47_v51 = vld [vmem:[%s4055_s0 + $0x20] sm:$0xff] }
 0x19d   :  { %v416_v42 = vmul.f32 0.5, %v412_v38  ;;  %v420_v43 = vmul.f32 0.5, %v413_v39  ;;  %v665_v47 = vmul.f32 0.5, %v662_v40  ;;  %2149 = vmatmul.mubr.msk.f32.gmra.mrb[8].mxu0 %vm101_vm1, %v47_v51  ;;  %2159 = vmatmul.mubr.msk.f32.gmra.mrb[8].mxu1 %vm101_vm1, %v47_v51 }
 0x19e   :  { %v670_v61 = vmul.f32 0.5, %v664_v59  ;;  %v425_v62 = vmul.f32 0.5, %v415_v60  ;;  %232 = vmatprep.mubr.f32.mxu0 %v4067_v3  ;;  %345 = vmatprep.mubr.f32.mxu1 %v4067_v3  ;;  %v2935_v59 = vld [vmem:[%s4058_s4 + $0x1] ss:$4 sm:$0xf] }
 0x19f   :  { %2220 = vtanh.f32 %v416_v42  ;;  %v2164_v60 = vld [vmem:[%s4059_s5 + $0x1] ss:$8 sm:$0xf] }
 0x1a0   :  { %2222 = vtanh.f32 %v420_v43  ;;  %v218_v43 = vpop.f32.mrb[5].mxu0 }
 0x1a1   :  { %2224 = vtanh.f32 %v665_v47  ;;  %v331_v47 = vpop.f32.mrb[5].mxu1  ;;  %v2924_v54 = vpop.f32.mrb[6].mxu0 }
 0x1a2   :  { %2226 = vtanh.f32 %v414_v56  ;;  %v2926_v56 = vpop.f32.mrb[6].mxu1  ;;  %v2928_v57 = vpop.f32.mrb[7].mxu0 }
 0x1a3   :  { %2228 = vtanh.f32 %v663_v58  ;;  %v2930_v58 = vpop.f32.mrb[7].mxu1 }
 0x1a4   :  { %2230 = vtanh.f32 %v670_v61  ;;  %v2943_v61 = vld [vmem:[%s4056_s6 + $0x2] ss:$8 sm:$0xf] }
 0x1a5   :  { %2232 = vtanh.f32 %v425_v62  ;;  %v2947_v62 = vrot.slane %v2935_v59, %v2793_v46 }
 0x1a7   :  { %4217 = vst [vmem:[#allocation22_spill] sm:$0xff] %v2947_v62 }
 0x1a9   :  { %v2221_v63 = vpop.eup %2220 }
 0x1aa   :  { %v2223_v1 = vpop.eup %2222  ;;  %v418_v2 = vmul.f32 0.5, %v2221_v63  ;;  %v2950_v63 = vrot.slane %v2164_v60, %v2793_v46 }
 0x1ab   :  { %v2225_v0 = vpop.eup %2224  ;;  %v422_v4 = vmul.f32 0.5, %v2223_v1  ;;  %v2954_v1 = vrot.slane %v2935_v59, %v2799_v48 }
 0x1ac   :  { %v667_v5 = vmul.f32 0.5, %v2225_v0  ;;  %v419_v6 = vadd.f32 0.5, %v418_v2  ;;  %v2227_v8 = vpop.eup %2226  ;;  %4218 = vst [vmem:[#allocation23_spill] sm:$0xff] %v2950_v63  ;;  %v2958_v2 = vrot.slane %v2943_v61, %v2793_v46  ;;  %v2962_v0 = vrot.slane %v2843_v19, %v2835_v17 }
 0x1ad   :  { %v423_v9 = vadd.f32 0.5, %v422_v4  ;;  %v2229_v13 = vpop.eup %2228  ;;  %4219 = vst [vmem:[#allocation24_spill] sm:$0xff] %v2954_v1  ;;  %v217_v4 = vadd.f32 %v2832_v16, %v2802_v49  ;;  %v330_v16 = vadd.f32 %v329_v44, %v2808_v52 }
 0x1ae   :  { %v668_v10 = vadd.f32 0.5, %v667_v5  ;;  %v430_v11 = vmul.f32 %v2227_v8, %v419_v6  ;;  %v2231_v25 = vpop.eup %2230  ;;  %4220 = vst [vmem:[#allocation25_spill] sm:$0xff] %v2958_v2  ;;  %4221 = vst [vmem:[#allocation26_spill] sm:$0xff] %v2962_v0  ;;  %v2967_v5 = vrot.slane %v2164_v60, %v2835_v17  ;;  %v219_v8 = vadd.f32 %v218_v43, %v2846_v20 }
 0x1af   :  { %v429_v14 = vmul.f32 %v423_v9, %v2816_v7  ;;  %v2233_v26 = vpop.eup %2232  ;;  %v672_v29 = vmul.f32 0.5, %v2231_v25  ;;  %v2972_v9 = vrot.slane %v2943_v61, %v2799_v48  ;;  %v2993_v43 = vrot.slane %v2164_v60, %v2799_v48 }
 0x1b0   :  { %v2904_v15 = vmul.f32 %v2229_v13, %v668_v10  ;;  %v427_v31 = vmul.f32 0.5, %v2233_v26  ;;  %4222 = vst [vmem:[#allocation27_spill] sm:$0xff] %v2967_v5 }
 0x1b1   :  { %v2906_v18 = vadd.f32 %v430_v11, %v429_v14  ;;  %v673_v32 = vadd.f32 0.5, %v672_v29  ;;  %4223 = vst [vmem:[#allocation28_spill] sm:$0xff] %v2972_v9  ;;  %v2977_v11 = vrot.slane %v2851_v21, %v2835_v17  ;;  %4225 = vst [vmem:[#allocation30_spill] sm:$0xff] %v2993_v43 }
 0x1b2   :  { %2234 = vtanh.f32 %v2904_v15  ;;  %v428_v7 = vadd.f32 0.5, %v427_v31 }
 0x1b3   :  { %2236 = vtanh.f32 %v2906_v18  ;;  %4224 = vst [vmem:[#allocation29_spill] sm:$0xff] %v2977_v11 }
 0x1bc   :  { %v2235_v33 = vpop.eup %2234 }
 0x1bd   :  { %v2237_v37 = vpop.eup %2236  ;;  %v676_v38 = vmul.f32 %v2235_v33, %v673_v32 }
 0x1be   :  { %v433_v39 = vmul.f32 %v2237_v37, %v428_v7 }
 0x1bf   :  { %v681_v40 = vmul.f32 %v2913_v34, %v676_v38 }
 0x1c0   :  { %v434_v42 = vmul.f32 %v2822_v12, %v433_v39 }
 0x1c1   :  { %682 = vadd.xlane.f32.xlu1 %v681_v40 }
 0x1c2   :  { %435 = vadd.xlane.f32.xlu0 %v434_v42 }
 0x24e   :  { %v683_v6 = vpop.xlane.xlu1 %682 }
 0x24f   :  { %v992_v10 = vmul.f32 %v2947_v62, %v683_v6  ;;  %v436_v19 = vpop.xlane.xlu0 %435  ;;  %v713_v13 = vmul.f32 %v2950_v63, %v683_v6  ;;  %v993_v26 = vmul.f32 %v2954_v1, %v683_v6  ;;  %v714_v21 = vmul.f32 %v2967_v5, %v683_v6 }
 0x250   :  { %v437_v14 = vmul.f32 %v436_v19, %v2854_v22  ;;  %v438_v25 = vmul.f32 %v436_v19, %v2857_v23  ;;  %v684_v31 = vmul.f32 %v2861_v24, %v436_v19  ;;  %v685_v32 = vmul.f32 %v2962_v0, %v436_v19 }
 0x251   :  { %v1016_v29 = vadd.f32 %v2958_v2, %v992_v10  ;;  %v439_v33 = vmul.f32 %v436_v19, %v2866_v27  ;;  %v686_v39 = vmul.f32 %v2874_v30, %v436_v19  ;;  %v2997_v10 = vrot.slane %v2935_v59, %v2805_v50 }
 0x252   :  { %v441_v7 = vadd.f32 %v437_v14, %v217_v4  ;;  %v442_v37 = vadd.f32 %v438_v25, %v219_v8  ;;  %v688_v40 = vadd.f32 %v684_v31, %v2870_v28  ;;  %v689_v42 = vadd.f32 %v685_v32, %v2977_v11 }
 0x253   :  { %v1019_v38 = vmul.f32 0.5, %v1016_v29  ;;  %4226 = vst [vmem:[#allocation31_spill] sm:$0xff] %v2997_v10  ;;  %v1017_v3 = vadd.f32 %v2972_v9, %v993_v26  ;;  %v332_v14 = vadd.f32 %v331_v47, %v2812_v55  ;;  %v443_v25 = vadd.f32 %v439_v33, %v330_v16 }
 0x254   :  { %v445_v44 = vmul.f32 0.5, %v441_v7  ;;  %v449_v51 = vmul.f32 0.5, %v442_v37  ;;  %v717_v4 = vadd.f32 %v713_v13, %v688_v40  ;;  %v718_v8 = vadd.f32 %v714_v21, %v689_v42 }
 0x255   :  { %2238 = vtanh.f32 %v1019_v38  ;;  %v440_v29 = vmul.f32 %v436_v19, %v2885_v36  ;;  %v690_v31 = vadd.f32 %v686_v39, %v2891_v41  ;;  %v687_v32 = vmul.f32 %v2882_v35, %v436_v19 }
 0x256   :  { %2240 = vtanh.f32 %v445_v44  ;;  %v721_v7 = vmul.f32 0.5, %v717_v4  ;;  %v725_v37 = vmul.f32 0.5, %v718_v8  ;;  %v994_v45 = vmul.f32 %v2997_v10, %v683_v6 }
 0x257   :  { %2242 = vtanh.f32 %v449_v51  ;;  %v3007_v26 = vrot.slane %v2943_v61, %v2805_v50  ;;  %v715_v13 = vmul.f32 %v2993_v43, %v683_v6  ;;  %v3011_v47 = vrot.slane %v2164_v60, %v2805_v50 }
 0x258   :  { %2244 = vtanh.f32 %v1017_v3  ;;  %v444_v16 = vadd.f32 %v440_v29, %v332_v14  ;;  %v691_v33 = vadd.f32 %v687_v32, %v2897_v53 }
 0x259   :  { %4227 = vst [vmem:[#allocation32_spill] sm:$0xff] %v3007_v26  ;;  %4228 = vst [vmem:[#allocation33_spill] sm:$0xff] %v3011_v47  ;;  %2246 = vtanh.f32 %v443_v25  ;;  %v719_v21 = vadd.f32 %v715_v13, %v690_v31  ;;  %v1018_v19 = vadd.f32 %v3007_v26, %v994_v45  ;;  %v716_v38 = vmul.f32 %v3011_v47, %v683_v6 }
 0x25a   :  { %2248 = vtanh.f32 %v721_v7  ;;  %v454_v39 = vmul.f32 0.5, %v444_v16 }
 0x25b   :  { %2250 = vtanh.f32 %v725_v37  ;;  %v720_v42 = vadd.f32 %v716_v38, %v691_v33  ;;  %v1024_v51 = vmul.f32 0.5, %v1018_v19 }
 0x25c   :  { %2252 = vtanh.f32 %v719_v21 }
 0x25d   :  { %2254 = vtanh.f32 %v454_v39  ;;  %v730_v31 = vmul.f32 0.5, %v720_v42 }
 0x25e   :  { %2256 = vtanh.f32 %v1024_v51 }
 0x25f   :  { %v2239_v40 = vpop.eup %2238  ;;  %2258 = vtanh.f32 %v730_v31 }
 0x260   :  { %v2241_v44 = vpop.eup %2240  ;;  %v1021_v3 = vmul.f32 0.5, %v2239_v40 }
 0x261   :  { %v2243_v60 = vpop.eup %2242  ;;  %v447_v4 = vmul.f32 0.5, %v2241_v44 }
 0x262   :  { %v451_v8 = vmul.f32 0.5, %v2243_v60  ;;  %v1022_v14 = vadd.f32 0.5, %v1021_v3  ;;  %v2245_v25 = vpop.eup %2244 }
 0x263   :  { %v448_v29 = vadd.f32 0.5, %v447_v4  ;;  %v2247_v32 = vpop.eup %2246 }
 0x264   :  { %v452_v7 = vadd.f32 0.5, %v451_v8  ;;  %v2249_v45 = vpop.eup %2248  ;;  %v3016_v37 = vmul.f32 %v2245_v25, %v1022_v14 }
 0x265   :  { %v459_v6 = vmul.f32 %v2247_v32, %v448_v29  ;;  %v2251_v13 = vpop.eup %2250  ;;  %v723_v21 = vmul.f32 0.5, %v2249_v45 }
 0x266   :  { %v458_v16 = vmul.f32 %v452_v7, %v2906_v18  ;;  %v727_v33 = vmul.f32 0.5, %v2251_v13  ;;  %v2253_v39 = vpop.eup %2252  ;;  %2260 = vtanh.f32 %v3016_v37 }
 0x267   :  { %v724_v38 = vadd.f32 0.5, %v723_v21  ;;  %v2255_v3 = vpop.eup %2254 }
 0x268   :  { %v3019_v19 = vadd.f32 %v459_v6, %v458_v16  ;;  %v728_v40 = vadd.f32 0.5, %v727_v33  ;;  %v2257_v60 = vpop.eup %2256  ;;  %v456_v18 = vmul.f32 0.5, %v2255_v3 }
 0x269   :  { %v735_v42 = vmul.f32 %v2253_v39, %v724_v38  ;;  %v2259_v4 = vpop.eup %2258  ;;  %v1026_v8 = vmul.f32 0.5, %v2257_v60  ;;  %v48_v39 = vld [vmem:[%s4055_s0 + $0x28] sm:$0xff] }
 0x26a   :  { %2262 = vtanh.f32 %v3019_v19  ;;  %v734_v44 = vmul.f32 %v728_v40, %v2904_v15  ;;  %v457_v25 = vadd.f32 0.5, %v456_v18  ;;  %v732_v31 = vmul.f32 0.5, %v2259_v4  ;;  %v3031_v15 = vld [vmem:[%s4057_s7 + $0x2] ss:$0 sm:$0xff]  ;;  %2150 = vmatmul.mubr.msk.f32.gmra.mrb[10].mxu0 %vm101_vm1, %v48_v39  ;;  %2160 = vmatmul.mubr.msk.f32.gmra.mrb[10].mxu1 %vm101_vm1, %v48_v39 }
 0x26b   :  { %v1027_v7 = vadd.f32 0.5, %v1026_v8  ;;  %v4229_v40 = vmov 0.0   ;;  %v2167_v18 = vld [vmem:[%s4059_s5 + $0x2] ss:$8 sm:$0xf] }
 0x26c   :  { %v3024_v51 = vadd.f32 %v735_v42, %v734_v44  ;;  %v733_v13 = vadd.f32 0.5, %v732_v31  ;;  %238 = vmatprep.mubr.f32.mxu0 %v4229_v40  ;;  %351 = vmatprep.mubr.f32.mxu1 %v4229_v40  ;;  %v3056_v4 = vld [vmem:[%s4056_s6 + $0x3] ss:$8 sm:$0xf]  ;;  %v338_v31 = vadd.f32 %v2930_v58, %v2812_v55 }
 0x26d   :  { %v3061_v8 = vld [vmem:[%s4058_s4 + $0x2] ss:$4 sm:$0xf]  ;;  %v3108_v39 = vrot.slane %v3056_v4, %v2799_v48 }
 0x26e   :  { %2264 = vtanh.f32 %v3024_v51  ;;  %v3090_v58 = vrot.slane %v3061_v8, %v2793_v46 }
 0x26f   :  { %4239 = vst [vmem:[#allocation43_spill] sm:$0xff] %v3108_v39 }
 0x270   :  { %v2261_v14 = vpop.eup %2260  ;;  %v3042_v42 = vpop.f32.mrb[8].mxu0  ;;  %4236 = vst [vmem:[#allocation40_spill] sm:$0xff] %v3090_v58 }
 0x271   :  { %v1030_v6 = vmul.f32 %v2261_v14, %v1027_v7  ;;  %v3044_v44 = vpop.f32.mrb[8].mxu1  ;;  %v3046_v3 = vpop.f32.mrb[9].mxu0  ;;  %v223_v14 = vadd.f32 %v2924_v54, %v2802_v49  ;;  %v3077_v7 = vrot.slane %v2943_v61, %v2835_v17  ;;  %v3083_v54 = vrot.slane %v2167_v18, %v2835_v17 }
 0x272   :  { %v3048_v60 = vpop.f32.mrb[9].mxu1  ;;  %v3098_v61 = vrot.slane %v3056_v4, %v2793_v46 }
 0x273   :  { %v1035_v33 = vmul.f32 %v3031_v15, %v1030_v6  ;;  %4230 = vst [vmem:[#allocation34_spill] sm:$0xff] %v3048_v60  ;;  %4232 = vst [vmem:[#allocation36_spill] sm:$0xff] %v3077_v7 }
 0x274   :  { %v2263_v29 = vpop.eup %2262  ;;  %4234 = vst [vmem:[#allocation38_spill] sm:$0xff] %v3083_v54  ;;  %4238 = vst [vmem:[#allocation42_spill] sm:$0xff] %v3098_v61 }
 0x275   :  { %v462_v32 = vmul.f32 %v2263_v29, %v457_v25  ;;  %v225_v25 = vadd.f32 %v2928_v57, %v2846_v20  ;;  %v336_v29 = vadd.f32 %v2926_v56, %v2808_v52  ;;  %v3086_v56 = vrot.slane %v2167_v18, %v2799_v48 }
 0x277   :  { %v463_v45 = vmul.f32 %v2822_v12, %v462_v32  ;;  %v3073_v32 = vrot.slane %v2935_v59, %v2835_v17  ;;  %4235 = vst [vmem:[#allocation39_spill] sm:$0xff] %v3086_v56  ;;  %v3094_v59 = vrot.slane %v3061_v8, %v2799_v48  ;;  %v3111_v17 = vrot.slane %v2167_v18, %v2805_v50 }
 0x278   :  { %v2265_v16 = vpop.eup %2264 }
 0x279   :  { %464 = vadd.xlane.f32.xlu1 %v463_v45  ;;  %v738_v21 = vmul.f32 %v2265_v16, %v733_v13  ;;  %4231 = vst [vmem:[#allocation35_spill] sm:$0xff] %v3073_v32  ;;  %v3080_v45 = vrot.slane %v2167_v18, %v2793_v46  ;;  %4237 = vst [vmem:[#allocation41_spill] sm:$0xff] %v3094_v59 }
 0x27b   :  { %v739_v38 = vmul.f32 %v2913_v34, %v738_v21  ;;  %4233 = vst [vmem:[#allocation37_spill] sm:$0xff] %v3080_v45 }
 0x27d   :  { %1036 = vadd.xlane.f32.xlu1 %v1035_v33  ;;  %740 = vadd.xlane.f32.xlu0 %v739_v38 }
 0x306   :  { %v465_v57 = vpop.xlane.xlu1 %464 }
 0x307   :  { %v466_v6 = vmul.f32 %v465_v57, %v2854_v22  ;;  %v467_v13 = vmul.f32 %v465_v57, %v2857_v23  ;;  %v468_v16 = vmul.f32 %v465_v57, %v2866_v27  ;;  %v742_v21 = vmul.f32 %v2861_v24, %v465_v57 }
 0x308   :  { %v743_v33 = vmul.f32 %v2962_v0, %v465_v57  ;;  %v744_v38 = vmul.f32 %v2874_v30, %v465_v57  ;;  %v3115_v23 = vrot.slane %v3061_v8, %v2805_v50  ;;  %v3119_v24 = vrot.slane %v3056_v4, %v2805_v50 }
 0x309   :  { %v470_v46 = vadd.f32 %v466_v6, %v223_v14  ;;  %v471_v60 = vadd.f32 %v467_v13, %v225_v25  ;;  %v472_v0 = vadd.f32 %v468_v16, %v336_v29  ;;  %v746_v30 = vadd.f32 %v742_v21, %v2870_v28 }
 0x30a   :  { %v747_v27 = vadd.f32 %v743_v33, %v2977_v11  ;;  %v1037_v22 = vpop.xlane.xlu1 %1036  ;;  %v469_v48 = vmul.f32 %v465_v57, %v2885_v36  ;;  %v748_v14 = vadd.f32 %v744_v38, %v2891_v41  ;;  %v741_v25 = vpop.xlane.xlu0 %740 }
 0x30b   :  { %v474_v18 = vmul.f32 0.5, %v470_v46  ;;  %v478_v55 = vmul.f32 0.5, %v471_v60  ;;  %v1067_v6 = vmul.f32 %v3080_v45, %v1037_v22  ;;  %v750_v13 = vmul.f32 %v741_v25, %v2950_v63 }
 0x30c   :  { %v751_v50 = vmul.f32 %v741_v25, %v2967_v5  ;;  %v752_v29 = vmul.f32 %v741_v25, %v2993_v43  ;;  %v1038_v16 = vmul.f32 %v2947_v62, %v741_v25  ;;  %v1039_v21 = vmul.f32 %v3073_v32, %v741_v25 }
 0x30d   :  { %2266 = vtanh.f32 %v474_v18  ;;  %v1040_v33 = vmul.f32 %v2954_v1, %v741_v25  ;;  %v1068_v46 = vmul.f32 %v3083_v54, %v1037_v22  ;;  %v754_v60 = vadd.f32 %v750_v13, %v746_v30 }
 0x30e   :  { %2268 = vtanh.f32 %v478_v55  ;;  %v755_v38 = vadd.f32 %v751_v50, %v747_v27  ;;  %v745_v45 = vmul.f32 %v2882_v35, %v465_v57  ;;  %v756_v41 = vadd.f32 %v752_v29, %v748_v14 }
 0x30f   :  { %v1042_v63 = vadd.f32 %v1038_v16, %v2958_v2  ;;  %v1043_v5 = vadd.f32 %v1039_v21, %v3077_v7  ;;  %v1044_v43 = vadd.f32 %v1040_v33, %v2972_v9  ;;  %v758_v62 = vmul.f32 0.5, %v754_v60 }
 0x310   :  { %v762_v18 = vmul.f32 0.5, %v755_v38  ;;  %v1069_v32 = vmul.f32 %v3086_v56, %v1037_v22  ;;  %v1346_v1 = vmul.f32 %v3090_v58, %v1037_v22  ;;  %2270 = vtanh.f32 %v472_v0 }
 0x311   :  { %v1071_v54 = vadd.f32 %v1067_v6, %v1042_v63  ;;  %v1072_v55 = vadd.f32 %v1068_v46, %v1043_v5  ;;  %v473_v30 = vadd.f32 %v469_v48, %v338_v31  ;;  %2272 = vtanh.f32 %v758_v62 }
 0x312   :  { %v1370_v50 = vadd.f32 %v3098_v61, %v1346_v1  ;;  %v749_v27 = vadd.f32 %v745_v45, %v2897_v53  ;;  %v753_v57 = vmul.f32 %v741_v25, %v3011_v47  ;;  %2274 = vtanh.f32 %v762_v18 }
 0x313   :  { %v1075_v14 = vmul.f32 0.5, %v1071_v54  ;;  %v1079_v13 = vmul.f32 0.5, %v1072_v55  ;;  %v1347_v29 = vmul.f32 %v3094_v59, %v1037_v22  ;;  %2276 = vtanh.f32 %v756_v41 }
 0x314   :  { %v1073_v16 = vadd.f32 %v1069_v32, %v1044_v43  ;;  %v1373_v21 = vmul.f32 0.5, %v1370_v50  ;;  %v1041_v0 = vmul.f32 %v2997_v10, %v741_v25  ;;  %v483_v63 = vmul.f32 0.5, %v473_v30 }
 0x315   :  { %2278 = vtanh.f32 %v1075_v14  ;;  %v1070_v48 = vmul.f32 %v3111_v17, %v1037_v22  ;;  %v1348_v62 = vmul.f32 %v3115_v23, %v1037_v22  ;;  %v757_v1 = vadd.f32 %v753_v57, %v749_v27 }
 0x316   :  { %2280 = vtanh.f32 %v1079_v13  ;;  %v1045_v5 = vadd.f32 %v1041_v0, %v3007_v26  ;;  %v1371_v45 = vadd.f32 %v3108_v39, %v1347_v29 }
 0x317   :  { %v2267_v31 = vpop.eup %2266  ;;  %2282 = vtanh.f32 %v1373_v21  ;;  %v1372_v41 = vadd.f32 %v3119_v24, %v1348_v62  ;;  %v767_v33 = vmul.f32 0.5, %v757_v1 }
 0x318   :  { %v2269_v43 = vpop.eup %2268  ;;  %2284 = vtanh.f32 %v1073_v16  ;;  %v476_v32 = vmul.f32 0.5, %v2267_v31  ;;  %v1074_v54 = vadd.f32 %v1070_v48, %v1045_v5 }
 0x319   :  { %v480_v25 = vmul.f32 0.5, %v2269_v43  ;;  %2286 = vtanh.f32 %v483_v63  ;;  %v1378_v60 = vmul.f32 0.5, %v1372_v41 }
 0x31a   :  { %v477_v6 = vadd.f32 0.5, %v476_v32  ;;  %v2271_v46 = vpop.eup %2270  ;;  %2288 = vtanh.f32 %v1371_v45  ;;  %v1084_v55 = vmul.f32 0.5, %v1074_v54 }
 0x31b   :  { %v481_v22 = vadd.f32 0.5, %v480_v25  ;;  %v2273_v38 = vpop.eup %2272  ;;  %2290 = vtanh.f32 %v767_v33 }
 0x31c   :  { %v488_v18 = vmul.f32 %v2271_v46, %v477_v6  ;;  %v2275_v30 = vpop.eup %2274  ;;  %v760_v27 = vmul.f32 0.5, %v2273_v38  ;;  %2292 = vtanh.f32 %v1378_v60 }
 0x31d   :  { %v487_v50 = vmul.f32 %v481_v22, %v3019_v19  ;;  %v2277_v57 = vpop.eup %2276  ;;  %v764_v14 = vmul.f32 0.5, %v2275_v30  ;;  %2294 = vtanh.f32 %v1084_v55 }
 0x31e   :  { %v761_v16 = vadd.f32 0.5, %v760_v27 }
 0x31f   :  { %v2279_v13 = vpop.eup %2278  ;;  %v3150_v29 = vadd.f32 %v488_v18, %v487_v50  ;;  %v765_v0 = vadd.f32 0.5, %v764_v14 }
 0x320   :  { %v2281_v21 = vpop.eup %2280  ;;  %v1077_v63 = vmul.f32 0.5, %v2279_v13  ;;  %v772_v62 = vmul.f32 %v2277_v57, %v761_v16 }
 0x321   :  { %v2283_v48 = vpop.eup %2282  ;;  %2296 = vtanh.f32 %v3150_v29  ;;  %v1081_v1 = vmul.f32 0.5, %v2281_v21  ;;  %v771_v19 = vmul.f32 %v765_v0, %v3024_v51 }
 0x322   :  { %v2285_v5 = vpop.eup %2284  ;;  %v1078_v31 = vadd.f32 0.5, %v1077_v63  ;;  %v1375_v45 = vmul.f32 0.5, %v2283_v48 }
 0x323   :  { %v2287_v41 = vpop.eup %2286  ;;  %v1082_v43 = vadd.f32 0.5, %v1081_v1  ;;  %v3154_v32 = vadd.f32 %v772_v62, %v771_v19 }
 0x324   :  { %v1089_v54 = vmul.f32 %v2285_v5, %v1078_v31  ;;  %v1376_v25 = vadd.f32 0.5, %v1375_v45  ;;  %v2289_v6 = vpop.eup %2288  ;;  %v485_v46 = vmul.f32 0.5, %v2287_v41  ;;  %v3169_v31 = vld [vmem:[%s4057_s7 + $0x3] ss:$0 sm:$0xff]  ;;  %v49_v41 = vld [vmem:[%s4055_s0 + $0x30] sm:$0xff] }
 0x325   :  { %v1088_v33 = vmul.f32 %v1082_v43, %v3016_v37  ;;  %2298 = vtanh.f32 %v3154_v32  ;;  %v2291_v38 = vpop.eup %2290  ;;  %4240 = vst [vmem:[#allocation44_spill] sm:$0xff] %v3169_v31  ;;  %2151 = vmatmul.mubr.msk.f32.gmra.mrb[12].mxu0 %vm101_vm1, %v49_v41  ;;  %2161 = vmatmul.mubr.msk.f32.gmra.mrb[12].mxu1 %vm101_vm1, %v49_v41  ;;  %v4263_v41 = vld [vmem:[#allocation14_spill] sm:$0xff] }
 0x326   :  { %v3158_v22 = vmul.f32 %v2289_v6, %v1376_v25  ;;  %v2293_v51 = vpop.eup %2292  ;;  %v486_v55 = vadd.f32 0.5, %v485_v46  ;;  %v769_v50 = vmul.f32 0.5, %v2291_v38  ;;  %244 = vmatprep.mubr.f32.mxu0 %v4229_v40  ;;  %357 = vmatprep.mubr.f32.mxu1 %v4229_v40  ;;  %v3194_v46 = vld [vmem:[%s4058_s4 + $0x3] ss:$4 sm:$0xf]  ;;  %v229_v38 = vadd.f32 %v3042_v42, %v2802_v49 }
 0x327   :  { %v3160_v60 = vadd.f32 %v1089_v54, %v1088_v33  ;;  %v2295_v18 = vpop.eup %2294  ;;  %v1380_v57 = vmul.f32 0.5, %v2293_v51  ;;  %v2171_v33 = vld [vmem:[%s4059_s5 + $0x3] ss:$8 sm:$0xf]  ;;  %v342_v51 = vadd.f32 %v3044_v44, %v2808_v52 }
 0x328   :  { %2300 = vtanh.f32 %v3158_v22  ;;  %v1086_v14 = vmul.f32 0.5, %v2295_v18  ;;  %v770_v13 = vadd.f32 0.5, %v769_v50  ;;  %v3199_v40 = vld [vmem:[%s4056_s6 + $0x4] ss:$8 sm:$0xf]  ;;  %v231_v18 = vadd.f32 %v3046_v3, %v2846_v20 }
 0x329   :  { %2302 = vtanh.f32 %v3160_v60  ;;  %v1381_v0 = vadd.f32 0.5, %v1380_v57  ;;  %v4253_v44 = vld [vmem:[#allocation5_spill] sm:$0xff] }
 0x32a   :  { %v1087_v48 = vadd.f32 0.5, %v1086_v14  ;;  %v4250_v14 = vld [vmem:[#allocation4_spill] sm:$0xff] }
 0x32b   :  { %v2297_v30 = vpop.eup %2296  ;;  %v3228_v3 = vrot.slane %v3194_v46, %v4250_v14 }
 0x32c   :  { %v491_v27 = vmul.f32 %v2297_v30, %v486_v55  ;;  %v4245_v55 = vld [vmem:[#allocation9_spill] sm:$0xff]  ;;  %v4246_v30 = vld [vmem:[#allocation34_spill] sm:$0xff] }
 0x32d   :  { %v344_v50 = vadd.f32 %v4246_v30, %v4245_v55  ;;  %4255 = vst [vmem:[#allocation53_spill] sm:$0xff] %v3228_v3  ;;  %v4265_v55 = vld [vmem:[#allocation17_spill] sm:$0xff] }
 0x32e   :  { %v492_v37 = vmul.f32 %v2822_v12, %v491_v27  ;;  %v4247_v27 = vld [vmem:[#allocation10_spill] sm:$0xff] }
 0x32f   :  { %v2299_v16 = vpop.eup %2298  ;;  %v3211_v57 = vrot.slane %v3061_v8, %v4247_v27  ;;  %v3221_v42 = vrot.slane %v2171_v33, %v4247_v27  ;;  %v3232_v8 = vrot.slane %v3194_v46, %v4253_v44 }
 0x330   :  { %493 = vadd.xlane.f32.xlu0 %v492_v37  ;;  %v775_v21 = vmul.f32 %v2299_v16, %v770_v13  ;;  %v3215_v37 = vrot.slane %v3056_v4, %v4247_v27  ;;  %v3218_v13 = vrot.slane %v2171_v33, %v4250_v14  ;;  %v3224_v16 = vrot.slane %v2171_v33, %v4253_v44  ;;  %v4264_v27 = vld [vmem:[#allocation26_spill] sm:$0xff] }
 0x331   :  { %4248 = vst [vmem:[#allocation34_spill] sm:$0xff] %v3211_v57  ;;  %4252 = vst [vmem:[#allocation51_spill] sm:$0xff] %v3221_v42  ;;  %v3236_v4 = vrot.slane %v3199_v40, %v4250_v14 }
 0x332   :  { %v2301_v63 = vpop.eup %2300  ;;  %v776_v1 = vmul.f32 %v2913_v34, %v775_v21  ;;  %4249 = vst [vmem:[#allocation49_spill] sm:$0xff] %v3215_v37  ;;  %4251 = vst [vmem:[#allocation50_spill] sm:$0xff] %v3218_v13 }
 0x333   :  { %v2303_v62 = vpop.eup %2302  ;;  %v1384_v5 = vmul.f32 %v2301_v63, %v1381_v0  ;;  %4254 = vst [vmem:[#allocation52_spill] sm:$0xff] %v3224_v16  ;;  %4256 = vst [vmem:[#allocation54_spill] sm:$0xff] %v3232_v8  ;;  %v3240_v0 = vrot.slane %v3199_v40, %v4253_v44  ;;  %v4259_v63 = vld [vmem:[#allocation7_spill] sm:$0xff] }
 0x334   :  { %v1092_v19 = vmul.f32 %v2303_v62, %v1087_v48  ;;  %777 = vadd.xlane.f32.xlu1 %v776_v1  ;;  %4257 = vst [vmem:[#allocation55_spill] sm:$0xff] %v3236_v4  ;;  %v3243_v48 = vrot.slane %v2171_v33, %v4259_v63  ;;  %v4260_v62 = vld [vmem:[#allocation12_spill] sm:$0xff] }
 0x335   :  { %v1389_v45 = vmul.f32 %v3169_v31, %v1384_v5  ;;  %4258 = vst [vmem:[#allocation56_spill] sm:$0xff] %v3240_v0  ;;  %v4261_v5 = vld [vmem:[#allocation13_spill] sm:$0xff] }
 0x336   :  { %v1093_v12 = vmul.f32 %v3031_v15, %v1092_v19 }
 0x338   :  { %1094 = vadd.xlane.f32.xlu0 %v1093_v12  ;;  %1390 = vadd.xlane.f32.xlu1 %v1389_v45  ;;  %v4262_v12 = vld [vmem:[#allocation15_spill] sm:$0xff] }
 0x33d   :  { %v3180_v43 = vpop.f32.mrb[10].mxu0  ;;  %v3182_v54 = vpop.f32.mrb[10].mxu1 }
 0x33e   :  { %4241 = vst [vmem:[#allocation45_spill] sm:$0xff] %v3180_v43  ;;  %4242 = vst [vmem:[#allocation46_spill] sm:$0xff] %v3182_v54  ;;  %v3184_v25 = vpop.f32.mrb[11].mxu0  ;;  %v3186_v6 = vpop.f32.mrb[11].mxu1 }
 0x33f   :  { %4243 = vst [vmem:[#allocation47_spill] sm:$0xff] %v3184_v25  ;;  %4244 = vst [vmem:[#allocation48_spill] sm:$0xff] %v3186_v6 }
 0x3bd   :  { %v494_v21 = vpop.xlane.xlu0 %493 }
 0x3be   :  { %v495_v1 = vmul.f32 %v494_v21, %v4260_v62  ;;  %v496_v19 = vmul.f32 %v494_v21, %v4261_v5  ;;  %v497_v45 = vmul.f32 %v494_v21, %v4262_v12  ;;  %v779_v30 = vmul.f32 %v4263_v41, %v494_v21  ;;  %v4266_v41 = vld [vmem:[#allocation20_spill] sm:$0xff] }
 0x3bf   :  { %v780_v6 = vmul.f32 %v4264_v27, %v494_v21  ;;  %v781_v14 = vmul.f32 %v4265_v55, %v494_v21  ;;  %v498_v54 = vmul.f32 %v494_v21, %v2885_v36  ;;  %v782_v44 = vmul.f32 %v2882_v35, %v494_v21  ;;  %v4268_v21 = vld [vmem:[#allocation27_spill] sm:$0xff] }
 0x3c0   :  { %v499_v52 = vadd.f32 %v495_v1, %v229_v38  ;;  %v500_v25 = vadd.f32 %v496_v19, %v231_v18  ;;  %v501_v33 = vadd.f32 %v497_v45, %v342_v51  ;;  %v3255_v62 = vrot.slane %v3194_v46, %v4259_v63  ;;  %v4267_v18 = vld [vmem:[#allocation23_spill] sm:$0xff]  ;;  %v4269_v19 = vld [vmem:[#allocation30_spill] sm:$0xff] }
 0x3c1   :  { %v783_v5 = vadd.f32 %v779_v30, %v2870_v28  ;;  %v784_v12 = vadd.f32 %v780_v6, %v2977_v11  ;;  %v785_v20 = vadd.f32 %v781_v14, %v4266_v41  ;;  %v502_v27 = vadd.f32 %v498_v54, %v344_v50  ;;  %v3260_v36 = vpop.xlane.xlu1 %777  ;;  %v4270_v6 = vld [vmem:[#allocation22_spill] sm:$0xff] }
 0x3c2   :  { %v503_v43 = vmul.f32 0.5, %v499_v52  ;;  %v507_v55 = vmul.f32 0.5, %v500_v25  ;;  %2304 = vtanh.f32 %v501_v33  ;;  %v786_v38 = vadd.f32 %v782_v44, %v2897_v53  ;;  %v4271_v52 = vld [vmem:[#allocation35_spill] sm:$0xff]  ;;  %v4272_v25 = vld [vmem:[#allocation24_spill] sm:$0xff] }
 0x3c3   :  { %v787_v51 = vmul.f32 %v3260_v36, %v4267_v18  ;;  %v788_v1 = vmul.f32 %v3260_v36, %v4268_v21  ;;  %v789_v45 = vmul.f32 %v3260_v36, %v4269_v19  ;;  %v1096_v14 = vmul.f32 %v4270_v6, %v3260_v36  ;;  %v4273_v6 = vld [vmem:[#allocation37_spill] sm:$0xff] }
 0x3c4   :  { %2306 = vtanh.f32 %v503_v43  ;;  %v1097_v54 = vmul.f32 %v4271_v52, %v3260_v36  ;;  %v1098_v50 = vmul.f32 %v4272_v25, %v3260_v36  ;;  %v512_v44 = vmul.f32 0.5, %v502_v27  ;;  %v4274_v25 = vld [vmem:[#allocation38_spill] sm:$0xff] }
 0x3c5   :  { %2308 = vtanh.f32 %v507_v55  ;;  %v791_v30 = vadd.f32 %v787_v51, %v783_v5  ;;  %v792_v33 = vadd.f32 %v788_v1, %v784_v12  ;;  %v793_v18 = vadd.f32 %v789_v45, %v785_v20  ;;  %v1095_v53 = vpop.xlane.xlu0 %1094  ;;  %v3279_v11 = vpop.xlane.xlu1 %1390 }
 0x3c6   :  { %v1100_v21 = vadd.f32 %v1096_v14, %v2958_v2  ;;  %v1101_v19 = vadd.f32 %v1097_v54, %v3077_v7  ;;  %v1102_v41 = vadd.f32 %v1098_v50, %v2972_v9  ;;  %v1104_v43 = vmul.f32 %v1095_v53, %v4273_v6 }
 0x3c7   :  { %v795_v52 = vmul.f32 0.5, %v791_v30  ;;  %v799_v28 = vmul.f32 0.5, %v792_v33  ;;  %2310 = vtanh.f32 %v793_v18  ;;  %v1105_v27 = vmul.f32 %v1095_v53, %v4274_v25 }
 0x3c8   :  { %v1106_v55 = vmul.f32 %v1095_v53, %v3086_v56  ;;  %v1108_v5 = vadd.f32 %v1104_v43, %v1100_v21  ;;  %v1392_v20 = vmul.f32 %v3090_v58, %v1095_v53  ;;  %v1393_v12 = vmul.f32 %v3211_v57, %v1095_v53 }
 0x3c9   :  { %2312 = vtanh.f32 %v795_v52  ;;  %v1109_v51 = vadd.f32 %v1105_v27, %v1101_v19  ;;  %v1394_v1 = vmul.f32 %v3094_v59, %v1095_v53  ;;  %v1421_v45 = vmul.f32 %v3218_v13, %v3279_v11 }
 0x3ca   :  { %2314 = vtanh.f32 %v799_v28  ;;  %v1110_v14 = vadd.f32 %v1106_v55, %v1102_v41  ;;  %v1112_v54 = vmul.f32 0.5, %v1108_v5  ;;  %v1396_v18 = vadd.f32 %v1392_v20, %v3098_v61 }
 0x3cb   :  { %v1116_v50 = vmul.f32 0.5, %v1109_v51  ;;  %v1397_v30 = vadd.f32 %v1393_v12, %v3215_v37  ;;  %v1398_v21 = vadd.f32 %v1394_v1, %v3108_v39  ;;  %v1422_v33 = vmul.f32 %v3221_v42, %v3279_v11 }
 0x3cc   :  { %v2305_v52 = vpop.eup %2304  ;;  %2316 = vtanh.f32 %v1112_v54  ;;  %v1423_v19 = vmul.f32 %v3224_v16, %v3279_v11  ;;  %v1425_v43 = vadd.f32 %v1421_v45, %v1396_v18  ;;  %v1700_v28 = vmul.f32 %v3228_v3, %v3279_v11 }
 0x3cd   :  { %2318 = vtanh.f32 %v1116_v50  ;;  %v1426_v41 = vadd.f32 %v1422_v33, %v1397_v30  ;;  %v790_v27 = vmul.f32 %v3260_v36, %v3011_v47  ;;  %v3301_v55 = vrot.slane %v3199_v40, %v4259_v63 }
 0x3ce   :  { %v2307_v5 = vpop.eup %2306  ;;  %2320 = vtanh.f32 %v1110_v14  ;;  %v1429_v20 = vmul.f32 0.5, %v1425_v43  ;;  %v1701_v12 = vmul.f32 %v3232_v8, %v3279_v11  ;;  %v1724_v51 = vadd.f32 %v3236_v4, %v1700_v28 }
 0x3cf   :  { %v2309_v1 = vpop.eup %2308  ;;  %v1427_v45 = vadd.f32 %v1423_v19, %v1398_v21  ;;  %v1433_v54 = vmul.f32 0.5, %v1426_v41  ;;  %v505_v18 = vmul.f32 0.5, %v2307_v5  ;;  %2322 = vtanh.f32 %v512_v44 }
 0x3d0   :  { %2324 = vtanh.f32 %v1429_v20  ;;  %v1727_v50 = vmul.f32 0.5, %v1724_v51  ;;  %v509_v30 = vmul.f32 0.5, %v2309_v1  ;;  %v794_v33 = vadd.f32 %v790_v27, %v786_v38 }
 0x3d1   :  { %v2311_v3 = vpop.eup %2310  ;;  %2326 = vtanh.f32 %v1433_v54  ;;  %v506_v63 = vadd.f32 0.5, %v505_v18  ;;  %v1099_v14 = vmul.f32 %v2997_v10, %v3260_v36  ;;  %v1107_v43 = vmul.f32 %v1095_v53, %v3111_v17 }
 0x3d2   :  { %v1725_v8 = vadd.f32 %v3240_v0, %v1701_v12  ;;  %v510_v28 = vadd.f32 0.5, %v509_v30  ;;  %v804_v4 = vmul.f32 0.5, %v794_v33  ;;  %v1395_v21 = vmul.f32 %v3115_v23, %v1095_v53 }
 0x3d3   :  { %v2313_v19 = vpop.eup %2312  ;;  %2328 = vtanh.f32 %v1727_v50  ;;  %v517_v44 = vmul.f32 %v2305_v52, %v506_v63  ;;  %v1103_v41 = vadd.f32 %v1099_v14, %v3007_v26  ;;  %v1424_v38 = vmul.f32 %v3243_v48, %v3279_v11 }
 0x3d4   :  { %v2315_v27 = vpop.eup %2314  ;;  %2330 = vtanh.f32 %v1427_v45  ;;  %v516_v36 = vmul.f32 %v510_v28, %v3150_v29  ;;  %v797_v5 = vmul.f32 0.5, %v2313_v19  ;;  %v1399_v20 = vadd.f32 %v1395_v21, %v3119_v24 }
 0x3d5   :  { %v801_v12 = vmul.f32 0.5, %v2315_v27  ;;  %2332 = vtanh.f32 %v804_v4  ;;  %v1111_v51 = vadd.f32 %v1107_v43, %v1103_v41  ;;  %v1702_v53 = vmul.f32 %v3255_v62, %v3279_v11 }
 0x3d6   :  { %v2317_v1 = vpop.eup %2316  ;;  %2334 = vtanh.f32 %v1725_v8  ;;  %v3318_v63 = vadd.f32 %v517_v44, %v516_v36  ;;  %v798_v52 = vadd.f32 0.5, %v797_v5  ;;  %v1428_v54 = vadd.f32 %v1424_v38, %v1399_v20 }
 0x3d7   :  { %v2319_v18 = vpop.eup %2318  ;;  %v802_v50 = vadd.f32 0.5, %v801_v12  ;;  %v1114_v45 = vmul.f32 0.5, %v2317_v1  ;;  %v1121_v30 = vmul.f32 0.5, %v1111_v51  ;;  %v1726_v29 = vadd.f32 %v3301_v55, %v1702_v53 }
 0x3d8   :  { %v2321_v33 = vpop.eup %2320  ;;  %2336 = vtanh.f32 %v3318_v63  ;;  %v809_v4 = vmul.f32 %v2311_v3, %v798_v52  ;;  %v1118_v14 = vmul.f32 0.5, %v2319_v18  ;;  %v1438_v43 = vmul.f32 0.5, %v1428_v54 }
 0x3d9   :  { %v2323_v28 = vpop.eup %2322  ;;  %v808_v11 = vmul.f32 %v802_v50, %v3154_v32  ;;  %v1115_v8 = vadd.f32 0.5, %v1114_v45  ;;  %2338 = vtanh.f32 %v1121_v30  ;;  %v1732_v21 = vmul.f32 0.5, %v1726_v29 }
 0x3da   :  { %v2325_v19 = vpop.eup %2324  ;;  %v1119_v44 = vadd.f32 0.5, %v1118_v14  ;;  %2340 = vtanh.f32 %v1438_v43  ;;  %v514_v12 = vmul.f32 0.5, %v2323_v28 }
 0x3db   :  { %v2327_v41 = vpop.eup %2326  ;;  %v3323_v38 = vadd.f32 %v809_v4, %v808_v11  ;;  %v1126_v27 = vmul.f32 %v2321_v33, %v1115_v8  ;;  %v1431_v36 = vmul.f32 0.5, %v2325_v19  ;;  %2342 = vtanh.f32 %v1732_v21  ;;  %v3339_v8 = vld [vmem:[%s4057_s7] ss:$0 sm:$0xff] }
 0x3dc   :  { %v1125_v5 = vmul.f32 %v1119_v44, %v3160_v60  ;;  %v1435_v20 = vmul.f32 0.5, %v2327_v41  ;;  %v515_v30 = vadd.f32 0.5, %v514_v12  ;;  %4275 = vst [vmem:[#allocation57_spill] sm:$0xff] %v3339_v8 }
 0x3dd   :  { %v2329_v3 = vpop.eup %2328  ;;  %2344 = vtanh.f32 %v3323_v38  ;;  %v1432_v32 = vadd.f32 0.5, %v1431_v36 }
 0x3de   :  { %v2331_v51 = vpop.eup %2330  ;;  %v3327_v53 = vadd.f32 %v1126_v27, %v1125_v5  ;;  %v1436_v1 = vadd.f32 0.5, %v1435_v20  ;;  %v1729_v52 = vmul.f32 0.5, %v2329_v3 }
 0x3df   :  { %v2333_v54 = vpop.eup %2332  ;;  %v1443_v18 = vmul.f32 %v2331_v51, %v1432_v32 }
 0x3e0   :  { %v2335_v50 = vpop.eup %2334  ;;  %2346 = vtanh.f32 %v3327_v53  ;;  %v1442_v45 = vmul.f32 %v1436_v1, %v3158_v22  ;;  %v1730_v60 = vadd.f32 0.5, %v1729_v52  ;;  %v806_v33 = vmul.f32 0.5, %v2333_v54 }
 0x3e2   :  { %v2337_v29 = vpop.eup %2336  ;;  %v3331_v4 = vadd.f32 %v1443_v18, %v1442_v45  ;;  %v3333_v14 = vmul.f32 %v2335_v50, %v1730_v60  ;;  %v807_v44 = vadd.f32 0.5, %v806_v33  ;;  %v3348_v45 = vld [vmem:[%s4057_s7 + $0x4] ss:$0 sm:$0xff] }
 0x3e3   :  { %v2339_v43 = vpop.eup %2338  ;;  %v520_v28 = vmul.f32 %v2337_v29, %v515_v30  ;;  %4276 = vst [vmem:[#allocation58_spill] sm:$0xff] %v3348_v45 }
 0x3e4   :  { %2348 = vtanh.f32 %v3331_v4  ;;  %v2341_v11 = vpop.eup %2340  ;;  %v1123_v21 = vmul.f32 0.5, %v2339_v43 }
 0x3e5   :  { %v521_v22 = vmul.f32 %v3339_v8, %v520_v28  ;;  %2350 = vtanh.f32 %v3333_v14  ;;  %v2343_v19 = vpop.eup %2342  ;;  %v1440_v5 = vmul.f32 0.5, %v2341_v11  ;;  %v3368_v11 = vld [vmem:[%s4059_s5 + $0x4] ss:$8 sm:$0xf] }
 0x3e6   :  { %v1124_v36 = vadd.f32 0.5, %v1123_v21  ;;  %v1734_v12 = vmul.f32 0.5, %v2343_v19  ;;  %v4282_v19 = vld [vmem:[#allocation11_spill] sm:$0xff] }
 0x3e7   :  { %v2345_v41 = vpop.eup %2344  ;;  %522 = vadd.xlane.f32.xlu0 %v521_v22  ;;  %v1441_v1 = vadd.f32 0.5, %v1440_v5  ;;  %v4281_v22 = vld [vmem:[#allocation45_spill] sm:$0xff] }
 0x3e8   :  { %v812_v27 = vmul.f32 %v2345_v41, %v807_v44  ;;  %v1735_v54 = vadd.f32 0.5, %v1734_v12  ;;  %v235_v21 = vadd.f32 %v4281_v22, %v2802_v49  ;;  %v4283_v44 = vld [vmem:[#allocation47_spill] sm:$0xff] }
 0x3e9   :  { %v237_v41 = vadd.f32 %v4283_v44, %v4282_v19  ;;  %v4296_v22 = vld [vmem:[#allocation15_spill] sm:$0xff] }
 0x3ea   :  { %v2347_v20 = vpop.eup %2346  ;;  %v813_v3 = vmul.f32 %v2913_v34, %v812_v27  ;;  %v4284_v27 = vld [vmem:[#allocation8_spill] sm:$0xff] }
 0x3eb   :  { %v1129_v32 = vmul.f32 %v2347_v20, %v1124_v36  ;;  %v4285_v36 = vld [vmem:[#allocation46_spill] sm:$0xff]  ;;  %v4286_v20 = vld [vmem:[#allocation9_spill] sm:$0xff] }
 0x3ec   :  { %814 = vadd.xlane.f32.xlu1 %v813_v3  ;;  %v348_v5 = vadd.f32 %v4285_v36, %v4284_v27  ;;  %v4287_v3 = vld [vmem:[#allocation48_spill] sm:$0xff] }
 0x3ed   :  { %v1130_v51 = vmul.f32 %v3031_v15, %v1129_v32  ;;  %v50_v15 = vld [vmem:[%s4055_s0 + $0x38] sm:$0xff]  ;;  %v350_v12 = vadd.f32 %v4287_v3, %v4286_v20 }
 0x3ee   :  { %v2349_v52 = vpop.eup %2348  ;;  %2152 = vmatmul.mubr.msk.f32.gmra.mrb[14].mxu0 %vm101_vm1, %v50_v15  ;;  %2162 = vmatmul.mubr.msk.f32.gmra.mrb[14].mxu1 %vm101_vm1, %v50_v15  ;;  %v4298_v3 = vld [vmem:[#allocation26_spill] sm:$0xff] }
 0x3ef   :  { %v2351_v18 = vpop.eup %2350  ;;  %1131 = vadd.xlane.f32.xlu0 %v1130_v51  ;;  %v1446_v50 = vmul.f32 %v2349_v52, %v1441_v1  ;;  %v4288_v51 = vld [vmem:[#allocation10_spill] sm:$0xff] }
 0x3f0   :  { %v1738_v60 = vmul.f32 %v2351_v18, %v1735_v54  ;;  %v3380_v1 = vrot.slane %v3194_v46, %v4288_v51  ;;  %v3384_v52 = vrot.slane %v3199_v40, %v4288_v51  ;;  %v4291_v54 = vld [vmem:[#allocation4_spill] sm:$0xff]  ;;  %v4297_v46 = vld [vmem:[#allocation14_spill] sm:$0xff]  ;;  %v4299_v40 = vld [vmem:[#allocation17_spill] sm:$0xff] }
 0x3f1   :  { %v1447_v30 = vmul.f32 %v3169_v31, %v1446_v50  ;;  %v3388_v18 = vrot.slane %v3368_v11, %v4291_v54  ;;  %v3392_v50 = vrot.slane %v3368_v11, %v4288_v51 }
 0x3f2   :  { %v1743_v34 = vmul.f32 %v3348_v45, %v1738_v60  ;;  %4289 = vst [vmem:[#allocation45_spill] sm:$0xff] %v3380_v1  ;;  %4290 = vst [vmem:[#allocation47_spill] sm:$0xff] %v3384_v52  ;;  %v4294_v60 = vld [vmem:[#allocation12_spill] sm:$0xff] }
 0x3f3   :  { %1448 = vadd.xlane.f32.xlu1 %v1447_v30  ;;  %4292 = vst [vmem:[#allocation46_spill] sm:$0xff] %v3388_v18  ;;  %4293 = vst [vmem:[#allocation48_spill] sm:$0xff] %v3392_v50 }
 0x3f4   :  { %1744 = vadd.xlane.f32.xlu0 %v1743_v34  ;;  %v4295_v34 = vld [vmem:[#allocation13_spill] sm:$0xff] }
 0x3f8   :  { %v3357_v29 = vpop.f32.mrb[12].mxu0  ;;  %v3359_v33 = vpop.f32.mrb[12].mxu1 }
 0x3f9   :  { %4277 = vst [vmem:[#allocation59_spill] sm:$0xff] %v3357_v29  ;;  %4278 = vst [vmem:[#allocation60_spill] sm:$0xff] %v3359_v33  ;;  %v3361_v43 = vpop.f32.mrb[13].mxu0  ;;  %v3363_v28 = vpop.f32.mrb[13].mxu1  ;;  %v4300_v33 = vld [vmem:[#allocation19_spill] sm:$0xff]  ;;  %v4301_v29 = vld [vmem:[#allocation5_spill] sm:$0xff] }
 0x3fa   :  { %4279 = vst [vmem:[#allocation61_spill] sm:$0xff] %v3361_v43  ;;  %4280 = vst [vmem:[#allocation62_spill] sm:$0xff] %v3363_v28 }
 0x474   :  { %v523_v32 = vpop.xlane.xlu0 %522 }
 0x475   :  { %v524_v30 = vmul.f32 %v523_v32, %v4294_v60  ;;  %v525_v15 = vmul.f32 %v523_v32, %v4295_v34  ;;  %v526_v44 = vmul.f32 %v523_v32, %v4296_v22  ;;  %v816_v36 = vmul.f32 %v4297_v46, %v523_v32  ;;  %v4303_v34 = vld [vmem:[#allocation16_spill] sm:$0xff]  ;;  %v4304_v22 = vld [vmem:[#allocation29_spill] sm:$0xff] }
 0x476   :  { %v817_v28 = vmul.f32 %v4298_v3, %v523_v32  ;;  %v818_v20 = vmul.f32 %v4299_v40, %v523_v32  ;;  %v527_v27 = vmul.f32 %v523_v32, %v4300_v33  ;;  %v819_v54 = vmul.f32 %v2882_v35, %v523_v32  ;;  %v4305_v46 = vld [vmem:[#allocation20_spill] sm:$0xff]  ;;  %v4306_v32 = vld [vmem:[#allocation21_spill] sm:$0xff] }
 0x477   :  { %v528_v43 = vadd.f32 %v524_v30, %v235_v21  ;;  %v529_v19 = vadd.f32 %v525_v15, %v237_v41  ;;  %v530_v51 = vadd.f32 %v526_v44, %v348_v5  ;;  %v3404_v60 = vrot.slane %v3368_v11, %v4301_v29  ;;  %v4307_v41 = vld [vmem:[#allocation23_spill] sm:$0xff]  ;;  %v4309_v44 = vld [vmem:[#allocation30_spill] sm:$0xff] }
 0x478   :  { %v820_v49 = vadd.f32 %v816_v36, %v4303_v34  ;;  %v821_v45 = vadd.f32 %v817_v28, %v4304_v22  ;;  %v822_v31 = vadd.f32 %v818_v20, %v4305_v46  ;;  %v531_v3 = vadd.f32 %v527_v27, %v350_v12  ;;  %v4308_v30 = vld [vmem:[#allocation27_spill] sm:$0xff]  ;;  %v4310_v20 = vld [vmem:[#allocation22_spill] sm:$0xff]  ;;  %v4312_v12 = vld [vmem:[#allocation24_spill] sm:$0xff] }
 0x479   :  { %4302 = vst [vmem:[#allocation63_spill] sm:$0xff] %v3404_v60  ;;  %v532_v8 = vmul.f32 0.5, %v528_v43  ;;  %v536_v40 = vmul.f32 0.5, %v529_v19  ;;  %2352 = vtanh.f32 %v530_v51  ;;  %v3409_v33 = vpop.xlane.xlu1 %814  ;;  %v3412_v21 = vadd.f32 %v819_v54, %v4306_v32  ;;  %v4311_v43 = vld [vmem:[#allocation35_spill] sm:$0xff] }
 0x47a   :  { %v824_v5 = vmul.f32 %v3409_v33, %v4307_v41  ;;  %v825_v15 = vmul.f32 %v3409_v33, %v4308_v30  ;;  %v826_v28 = vmul.f32 %v3409_v33, %v4309_v44  ;;  %v1133_v27 = vmul.f32 %v4310_v20, %v3409_v33 }
 0x47b   :  { %2354 = vtanh.f32 %v532_v8  ;;  %v1134_v19 = vmul.f32 %v4311_v43, %v3409_v33  ;;  %v1135_v51 = vmul.f32 %v4312_v12, %v3409_v33  ;;  %v3426_v54 = vmul.f32 0.5, %v531_v3 }
 0x47c   :  { %2356 = vtanh.f32 %v536_v40  ;;  %v828_v36 = vadd.f32 %v824_v5, %v820_v49  ;;  %v829_v29 = vadd.f32 %v825_v15, %v821_v45  ;;  %v830_v32 = vadd.f32 %v826_v28, %v822_v31  ;;  %v3428_v30 = vpop.xlane.xlu0 %1131 }
 0x47d   :  { %v1137_v44 = vadd.f32 %v1133_v27, %v2958_v2  ;;  %v1138_v41 = vadd.f32 %v1134_v19, %v3077_v7  ;;  %v1139_v8 = vadd.f32 %v1135_v51, %v2972_v9  ;;  %v1141_v43 = vmul.f32 %v3428_v30, %v4273_v6 }
 0x47e   :  { %v832_v20 = vmul.f32 0.5, %v828_v36  ;;  %v836_v46 = vmul.f32 0.5, %v829_v29  ;;  %2358 = vtanh.f32 %v830_v32  ;;  %v1142_v3 = vmul.f32 %v3428_v30, %v4274_v25 }
 0x47f   :  { %v1143_v49 = vmul.f32 %v3428_v30, %v3086_v56  ;;  %v1145_v31 = vadd.f32 %v1141_v43, %v1137_v44  ;;  %v1450_v45 = vmul.f32 %v3090_v58, %v3428_v30  ;;  %v1451_v40 = vmul.f32 %v3211_v57, %v3428_v30 }
 0x480   :  { %2360 = vtanh.f32 %v832_v20  ;;  %v1146_v5 = vadd.f32 %v1142_v3, %v1138_v41  ;;  %v1452_v15 = vmul.f32 %v3094_v59, %v3428_v30  ;;  %v3445_v29 = vpop.xlane.xlu1 %1448  ;;  %v827_v32 = vmul.f32 %v3409_v33, %v3011_v47  ;;  %v4314_v3 = vld [vmem:[#allocation53_spill] sm:$0xff] }
 0x481   :  { %2362 = vtanh.f32 %v836_v46  ;;  %v1147_v28 = vadd.f32 %v1143_v49, %v1139_v8  ;;  %v1149_v27 = vmul.f32 0.5, %v1145_v31  ;;  %v1454_v44 = vadd.f32 %v1450_v45, %v3098_v61  ;;  %v3458_v8 = vpop.xlane.xlu0 %1744 }
 0x482   :  { %v1153_v43 = vmul.f32 0.5, %v1146_v5  ;;  %v1455_v19 = vadd.f32 %v1451_v40, %v3215_v37  ;;  %v1456_v51 = vadd.f32 %v1452_v15, %v3108_v39  ;;  %v1458_v41 = vmul.f32 %v3445_v29, %v3218_v13  ;;  %4313 = vst [vmem:[#allocation64_spill] sm:$0xff] %v3458_v8  ;;  %v4315_v40 = vld [vmem:[#allocation54_spill] sm:$0xff] }
 0x483   :  { %v2353_v20 = vpop.eup %2352  ;;  %2364 = vtanh.f32 %v1149_v27  ;;  %v1459_v36 = vmul.f32 %v3445_v29, %v3221_v42  ;;  %v1460_v46 = vmul.f32 %v3445_v29, %v3224_v16  ;;  %v1752_v49 = vmul.f32 %v4314_v3, %v3445_v29  ;;  %v4316_v42 = vld [vmem:[#allocation55_spill] sm:$0xff] }
 0x484   :  { %2366 = vtanh.f32 %v1153_v43  ;;  %v1462_v31 = vadd.f32 %v1458_v41, %v1454_v44  ;;  %v1753_v45 = vmul.f32 %v3380_v1, %v3445_v29  ;;  %v1754_v5 = vmul.f32 %v4315_v40, %v3445_v29 }
 0x485   :  { %v2355_v15 = vpop.eup %2354  ;;  %2368 = vtanh.f32 %v1147_v28  ;;  %v1463_v27 = vadd.f32 %v1459_v36, %v1455_v19  ;;  %v1464_v47 = vadd.f32 %v1460_v46, %v1456_v51  ;;  %v1756_v39 = vadd.f32 %v1752_v49, %v4316_v42  ;;  %v4317_v51 = vld [vmem:[#allocation7_spill] sm:$0xff] }
 0x486   :  { %v2357_v16 = vpop.eup %2356  ;;  %v1466_v37 = vmul.f32 0.5, %v1462_v31  ;;  %v1757_v13 = vadd.f32 %v1753_v45, %v3384_v52  ;;  %v1758_v3 = vadd.f32 %v1754_v5, %v3240_v0  ;;  %v1781_v44 = vmul.f32 %v3388_v18, %v3458_v8 }
 0x487   :  { %v1470_v43 = vmul.f32 0.5, %v1463_v27  ;;  %2370 = vtanh.f32 %v1464_v47  ;;  %v1782_v41 = vmul.f32 %v3392_v50, %v3458_v8  ;;  %v1783_v28 = vmul.f32 %v3404_v60, %v3458_v8 }
 0x488   :  { %v2359_v19 = vpop.eup %2358  ;;  %2372 = vtanh.f32 %v1466_v37  ;;  %v3477_v36 = vrot.slane %v3368_v11, %v4317_v51  ;;  %v1785_v46 = vadd.f32 %v1781_v44, %v1756_v39  ;;  %v534_v49 = vmul.f32 0.5, %v2355_v15 }
 0x489   :  { %2374 = vtanh.f32 %v1470_v43  ;;  %v1786_v31 = vadd.f32 %v1782_v41, %v1757_v13  ;;  %v1787_v45 = vadd.f32 %v1783_v28, %v1758_v3  ;;  %v538_v5 = vmul.f32 0.5, %v2357_v16 }
 0x48a   :  { %v2361_v27 = vpop.eup %2360  ;;  %v1789_v47 = vmul.f32 0.5, %v1785_v46  ;;  %v535_v0 = vadd.f32 0.5, %v534_v49  ;;  %2376 = vtanh.f32 %v3426_v54  ;;  %v831_v50 = vadd.f32 %v827_v32, %v3412_v21 }
 0x48b   :  { %v2363_v60 = vpop.eup %2362  ;;  %v1793_v18 = vmul.f32 0.5, %v1786_v31  ;;  %2378 = vtanh.f32 %v1787_v45  ;;  %v539_v37 = vadd.f32 0.5, %v538_v5  ;;  %v834_v52 = vmul.f32 0.5, %v2361_v27 }
 0x48c   :  { %2380 = vtanh.f32 %v1789_v47  ;;  %v546_v11 = vmul.f32 %v2353_v20, %v535_v0  ;;  %v838_v39 = vmul.f32 0.5, %v2363_v60  ;;  %v841_v15 = vmul.f32 0.5, %v831_v50 }
 0x48d   :  { %v2365_v44 = vpop.eup %2364  ;;  %2382 = vtanh.f32 %v1793_v18  ;;  %v545_v13 = vmul.f32 %v539_v37, %v3318_v63  ;;  %v835_v16 = vadd.f32 0.5, %v834_v52  ;;  %v1136_v3 = vmul.f32 %v2997_v10, %v3409_v33 }
 0x48e   :  { %v2367_v54 = vpop.eup %2366  ;;  %v839_v43 = vadd.f32 0.5, %v838_v39  ;;  %2384 = vtanh.f32 %v841_v15  ;;  %v1144_v21 = vmul.f32 %v3428_v30, %v3111_v17  ;;  %v1151_v32 = vmul.f32 0.5, %v2365_v44 }
 0x48f   :  { %v2369_v41 = vpop.eup %2368  ;;  %v3486_v28 = vadd.f32 %v546_v11, %v545_v13  ;;  %v846_v0 = vmul.f32 %v2359_v19, %v835_v16  ;;  %v1140_v50 = vadd.f32 %v1136_v3, %v3007_v26  ;;  %v1155_v18 = vmul.f32 0.5, %v2367_v54 }
 0x490   :  { %v845_v63 = vmul.f32 %v839_v43, %v3323_v38  ;;  %v1152_v52 = vadd.f32 0.5, %v1151_v32  ;;  %v1453_v33 = vmul.f32 %v3115_v23, %v3428_v30  ;;  %v1461_v60 = vmul.f32 %v3445_v29, %v3243_v48 }
 0x491   :  { %v2371_v20 = vpop.eup %2370  ;;  %2386 = vtanh.f32 %v3486_v28  ;;  %v1148_v46 = vadd.f32 %v1144_v21, %v1140_v50  ;;  %v1156_v49 = vadd.f32 0.5, %v1155_v18  ;;  %v1755_v19 = vmul.f32 %v3255_v62, %v3445_v29 }
 0x492   :  { %v2373_v31 = vpop.eup %2372  ;;  %v1784_v45 = vmul.f32 %v3477_v36, %v3458_v8  ;;  %v3499_v38 = vadd.f32 %v846_v0, %v845_v63  ;;  %v1163_v5 = vmul.f32 %v2369_v41, %v1152_v52  ;;  %v1457_v30 = vadd.f32 %v1453_v33, %v3119_v24 }
 0x493   :  { %v2375_v27 = vpop.eup %2374  ;;  %v1158_v47 = vmul.f32 0.5, %v1148_v46  ;;  %v1162_v37 = vmul.f32 %v1156_v49, %v3327_v53  ;;  %v1468_v11 = vmul.f32 0.5, %v2373_v31  ;;  %v1759_v39 = vadd.f32 %v1755_v19, %v3301_v55 }
 0x494   :  { %v2377_v15 = vpop.eup %2376  ;;  %2388 = vtanh.f32 %v3499_v38  ;;  %v1465_v29 = vadd.f32 %v1461_v60, %v1457_v30  ;;  %v1472_v44 = vmul.f32 0.5, %v2375_v27 }
 0x495   :  { %v2379_v13 = vpop.eup %2378  ;;  %2390 = vtanh.f32 %v1158_v47  ;;  %v3505_v16 = vadd.f32 %v1163_v5, %v1162_v37  ;;  %v1469_v3 = vadd.f32 0.5, %v1468_v11  ;;  %v543_v43 = vmul.f32 0.5, %v2377_v15  ;;  %v4318_v37 = vld [vmem:[#allocation57_spill] sm:$0xff] }
 0x496   :  { %v2381_v54 = vpop.eup %2380  ;;  %v1473_v21 = vadd.f32 0.5, %v1472_v44  ;;  %v1475_v32 = vmul.f32 0.5, %v1465_v29  ;;  %v1788_v41 = vadd.f32 %v1784_v45, %v1759_v39 }
 0x497   :  { %v2383_v0 = vpop.eup %2382  ;;  %v1791_v53 = vmul.f32 0.5, %v2381_v54  ;;  %2392 = vtanh.f32 %v3505_v16  ;;  %v1480_v50 = vmul.f32 %v2371_v20, %v1469_v3  ;;  %v544_v19 = vadd.f32 0.5, %v543_v43 }
 0x498   :  { %v2385_v18 = vpop.eup %2384  ;;  %v1795_v63 = vmul.f32 0.5, %v2383_v0  ;;  %2394 = vtanh.f32 %v1475_v32  ;;  %v1479_v52 = vmul.f32 %v1473_v21, %v3331_v4  ;;  %v1798_v33 = vmul.f32 0.5, %v1788_v41 }
 0x499   :  { %v1792_v60 = vadd.f32 0.5, %v1791_v53  ;;  %v843_v46 = vmul.f32 0.5, %v2385_v18 }
 0x49a   :  { %v1796_v49 = vadd.f32 0.5, %v1795_v63  ;;  %v3509_v31 = vadd.f32 %v1480_v50, %v1479_v52  ;;  %2396 = vtanh.f32 %v1798_v33  ;;  %v3526_v50 = vld [vmem:[%s4057_s7 + $0x2] ss:$0 sm:$0xff]  ;;  %v4319_v52 = vld [vmem:[#allocation44_spill] sm:$0xff] }
 0x49b   :  { %v2387_v5 = vpop.eup %2386  ;;  %v1803_v45 = vmul.f32 %v2379_v13, %v1792_v60  ;;  %v844_v20 = vadd.f32 0.5, %v843_v46 }
 0x49c   :  { %v1802_v30 = vmul.f32 %v1796_v49, %v3333_v14  ;;  %v549_v27 = vmul.f32 %v2387_v5, %v544_v19  ;;  %2398 = vtanh.f32 %v3509_v31  ;;  %v3520_v14 = vld [vmem:[%s4057_s7 + $0x1] ss:$0 sm:$0xff]  ;;  %v4320_v19 = vld [vmem:[#allocation58_spill] sm:$0xff] }
 0x49e   :  { %v2389_v47 = vpop.eup %2388  ;;  %v550_v11 = vmul.f32 %v4318_v37, %v549_v27  ;;  %v3514_v4 = vadd.f32 %v1803_v45, %v1802_v30 }
 0x49f   :  { %v2391_v39 = vpop.eup %2390  ;;  %v849_v15 = vmul.f32 %v2389_v47, %v844_v20  ;;  %v4324_v47 = vld [vmem:[#allocation6_spill] sm:$0xff] }
 0x4a0   :  { %551 = vadd.xlane.f32.xlu1 %v550_v11  ;;  %v1160_v29 = vmul.f32 0.5, %v2391_v39  ;;  %2400 = vtanh.f32 %v3514_v4  ;;  %v4325_v11 = vld [vmem:[#allocation59_spill] sm:$0xff] }
 0x4a1   :  { %v2393_v44 = vpop.eup %2392  ;;  %v850_v13 = vmul.f32 %v3520_v14, %v849_v15  ;;  %v241_v39 = vadd.f32 %v4325_v11, %v4324_v47  ;;  %v4326_v15 = vld [vmem:[#allocation11_spill] sm:$0xff]  ;;  %v4337_v11 = vld [vmem:[#allocation17_spill] sm:$0xff] }
 0x4a2   :  { %v2395_v3 = vpop.eup %2394  ;;  %v1161_v54 = vadd.f32 0.5, %v1160_v29  ;;  %v4327_v29 = vld [vmem:[#allocation61_spill] sm:$0xff] }
 0x4a3   :  { %851 = vadd.xlane.f32.xlu0 %v850_v13  ;;  %v1477_v43 = vmul.f32 0.5, %v2395_v3  ;;  %v4328_v13 = vld [vmem:[#allocation8_spill] sm:$0xff] }
 0x4a4   :  { %v2397_v21 = vpop.eup %2396  ;;  %v1166_v32 = vmul.f32 %v2393_v44, %v1161_v54  ;;  %v243_v44 = vadd.f32 %v4327_v29, %v4326_v15  ;;  %v4329_v3 = vld [vmem:[#allocation60_spill] sm:$0xff]  ;;  %v4338_v29 = vld [vmem:[#allocation19_spill] sm:$0xff] }
 0x4a5   :  { %v1478_v41 = vadd.f32 0.5, %v1477_v43  ;;  %v1800_v0 = vmul.f32 0.5, %v2397_v21  ;;  %v354_v54 = vadd.f32 %v4329_v3, %v4328_v13  ;;  %v4330_v43 = vld [vmem:[#allocation9_spill] sm:$0xff]  ;;  %v4331_v21 = vld [vmem:[#allocation62_spill] sm:$0xff]  ;;  %v4340_v15 = vld [vmem:[#allocation23_spill] sm:$0xff] }
 0x4a6   :  { %v2399_v53 = vpop.eup %2398  ;;  %v1167_v18 = vmul.f32 %v3526_v50, %v1166_v32  ;;  %v356_v32 = vadd.f32 %v4331_v21, %v4330_v43 }
 0x4a7   :  { %v1483_v63 = vmul.f32 %v2399_v53, %v1478_v41  ;;  %v1801_v60 = vadd.f32 0.5, %v1800_v0  ;;  %v4332_v0 = vld [vmem:[#allocation12_spill] sm:$0xff] }
 0x4a8   :  { %1168 = vadd.xlane.f32.xlu1 %v1167_v18  ;;  %v4333_v18 = vld [vmem:[#allocation13_spill] sm:$0xff] }
 0x4a9   :  { %v1484_v33 = vmul.f32 %v4319_v52, %v1483_v63  ;;  %v4334_v52 = vld [vmem:[#allocation15_spill] sm:$0xff] }
 0x4aa   :  { %v2401_v46 = vpop.eup %2400 }
 0x4ab   :  { %1485 = vadd.xlane.f32.xlu0 %v1484_v33  ;;  %v1806_v49 = vmul.f32 %v2401_v46, %v1801_v60  ;;  %v4335_v60 = vld [vmem:[#allocation14_spill] sm:$0xff] }
 0x4ad   :  { %v1807_v5 = vmul.f32 %v4320_v19, %v1806_v49  ;;  %v4336_v49 = vld [vmem:[#allocation26_spill] sm:$0xff] }
 0x4af   :  { %1808 = vadd.xlane.f32.xlu1 %v1807_v5 }
 0x4c1   :  { %v3531_v45 = vpop.f32.mrb[14].mxu0  ;;  %v3533_v30 = vpop.f32.mrb[14].mxu1 }
 0x4c2   :  { %4321 = vst [vmem:[#allocation57_spill] sm:$0xff] %v3533_v30  ;;  %v3535_v27 = vpop.f32.mrb[15].mxu0  ;;  %v3537_v20 = vpop.f32.mrb[15].mxu1 }
 0x4c3   :  { %4322 = vst [vmem:[#allocation44_spill] sm:$0xff] %v3535_v27  ;;  %4323 = vst [vmem:[#allocation58_spill] sm:$0xff] %v3537_v20 }
 0x52d   :  { %v552_v41 = vpop.xlane.xlu1 %551 }
 0x52e   :  { %v553_v53 = vmul.f32 %v552_v41, %v4332_v0  ;;  %v554_v63 = vmul.f32 %v552_v41, %v4333_v18  ;;  %v555_v33 = vmul.f32 %v552_v41, %v4334_v52  ;;  %v853_v46 = vmul.f32 %v4335_v60, %v552_v41  ;;  %v4339_v18 = vld [vmem:[#allocation20_spill] sm:$0xff] }
 0x52f   :  { %v854_v5 = vmul.f32 %v4336_v49, %v552_v41  ;;  %v855_v8 = vmul.f32 %v4337_v11, %v552_v41  ;;  %v556_v51 = vmul.f32 %v552_v41, %v4338_v29  ;;  %v3555_v3 = vmul.f32 %v2882_v35, %v552_v41  ;;  %v4341_v11 = vld [vmem:[#allocation27_spill] sm:$0xff] }
 0x530   :  { %v557_v20 = vadd.f32 %v553_v53, %v241_v39  ;;  %v558_v21 = vadd.f32 %v554_v63, %v243_v44  ;;  %v559_v43 = vadd.f32 %v555_v33, %v354_v54  ;;  %v857_v0 = vadd.f32 %v853_v46, %v4303_v34  ;;  %v3558_v27 = vpop.xlane.xlu0 %851  ;;  %v4342_v39 = vld [vmem:[#allocation30_spill] sm:$0xff]  ;;  %v4344_v46 = vld [vmem:[#allocation35_spill] sm:$0xff] }
 0x531   :  { %v858_v52 = vadd.f32 %v854_v5, %v4304_v22  ;;  %v859_v60 = vadd.f32 %v855_v8, %v4339_v18  ;;  %v861_v49 = vmul.f32 %v3558_v27, %v4340_v15  ;;  %v862_v29 = vmul.f32 %v3558_v27, %v4341_v11  ;;  %v4343_v63 = vld [vmem:[#allocation22_spill] sm:$0xff] }
 0x532   :  { %v561_v30 = vmul.f32 0.5, %v557_v20  ;;  %v565_v41 = vmul.f32 0.5, %v558_v21  ;;  %2402 = vtanh.f32 %v559_v43  ;;  %v863_v44 = vmul.f32 %v3558_v27, %v4342_v39 }
 0x533   :  { %v865_v54 = vadd.f32 %v861_v49, %v857_v0  ;;  %v866_v53 = vadd.f32 %v862_v29, %v858_v52  ;;  %v1170_v33 = vmul.f32 %v4343_v63, %v3558_v27  ;;  %v1171_v8 = vmul.f32 %v4344_v46, %v3558_v27 }
 0x534   :  { %2404 = vtanh.f32 %v561_v30  ;;  %v867_v5 = vadd.f32 %v863_v44, %v859_v60  ;;  %v1172_v15 = vmul.f32 %v4312_v12, %v3558_v27  ;;  %v3574_v11 = vadd.f32 %v556_v51, %v356_v32 }
 0x535   :  { %2406 = vtanh.f32 %v565_v41  ;;  %v869_v20 = vmul.f32 0.5, %v865_v54  ;;  %v873_v43 = vmul.f32 0.5, %v866_v53  ;;  %v1174_v21 = vadd.f32 %v1170_v33, %v2958_v2  ;;  %v3577_v0 = vpop.xlane.xlu1 %1168 }
 0x536   :  { %2408 = vtanh.f32 %v867_v5  ;;  %v1175_v52 = vadd.f32 %v1171_v8, %v3077_v7  ;;  %v1176_v49 = vadd.f32 %v1172_v15, %v2972_v9  ;;  %v1178_v30 = vmul.f32 %v3577_v0, %v4273_v6  ;;  %v4345_v8 = vld [vmem:[#allocation50_spill] sm:$0xff] }
 0x537   :  { %2410 = vtanh.f32 %v869_v20  ;;  %v1179_v51 = vmul.f32 %v3577_v0, %v4274_v25  ;;  %v1180_v32 = vmul.f32 %v3577_v0, %v3086_v56  ;;  %v1487_v60 = vmul.f32 %v3090_v58, %v3577_v0  ;;  %v4346_v56 = vld [vmem:[#allocation49_spill] sm:$0xff] }
 0x538   :  { %2412 = vtanh.f32 %v873_v43  ;;  %v1182_v29 = vadd.f32 %v1178_v30, %v1174_v21  ;;  %v1488_v41 = vmul.f32 %v3211_v57, %v3577_v0  ;;  %v1489_v15 = vmul.f32 %v3094_v59, %v3577_v0  ;;  %v3593_v44 = vpop.xlane.xlu0 %1485  ;;  %v4347_v43 = vld [vmem:[#allocation43_spill] sm:$0xff]  ;;  %v4349_v59 = vld [vmem:[#allocation52_spill] sm:$0xff] }
 0x539   :  { %v1183_v54 = vadd.f32 %v1179_v51, %v1175_v52  ;;  %v1184_v53 = vadd.f32 %v1180_v32, %v1176_v49  ;;  %v1491_v33 = vadd.f32 %v1487_v60, %v3098_v61  ;;  %v1495_v5 = vmul.f32 %v3593_v44, %v4345_v8  ;;  %v4348_v30 = vld [vmem:[#allocation51_spill] sm:$0xff]  ;;  %v4350_v32 = vld [vmem:[#allocation53_spill] sm:$0xff]  ;;  %v4355_v8 = vld [vmem:[#allocation48_spill] sm:$0xff] }
 0x53a   :  { %v1186_v20 = vmul.f32 0.5, %v1182_v29  ;;  %v1492_v58 = vadd.f32 %v1488_v41, %v4346_v56  ;;  %v1493_v21 = vadd.f32 %v1489_v15, %v4347_v43  ;;  %v1496_v57 = vmul.f32 %v3593_v44, %v4348_v30  ;;  %v4357_v56 = vld [vmem:[#allocation21_spill] sm:$0xff] }
 0x53b   :  { %v1190_v25 = vmul.f32 0.5, %v1183_v54  ;;  %2414 = vtanh.f32 %v1184_v53  ;;  %v1497_v6 = vmul.f32 %v3593_v44, %v4349_v59  ;;  %v1499_v52 = vadd.f32 %v1495_v5, %v1491_v33  ;;  %v4352_v5 = vld [vmem:[#allocation47_spill] sm:$0xff] }
 0x53c   :  { %v2403_v49 = vpop.eup %2402  ;;  %2416 = vtanh.f32 %v1186_v20  ;;  %v1500_v51 = vadd.f32 %v1496_v57, %v1492_v58  ;;  %v1816_v60 = vmul.f32 %v4350_v32, %v3593_v44  ;;  %v1817_v29 = vmul.f32 %v3380_v1, %v3593_v44  ;;  %v3608_v41 = vpop.xlane.xlu1 %1808  ;;  %v4353_v57 = vld [vmem:[#allocation46_spill] sm:$0xff]  ;;  %v4354_v1 = vld [vmem:[#allocation56_spill] sm:$0xff] }
 0x53d   :  { %4351 = vst [vmem:[#allocation6_spill] sm:$0xff] %v3608_v41  ;;  %2418 = vtanh.f32 %v1190_v25  ;;  %v1501_v15 = vadd.f32 %v1497_v6, %v1493_v21  ;;  %v1503_v30 = vmul.f32 0.5, %v1499_v52  ;;  %v1818_v54 = vmul.f32 %v4315_v40, %v3593_v44  ;;  %v4356_v25 = vld [vmem:[#allocation63_spill] sm:$0xff] }
 0x53e   :  { %v2405_v53 = vpop.eup %2404  ;;  %v1507_v59 = vmul.f32 0.5, %v1500_v51  ;;  %v1820_v33 = vadd.f32 %v1816_v60, %v4316_v42  ;;  %v1821_v58 = vadd.f32 %v1817_v29, %v4352_v5  ;;  %v1824_v20 = vmul.f32 %v3608_v41, %v4353_v57 }
 0x53f   :  { %v2407_v32 = vpop.eup %2406  ;;  %2420 = vtanh.f32 %v1503_v30  ;;  %v1822_v43 = vadd.f32 %v1818_v54, %v4354_v1  ;;  %v1825_v6 = vmul.f32 %v3608_v41, %v4355_v8  ;;  %v1826_v21 = vmul.f32 %v3608_v41, %v4356_v25 }
 0x540   :  { %v2409_v52 = vpop.eup %2408  ;;  %2422 = vtanh.f32 %v1507_v59  ;;  %v3623_v51 = vmul.f32 %v3608_v41, %v3477_v36  ;;  %v1828_v60 = vadd.f32 %v1824_v20, %v1820_v33  ;;  %v563_v29 = vmul.f32 0.5, %v2405_v53  ;;  %v4358_v41 = vld [vmem:[#allocation33_spill] sm:$0xff] }
 0x541   :  { %v2411_v5 = vpop.eup %2410  ;;  %2424 = vtanh.f32 %v1501_v15  ;;  %v1829_v57 = vadd.f32 %v1825_v6, %v1821_v58  ;;  %v1830_v30 = vadd.f32 %v1826_v21, %v1822_v43  ;;  %v567_v42 = vmul.f32 0.5, %v2407_v32 }
 0x542   :  { %v2413_v54 = vpop.eup %2412  ;;  %v1832_v1 = vmul.f32 0.5, %v1828_v60  ;;  %v564_v40 = vadd.f32 0.5, %v563_v29  ;;  %v570_v8 = vmul.f32 0.5, %v3574_v11  ;;  %v860_v25 = vadd.f32 %v3555_v3, %v4357_v56 }
 0x543   :  { %v1836_v59 = vmul.f32 0.5, %v1829_v57  ;;  %2426 = vtanh.f32 %v1830_v30  ;;  %v568_v61 = vadd.f32 0.5, %v567_v42  ;;  %v864_v33 = vmul.f32 %v3558_v27, %v4358_v41 }
 0x544   :  { %2428 = vtanh.f32 %v1832_v1  ;;  %v575_v53 = vmul.f32 %v2403_v49, %v564_v40  ;;  %v871_v15 = vmul.f32 0.5, %v2411_v5  ;;  %v875_v58 = vmul.f32 0.5, %v2413_v54 }
 0x545   :  { %v2415_v43 = vpop.eup %2414  ;;  %2430 = vtanh.f32 %v1836_v59  ;;  %v574_v32 = vmul.f32 %v568_v61, %v3486_v28  ;;  %v868_v20 = vadd.f32 %v864_v33, %v860_v25  ;;  %v1173_v11 = vmul.f32 %v2997_v10, %v3558_v27 }
 0x546   :  { %v2417_v6 = vpop.eup %2416  ;;  %2432 = vtanh.f32 %v570_v8  ;;  %v872_v3 = vadd.f32 0.5, %v871_v15  ;;  %v876_v57 = vadd.f32 0.5, %v875_v58  ;;  %v1181_v42 = vmul.f32 %v3577_v0, %v3111_v17 }
 0x547   :  { %v2419_v21 = vpop.eup %2418  ;;  %v3635_v1 = vadd.f32 %v575_v53, %v574_v32  ;;  %v878_v40 = vmul.f32 0.5, %v868_v20  ;;  %v1177_v49 = vadd.f32 %v1173_v11, %v3007_v26  ;;  %v1188_v5 = vmul.f32 0.5, %v2417_v6 }
 0x548   :  { %v882_v61 = vmul.f32 %v876_v57, %v3499_v38  ;;  %v883_v28 = vmul.f32 %v2409_v52, %v872_v3  ;;  %v1192_v25 = vmul.f32 0.5, %v2419_v21  ;;  %v1490_v27 = vmul.f32 %v3115_v23, %v3577_v0 }
 0x549   :  { %v2421_v8 = vpop.eup %2420  ;;  %2434 = vtanh.f32 %v3635_v1  ;;  %v1185_v60 = vadd.f32 %v1181_v42, %v1177_v49  ;;  %v1189_v29 = vadd.f32 0.5, %v1188_v5  ;;  %v1498_v30 = vmul.f32 %v3593_v44, %v3243_v48 }
 0x54a   :  { %v2423_v54 = vpop.eup %2422  ;;  %2436 = vtanh.f32 %v878_v40  ;;  %v3644_v59 = vadd.f32 %v883_v28, %v882_v61  ;;  %v1193_v33 = vadd.f32 0.5, %v1192_v25  ;;  %v1494_v38 = vadd.f32 %v1490_v27, %v3119_v24 }
 0x54b   :  { %v2425_v52 = vpop.eup %2424  ;;  %v1195_v53 = vmul.f32 0.5, %v1185_v60  ;;  %v1200_v15 = vmul.f32 %v2415_v43, %v1189_v29  ;;  %v1505_v58 = vmul.f32 0.5, %v2421_v8  ;;  %v1509_v0 = vmul.f32 0.5, %v2423_v54 }
 0x54c   :  { %2438 = vtanh.f32 %v3644_v59  ;;  %v1199_v32 = vmul.f32 %v1193_v33, %v3505_v16  ;;  %v1502_v20 = vadd.f32 %v1498_v30, %v1494_v38  ;;  %v1819_v11 = vmul.f32 %v3255_v62, %v3593_v44 }
 0x54d   :  { %v2427_v6 = vpop.eup %2426  ;;  %2440 = vtanh.f32 %v1195_v53  ;;  %v1506_v3 = vadd.f32 0.5, %v1505_v58  ;;  %v1510_v57 = vadd.f32 0.5, %v1509_v0 }
 0x54e   :  { %v2429_v42 = vpop.eup %2428  ;;  %v3651_v21 = vadd.f32 %v1200_v15, %v1199_v32  ;;  %v1512_v40 = vmul.f32 0.5, %v1502_v20  ;;  %v1823_v43 = vadd.f32 %v1819_v11, %v3301_v55 }
 0x54f   :  { %v2431_v49 = vpop.eup %2430  ;;  %v1834_v5 = vmul.f32 0.5, %v2429_v42  ;;  %v1516_v61 = vmul.f32 %v1510_v57, %v3509_v31  ;;  %v1517_v28 = vmul.f32 %v2425_v52, %v1506_v3 }
 0x550   :  { %v2433_v16 = vpop.eup %2432  ;;  %v1838_v25 = vmul.f32 0.5, %v2431_v49  ;;  %2442 = vtanh.f32 %v3651_v21  ;;  %v1831_v44 = vadd.f32 %v3623_v51, %v1823_v43 }
 0x551   :  { %v1835_v27 = vadd.f32 0.5, %v1834_v5  ;;  %v572_v8 = vmul.f32 0.5, %v2433_v16  ;;  %2444 = vtanh.f32 %v1512_v40  ;;  %v3657_v60 = vadd.f32 %v1517_v28, %v1516_v61 }
 0x552   :  { %v1839_v29 = vadd.f32 0.5, %v1838_v25  ;;  %v1841_v30 = vmul.f32 0.5, %v1831_v44 }
 0x553   :  { %v2435_v54 = vpop.eup %2434  ;;  %v1846_v33 = vmul.f32 %v2427_v6, %v1835_v27  ;;  %v573_v38 = vadd.f32 0.5, %v572_v8  ;;  %2446 = vtanh.f32 %v3657_v60  ;;  %v3670_v27 = vld [vmem:[%s4057_s7 + $0x3] ss:$0 sm:$0xff] }
 0x554   :  { %v2437_v31 = vpop.eup %2436  ;;  %v1845_v52 = vmul.f32 %v1839_v29, %v3514_v4  ;;  %2448 = vtanh.f32 %v1841_v30 }
 0x555   :  { %v578_v53 = vmul.f32 %v2435_v54, %v573_v38  ;;  %v880_v15 = vmul.f32 0.5, %v2437_v31  ;;  %v247_v54 = vadd.f32 %v3531_v45, %v4324_v47  ;;  %v4360_v31 = vld [vmem:[#allocation11_spill] sm:$0xff]  ;;  %v4369_v47 = vld [vmem:[#allocation17_spill] sm:$0xff] }
 0x556   :  { %v2439_v58 = vpop.eup %2438  ;;  %v3661_v51 = vadd.f32 %v1846_v33, %v1845_v52  ;;  %v4359_v33 = vld [vmem:[#allocation57_spill] sm:$0xff]  ;;  %v4361_v52 = vld [vmem:[#allocation44_spill] sm:$0xff] }
 0x557   :  { %v2441_v0 = vpop.eup %2440  ;;  %v579_v32 = vmul.f32 %v4318_v37, %v578_v53  ;;  %v881_v20 = vadd.f32 0.5, %v880_v15  ;;  %v360_v38 = vadd.f32 %v4359_v33, %v4328_v13  ;;  %v249_v53 = vadd.f32 %v4361_v52, %v4360_v31  ;;  %v4362_v15 = vld [vmem:[#allocation9_spill] sm:$0xff]  ;;  %v4370_v13 = vld [vmem:[#allocation19_spill] sm:$0xff] }
 0x558   :  { %v1197_v11 = vmul.f32 0.5, %v2441_v0  ;;  %2450 = vtanh.f32 %v3661_v51  ;;  %v4372_v52 = vld [vmem:[#allocation27_spill] sm:$0xff] }
 0x559   :  { %580 = vadd.xlane.f32.xlu0 %v579_v32  ;;  %v886_v6 = vmul.f32 %v2439_v58, %v881_v20  ;;  %v4363_v58 = vld [vmem:[#allocation58_spill] sm:$0xff]  ;;  %v4364_v20 = vld [vmem:[#allocation12_spill] sm:$0xff] }
 0x55a   :  { %v2443_v3 = vpop.eup %2442  ;;  %v1198_v57 = vadd.f32 0.5, %v1197_v11  ;;  %v362_v0 = vadd.f32 %v4363_v58, %v4362_v15 }
 0x55b   :  { %v2445_v42 = vpop.eup %2444  ;;  %v887_v4 = vmul.f32 %v3520_v14, %v886_v6  ;;  %v4365_v6 = vld [vmem:[#allocation13_spill] sm:$0xff] }
 0x55c   :  { %v1203_v40 = vmul.f32 %v2443_v3, %v1198_v57  ;;  %v1514_v43 = vmul.f32 0.5, %v2445_v42  ;;  %v4366_v57 = vld [vmem:[#allocation15_spill] sm:$0xff]  ;;  %v4367_v42 = vld [vmem:[#allocation14_spill] sm:$0xff] }
 0x55d   :  { %v2447_v49 = vpop.eup %2446  ;;  %888 = vadd.xlane.f32.xlu1 %v887_v4 }
 0x55e   :  { %v2449_v5 = vpop.eup %2448  ;;  %v1204_v61 = vmul.f32 %v3526_v50, %v1203_v40  ;;  %v1515_v28 = vadd.f32 0.5, %v1514_v43  ;;  %v4368_v40 = vld [vmem:[#allocation26_spill] sm:$0xff] }
 0x55f   :  { %v1843_v37 = vmul.f32 0.5, %v2449_v5 }
 0x560   :  { %1205 = vadd.xlane.f32.xlu0 %v1204_v61  ;;  %v1520_v16 = vmul.f32 %v2447_v49, %v1515_v28 }
 0x561   :  { %v1844_v25 = vadd.f32 0.5, %v1843_v37 }
 0x562   :  { %v2451_v44 = vpop.eup %2450  ;;  %v1521_v8 = vmul.f32 %v3670_v27, %v1520_v16 }
 0x563   :  { %v1849_v29 = vmul.f32 %v2451_v44, %v1844_v25 }
 0x564   :  { %1522 = vadd.xlane.f32.xlu1 %v1521_v8 }
 0x565   :  { %v1850_v30 = vmul.f32 %v4320_v19, %v1849_v29 }
 0x567   :  { %1851 = vadd.xlane.f32.xlu0 %v1850_v30  ;;  %v4371_v30 = vld [vmem:[#allocation23_spill] sm:$0xff] }
 0x5e6   :  { %v581_v32 = vpop.xlane.xlu0 %580 }
 0x5e7   :  { %v582_v11 = vmul.f32 %v581_v32, %v4364_v20  ;;  %v583_v3 = vmul.f32 %v581_v32, %v4365_v6  ;;  %v584_v19 = vmul.f32 %v581_v32, %v4366_v57  ;;  %v890_v4 = vmul.f32 %v4367_v42, %v581_v32 }
 0x5e8   :  { %v891_v45 = vmul.f32 %v4368_v40, %v581_v32  ;;  %v892_v43 = vmul.f32 %v4369_v47, %v581_v32  ;;  %v585_v49 = vmul.f32 %v581_v32, %v4370_v13  ;;  %v893_v37 = vmul.f32 %v2882_v35, %v581_v32  ;;  %v4374_v13 = vld [vmem:[#allocation38_spill] sm:$0xff] }
 0x5e9   :  { %v586_v5 = vadd.f32 %v582_v11, %v247_v54  ;;  %v588_v61 = vadd.f32 %v584_v19, %v360_v38  ;;  %v894_v28 = vadd.f32 %v890_v4, %v4303_v34  ;;  %v587_v16 = vadd.f32 %v583_v3, %v249_v53 }
 0x5ea   :  { %v895_v25 = vadd.f32 %v891_v45, %v4304_v22  ;;  %v896_v44 = vadd.f32 %v892_v43, %v4339_v18  ;;  %v3693_v8 = vpop.xlane.xlu1 %888  ;;  %v589_v31 = vadd.f32 %v585_v49, %v362_v0  ;;  %v3710_v0 = vadd.f32 %v893_v37, %v4357_v56  ;;  %v4373_v45 = vld [vmem:[#allocation37_spill] sm:$0xff]  ;;  %v4376_v37 = vld [vmem:[#allocation40_spill] sm:$0xff]  ;;  %v4381_v22 = vld [vmem:[#allocation50_spill] sm:$0xff] }
 0x5eb   :  { %v590_v29 = vmul.f32 0.5, %v586_v5  ;;  %2452 = vtanh.f32 %v588_v61  ;;  %v898_v33 = vmul.f32 %v3693_v8, %v4371_v30  ;;  %v899_v54 = vmul.f32 %v3693_v8, %v4372_v52  ;;  %v4375_v61 = vld [vmem:[#allocation39_spill] sm:$0xff]  ;;  %v4380_v18 = vld [vmem:[#allocation49_spill] sm:$0xff] }
 0x5ec   :  { %v900_v38 = vmul.f32 %v3693_v8, %v4342_v39  ;;  %v1207_v53 = vmul.f32 %v4343_v63, %v3693_v8  ;;  %v1208_v15 = vmul.f32 %v4344_v46, %v3693_v8  ;;  %v1209_v32 = vmul.f32 %v4312_v12, %v3693_v8 }
 0x5ed   :  { %v902_v58 = vadd.f32 %v898_v33, %v894_v28  ;;  %v3707_v20 = vpop.xlane.xlu0 %1205  ;;  %2454 = vtanh.f32 %v590_v29  ;;  %v903_v11 = vadd.f32 %v899_v54, %v895_v25  ;;  %v4377_v33 = vld [vmem:[#allocation34_spill] sm:$0xff] }
 0x5ee   :  { %v904_v6 = vadd.f32 %v900_v38, %v896_v44  ;;  %v1211_v3 = vadd.f32 %v1207_v53, %v2958_v2  ;;  %v1212_v57 = vadd.f32 %v1208_v15, %v3077_v7  ;;  %v1213_v4 = vadd.f32 %v1209_v32, %v2972_v9  ;;  %v4378_v15 = vld [vmem:[#allocation41_spill] sm:$0xff]  ;;  %v4379_v32 = vld [vmem:[#allocation42_spill] sm:$0xff] }
 0x5ef   :  { %v906_v19 = vmul.f32 0.5, %v902_v58  ;;  %v1215_v43 = vmul.f32 %v3707_v20, %v4373_v45  ;;  %v1216_v49 = vmul.f32 %v3707_v20, %v4374_v13  ;;  %v910_v5 = vmul.f32 0.5, %v903_v11  ;;  %v4390_v45 = vld [vmem:[#allocation47_spill] sm:$0xff] }
 0x5f0   :  { %2456 = vtanh.f32 %v904_v6  ;;  %v1217_v28 = vmul.f32 %v3707_v20, %v4375_v61  ;;  %v1524_v25 = vmul.f32 %v4376_v37, %v3707_v20  ;;  %v1525_v54 = vmul.f32 %v4377_v33, %v3707_v20  ;;  %v4389_v61 = vld [vmem:[#allocation55_spill] sm:$0xff] }
 0x5f1   :  { %2458 = vtanh.f32 %v906_v19  ;;  %v1219_v44 = vadd.f32 %v1215_v43, %v1211_v3  ;;  %v1220_v29 = vadd.f32 %v1216_v49, %v1212_v57  ;;  %v3725_v38 = vpop.xlane.xlu1 %1522  ;;  %v1526_v58 = vmul.f32 %v4378_v15, %v3707_v20  ;;  %v4382_v57 = vld [vmem:[#allocation43_spill] sm:$0xff] }
 0x5f2   :  { %2460 = vtanh.f32 %v910_v5  ;;  %v1221_v53 = vadd.f32 %v1217_v28, %v1213_v4  ;;  %v1528_v11 = vadd.f32 %v1524_v25, %v4379_v32  ;;  %v1529_v35 = vadd.f32 %v1525_v54, %v4380_v18  ;;  %v4383_v43 = vld [vmem:[#allocation51_spill] sm:$0xff]  ;;  %v4384_v5 = vld [vmem:[#allocation52_spill] sm:$0xff]  ;;  %v4387_v54 = vld [vmem:[#allocation45_spill] sm:$0xff] }
 0x5f3   :  { %v1223_v6 = vmul.f32 0.5, %v1219_v44  ;;  %v1227_v56 = vmul.f32 0.5, %v1220_v29  ;;  %v1532_v3 = vmul.f32 %v3725_v38, %v4381_v22  ;;  %v1530_v19 = vadd.f32 %v1526_v58, %v4382_v57  ;;  %v4386_v44 = vld [vmem:[#allocation53_spill] sm:$0xff]  ;;  %v4388_v57 = vld [vmem:[#allocation54_spill] sm:$0xff]  ;;  %v4393_v22 = vld [vmem:[#allocation48_spill] sm:$0xff] }
 0x5f4   :  { %2462 = vtanh.f32 %v1221_v53  ;;  %v1533_v49 = vmul.f32 %v3725_v38, %v4383_v43  ;;  %v1534_v4 = vmul.f32 %v3725_v38, %v4384_v5  ;;  %v3738_v28 = vpop.xlane.xlu0 %1851  ;;  %v1859_v29 = vmul.f32 %v4386_v44, %v3725_v38  ;;  %v4392_v5 = vld [vmem:[#allocation56_spill] sm:$0xff] }
 0x5f5   :  { %4385 = vst [vmem:[#allocation59_spill] sm:$0xff] %v3738_v28  ;;  %v2453_v15 = vpop.eup %2452  ;;  %2464 = vtanh.f32 %v1223_v6  ;;  %v1536_v25 = vadd.f32 %v1532_v3, %v1528_v11  ;;  %v1860_v18 = vmul.f32 %v4387_v54, %v3725_v38  ;;  %v594_v53 = vmul.f32 0.5, %v587_v16  ;;  %v4391_v6 = vld [vmem:[#allocation46_spill] sm:$0xff] }
 0x5f6   :  { %2466 = vtanh.f32 %v1227_v56  ;;  %v1537_v58 = vadd.f32 %v1533_v49, %v1529_v35  ;;  %v1861_v32 = vmul.f32 %v4388_v57, %v3725_v38  ;;  %v1863_v13 = vadd.f32 %v1859_v29, %v4389_v61  ;;  %v4394_v35 = vld [vmem:[#allocation63_spill] sm:$0xff] }
 0x5f7   :  { %v2455_v33 = vpop.eup %2454  ;;  %v1540_v37 = vmul.f32 0.5, %v1536_v25  ;;  %v1864_v34 = vadd.f32 %v1860_v18, %v4390_v45  ;;  %v1867_v11 = vmul.f32 %v3738_v28, %v4391_v6  ;;  %v1538_v3 = vadd.f32 %v1534_v4, %v1530_v19 }
 0x5f8   :  { %v1544_v47 = vmul.f32 0.5, %v1537_v58  ;;  %v1865_v43 = vadd.f32 %v1861_v32, %v4392_v5  ;;  %v1868_v56 = vmul.f32 %v3738_v28, %v4393_v22  ;;  %v1869_v16 = vmul.f32 %v3738_v28, %v4394_v35 }
 0x5f9   :  { %2468 = vtanh.f32 %v1540_v37  ;;  %v1871_v49 = vadd.f32 %v1867_v11, %v1863_v13  ;;  %v599_v25 = vmul.f32 0.5, %v589_v31  ;;  %v592_v18 = vmul.f32 0.5, %v2455_v33 }
 0x5fa   :  { %v2457_v57 = vpop.eup %2456  ;;  %2470 = vtanh.f32 %v1544_v47  ;;  %v1872_v29 = vadd.f32 %v1868_v56, %v1864_v34  ;;  %v901_v6 = vmul.f32 %v3693_v8, %v4358_v41  ;;  %v1873_v4 = vadd.f32 %v1869_v16, %v1865_v43 }
 0x5fb   :  { %v2459_v19 = vpop.eup %2458  ;;  %v1875_v58 = vmul.f32 0.5, %v1871_v49  ;;  %2472 = vtanh.f32 %v594_v53  ;;  %v1210_v32 = vmul.f32 %v2997_v10, %v3693_v8  ;;  %v593_v35 = vadd.f32 0.5, %v592_v18 }
 0x5fc   :  { %v2461_v37 = vpop.eup %2460  ;;  %2474 = vtanh.f32 %v1538_v3  ;;  %v1879_v22 = vmul.f32 0.5, %v1872_v29  ;;  %v905_v31 = vadd.f32 %v901_v6, %v3710_v0  ;;  %v908_v47 = vmul.f32 0.5, %v2459_v19 }
 0x5fd   :  { %2476 = vtanh.f32 %v1875_v58  ;;  %v912_v34 = vmul.f32 0.5, %v2461_v37  ;;  %v1214_v13 = vadd.f32 %v1210_v32, %v3007_v26  ;;  %v604_v11 = vmul.f32 %v2453_v15, %v593_v35 }
 0x5fe   :  { %v2463_v33 = vpop.eup %2462  ;;  %2478 = vtanh.f32 %v1879_v22  ;;  %v915_v43 = vmul.f32 0.5, %v905_v31  ;;  %v1218_v53 = vmul.f32 %v3707_v20, %v3111_v17  ;;  %v909_v8 = vadd.f32 0.5, %v908_v47 }
 0x5ff   :  { %v2465_v56 = vpop.eup %2464  ;;  %2480 = vtanh.f32 %v1873_v4  ;;  %v913_v3 = vadd.f32 0.5, %v912_v34  ;;  %v1527_v16 = vmul.f32 %v3115_v23, %v3707_v20  ;;  %v1535_v29 = vmul.f32 %v3725_v38, %v3243_v48 }
 0x600   :  { %v2467_v0 = vpop.eup %2466  ;;  %2482 = vtanh.f32 %v915_v43  ;;  %v1222_v6 = vadd.f32 %v1218_v53, %v1214_v13  ;;  %v1225_v49 = vmul.f32 0.5, %v2465_v56  ;;  %v920_v15 = vmul.f32 %v2457_v57, %v909_v8 }
 0x601   :  { %v919_v22 = vmul.f32 %v913_v3, %v3644_v59  ;;  %v1229_v35 = vmul.f32 0.5, %v2467_v0  ;;  %v1531_v18 = vadd.f32 %v1527_v16, %v3119_v24  ;;  %v1870_v19 = vmul.f32 %v3738_v28, %v3477_v36 }
 0x602   :  { %v1226_v4 = vadd.f32 0.5, %v1225_v49  ;;  %v1232_v58 = vmul.f32 0.5, %v1222_v6  ;;  %v1862_v20 = vmul.f32 %v3255_v62, %v3725_v38  ;;  %2484 = vtanh.f32 %v599_v25 }
 0x603   :  { %v2469_v32 = vpop.eup %2468  ;;  %v3773_v37 = vadd.f32 %v920_v15, %v919_v22  ;;  %v1230_v31 = vadd.f32 0.5, %v1229_v35  ;;  %v1539_v47 = vadd.f32 %v1535_v29, %v1531_v18 }
 0x604   :  { %v2471_v34 = vpop.eup %2470  ;;  %v1237_v59 = vmul.f32 %v2463_v33, %v1226_v4  ;;  %v1542_v57 = vmul.f32 0.5, %v2469_v32  ;;  %v1866_v13 = vadd.f32 %v1862_v20, %v3301_v55 }
 0x605   :  { %v2473_v43 = vpop.eup %2472  ;;  %2486 = vtanh.f32 %v3773_v37  ;;  %v1236_v53 = vmul.f32 %v1230_v31, %v3651_v21  ;;  %v1546_v56 = vmul.f32 0.5, %v2471_v34  ;;  %v1549_v8 = vmul.f32 0.5, %v1539_v47 }
 0x606   :  { %v2475_v3 = vpop.eup %2474  ;;  %v596_v38 = vmul.f32 0.5, %v2473_v43  ;;  %2488 = vtanh.f32 %v1232_v58  ;;  %v1543_v16 = vadd.f32 0.5, %v1542_v57  ;;  %v1874_v0 = vadd.f32 %v1870_v19, %v1866_v13 }
 0x607   :  { %v2477_v6 = vpop.eup %2476  ;;  %v3778_v49 = vadd.f32 %v1237_v59, %v1236_v53  ;;  %v1547_v25 = vadd.f32 0.5, %v1546_v56  ;;  %2490 = vtanh.f32 %v1549_v8 }
 0x608   :  { %v2479_v33 = vpop.eup %2478  ;;  %v1877_v29 = vmul.f32 0.5, %v2477_v6  ;;  %v597_v22 = vadd.f32 0.5, %v596_v38  ;;  %v1554_v15 = vmul.f32 %v2475_v3, %v1543_v16  ;;  %v1884_v35 = vmul.f32 0.5, %v1874_v0 }
 0x609   :  { %v2481_v18 = vpop.eup %2480  ;;  %v1881_v4 = vmul.f32 0.5, %v2479_v33  ;;  %v1553_v21 = vmul.f32 %v1547_v25, %v3657_v60 }
 0x60a   :  { %v2483_v20 = vpop.eup %2482  ;;  %v1878_v32 = vadd.f32 0.5, %v1877_v29  ;;  %v603_v58 = vmul.f32 %v597_v22, %v3635_v1  ;;  %2492 = vtanh.f32 %v1884_v35 }
 0x60b   :  { %v1882_v19 = vadd.f32 0.5, %v1881_v4  ;;  %v917_v31 = vmul.f32 0.5, %v2483_v20  ;;  %v3782_v47 = vadd.f32 %v1554_v15, %v1553_v21  ;;  %2494 = vtanh.f32 %v3778_v49 }
 0x60c   :  { %v1889_v34 = vmul.f32 %v2481_v18, %v1878_v32  ;;  %v605_v59 = vadd.f32 %v604_v11, %v603_v58  ;;  %v2485_v13 = vpop.eup %2484 }
 0x60d   :  { %v1888_v57 = vmul.f32 %v1882_v19, %v3661_v51  ;;  %2496 = vtanh.f32 %v3782_v47  ;;  %v918_v60 = vadd.f32 0.5, %v917_v31  ;;  %v601_v38 = vmul.f32 0.5, %v2485_v13 }
 0x60e   :  { %2498 = vtanh.f32 %v605_v59 }
 0x60f   :  { %v2487_v43 = vpop.eup %2486  ;;  %v3787_v53 = vadd.f32 %v1889_v34, %v1888_v57  ;;  %v602_v33 = vadd.f32 0.5, %v601_v38  ;;  %v3799_v34 = vld [vmem:[%s4057_s7 + $0x4] ss:$0 sm:$0xff] }
 0x610   :  { %v2489_v1 = vpop.eup %2488  ;;  %v923_v56 = vmul.f32 %v2487_v43, %v918_v60 }
 0x611   :  { %v2491_v8 = vpop.eup %2490  ;;  %2500 = vtanh.f32 %v3787_v53  ;;  %v1234_v16 = vmul.f32 0.5, %v2489_v1 }
 0x612   :  { %v924_v3 = vmul.f32 %v3520_v14, %v923_v56  ;;  %v1551_v11 = vmul.f32 0.5, %v2491_v8  ;;  %v2606_v14 = vld [vmem:[%s4057_s7] ss:$0 sm:$0xff] }
 0x613   :  { %v1235_v29 = vadd.f32 0.5, %v1234_v16 }
 0x614   :  { %v2493_v0 = vpop.eup %2492  ;;  %925 = vadd.xlane.f32.xlu0 %v924_v3  ;;  %v1552_v6 = vadd.f32 0.5, %v1551_v11 }
 0x615   :  { %v2495_v51 = vpop.eup %2494  ;;  %v1886_v22 = vmul.f32 0.5, %v2493_v0 }
 0x616   :  { %v1240_v4 = vmul.f32 %v2495_v51, %v1235_v29 }
 0x617   :  { %v2497_v25 = vpop.eup %2496  ;;  %v1887_v58 = vadd.f32 0.5, %v1886_v22 }
 0x618   :  { %v2499_v15 = vpop.eup %2498  ;;  %v1557_v35 = vmul.f32 %v2497_v25, %v1552_v6  ;;  %v1241_v19 = vmul.f32 %v3526_v50, %v1240_v4  ;;  %v4395_v25 = vld [vmem:[#allocation54_spill] sm:$0xff]  ;;  %v4399_v4 = vld [vmem:[#allocation17_spill] sm:$0xff] }
 0x619   :  { %v607_v18 = vmul.f32 %v2499_v15, %v602_v33 }
 0x61a   :  { %v1558_v21 = vmul.f32 %v3670_v27, %v1557_v35  ;;  %v4398_v35 = vld [vmem:[#allocation52_spill] sm:$0xff] }
 0x61b   :  { %v2501_v20 = vpop.eup %2500  ;;  %v608_v32 = vmul.f32 %v2606_v14, %v607_v18 }
 0x61c   :  { %1559 = vadd.xlane.f32.xlu0 %v1558_v21  ;;  %v1892_v31 = vmul.f32 %v2501_v20, %v1887_v58  ;;  %v4400_v20 = vld [vmem:[#allocation16_spill] sm:$0xff] }
 0x61d   :  { %609 = vadd.xlane.f32.xlu1 %v608_v32  ;;  %v4401_v32 = vld [vmem:[#allocation37_spill] sm:$0xff] }
 0x61e   :  { %v1893_v59 = vmul.f32 %v3799_v34, %v1892_v31  ;;  %v4402_v31 = vld [vmem:[#allocation38_spill] sm:$0xff] }
 0x621   :  { %1242 = vadd.xlane.f32.xlu1 %v1241_v19 }
 0x625   :  { %1894 = vadd.xlane.f32.xlu1 %v1893_v59 }
 0x6a1   :  { %v3802_v57 = vpop.xlane.xlu0 %925 }
 0x6a2   :  { %v1244_v13 = vmul.f32 %v4343_v63, %v3802_v57  ;;  %v1245_v60 = vmul.f32 %v4344_v46, %v3802_v57  ;;  %v1246_v50 = vmul.f32 %v4312_v12, %v3802_v57  ;;  %v1247_v56 = vmul.f32 %v2997_v10, %v3802_v57 }
 0x6a3   :  { %v935_v3 = vmul.f32 %v3802_v57, %v4371_v30  ;;  %v936_v38 = vmul.f32 %v3802_v57, %v4372_v52  ;;  %v3823_v16 = vmul.f32 %v3802_v57, %v4342_v39  ;;  %v4396_v52 = vld [vmem:[#allocation50_spill] sm:$0xff]  ;;  %v4397_v39 = vld [vmem:[#allocation51_spill] sm:$0xff] }
 0x6a4   :  { %v1248_v0 = vadd.f32 %v1244_v13, %v2958_v2  ;;  %v1249_v51 = vadd.f32 %v1245_v60, %v3077_v7  ;;  %v4403_v13 = vld [vmem:[#allocation39_spill] sm:$0xff]  ;;  %v4409_v7 = vld [vmem:[#allocation49_spill] sm:$0xff] }
 0x6a9   :  { %v3810_v43 = vpop.xlane.xlu0 %1559 }
 0x6aa   :  { %v610_v1 = vpop.xlane.xlu1 %609  ;;  %v1902_v11 = vmul.f32 %v4386_v44, %v3810_v43  ;;  %v1903_v30 = vmul.f32 %v4387_v54, %v3810_v43  ;;  %v1904_v33 = vmul.f32 %v4395_v25, %v3810_v43  ;;  %v1569_v22 = vmul.f32 %v3810_v43, %v4396_v52  ;;  %v4405_v25 = vld [vmem:[#allocation34_spill] sm:$0xff]  ;;  %v4406_v54 = vld [vmem:[#allocation29_spill] sm:$0xff] }
 0x6ab   :  { %v927_v8 = vmul.f32 %v4367_v42, %v610_v1  ;;  %v928_v6 = vmul.f32 %v4368_v40, %v610_v1  ;;  %v1250_v42 = vadd.f32 %v1246_v50, %v2972_v9  ;;  %v1570_v15 = vmul.f32 %v3810_v43, %v4397_v39  ;;  %v4404_v50 = vld [vmem:[#allocation40_spill] sm:$0xff] }
 0x6ac   :  { %v1571_v18 = vmul.f32 %v3810_v43, %v4398_v35  ;;  %v1251_v40 = vadd.f32 %v1247_v56, %v3007_v26  ;;  %v929_v21 = vmul.f32 %v4399_v4, %v610_v1  ;;  %v1906_v19 = vadd.f32 %v1902_v11, %v4389_v61  ;;  %v4407_v26 = vld [vmem:[#allocation41_spill] sm:$0xff]  ;;  %v4408_v11 = vld [vmem:[#allocation42_spill] sm:$0xff] }
 0x6ad   :  { %v931_v14 = vadd.f32 %v927_v8, %v4400_v20  ;;  %v932_v44 = vadd.f32 %v928_v6, %v4406_v54  ;;  %v1907_v56 = vadd.f32 %v1903_v30, %v4390_v45  ;;  %v1908_v4 = vadd.f32 %v1904_v33, %v4392_v5  ;;  %v4411_v54 = vld [vmem:[#allocation48_spill] sm:$0xff]  ;;  %v4412_v30 = vld [vmem:[#allocation43_spill] sm:$0xff] }
 0x6ae   :  { %v1243_v29 = vpop.xlane.xlu1 %1242 }
 0x6af   :  { %v1252_v58 = vmul.f32 %v1243_v29, %v4401_v32  ;;  %v1253_v59 = vmul.f32 %v1243_v29, %v4402_v31  ;;  %v1254_v60 = vmul.f32 %v1243_v29, %v4403_v13  ;;  %v1561_v28 = vmul.f32 %v4404_v50, %v1243_v29  ;;  %v4410_v13 = vld [vmem:[#allocation46_spill] sm:$0xff] }
 0x6b0   :  { %v1562_v10 = vmul.f32 %v4405_v25, %v1243_v29  ;;  %v1563_v39 = vmul.f32 %v4407_v26, %v1243_v29  ;;  %v940_v45 = vadd.f32 %v936_v38, %v932_v44 }
 0x6b1   :  { %v1256_v35 = vadd.f32 %v1252_v58, %v1248_v0  ;;  %v1257_v8 = vadd.f32 %v1253_v59, %v1249_v51  ;;  %v1258_v20 = vadd.f32 %v1254_v60, %v1250_v42  ;;  %v1565_v61 = vadd.f32 %v1561_v28, %v4408_v11  ;;  %v4413_v59 = vld [vmem:[#allocation63_spill] sm:$0xff] }
 0x6b2   :  { %v3853_v52 = vpop.xlane.xlu1 %1894  ;;  %v1566_v2 = vadd.f32 %v1562_v10, %v4409_v7  ;;  %v1567_v33 = vadd.f32 %v1563_v39, %v4412_v30  ;;  %v1905_v42 = vmul.f32 %v3255_v62, %v3810_v43  ;;  %v939_v58 = vadd.f32 %v935_v3, %v931_v14  ;;  %v4415_v3 = vld [vmem:[#allocation20_spill] sm:$0xff] }
 0x6b3   :  { %v1260_v9 = vmul.f32 0.5, %v1256_v35  ;;  %v1910_v12 = vmul.f32 %v3853_v52, %v4410_v13  ;;  %v1911_v0 = vmul.f32 %v3853_v52, %v4411_v54  ;;  %v1264_v6 = vmul.f32 0.5, %v1257_v8  ;;  %v4414_v13 = vld [vmem:[#allocation18_spill] sm:$0xff] }
 0x6b4   :  { %v1573_v51 = vadd.f32 %v1569_v22, %v1565_v61  ;;  %v1574_v28 = vadd.f32 %v1570_v15, %v1566_v2  ;;  %v1912_v35 = vmul.f32 %v3853_v52, %v4413_v59  ;;  %v1575_v10 = vadd.f32 %v1571_v18, %v1567_v33 }
 0x6b5   :  { %2502 = vtanh.f32 %v1260_v9  ;;  %v1914_v5 = vadd.f32 %v1910_v12, %v1906_v19  ;;  %v1915_v8 = vadd.f32 %v1911_v0, %v1907_v56  ;;  %v930_v39 = vmul.f32 %v4414_v13, %v610_v1 }
 0x6b6   :  { %2504 = vtanh.f32 %v1264_v6  ;;  %v1577_v60 = vmul.f32 0.5, %v1573_v51  ;;  %v1581_v54 = vmul.f32 0.5, %v1574_v28  ;;  %v1255_v22 = vmul.f32 %v1243_v29, %v3111_v17 }
 0x6b7   :  { %2506 = vtanh.f32 %v1258_v20  ;;  %v1918_v61 = vmul.f32 0.5, %v1914_v5  ;;  %v933_v9 = vadd.f32 %v929_v21, %v4415_v3  ;;  %v1916_v2 = vadd.f32 %v1912_v35, %v1908_v4  ;;  %v4416_v5 = vld [vmem:[#allocation21_spill] sm:$0xff] }
 0x6b8   :  { %2508 = vtanh.f32 %v1577_v60  ;;  %v1922_v15 = vmul.f32 0.5, %v1915_v8  ;;  %v943_v14 = vmul.f32 0.5, %v939_v58  ;;  %v1259_v18 = vadd.f32 %v1255_v22, %v1251_v40 }
 0x6b9   :  { %2510 = vtanh.f32 %v1581_v54  ;;  %v1564_v12 = vmul.f32 %v3115_v23, %v1243_v29  ;;  %v947_v44 = vmul.f32 0.5, %v940_v45  ;;  %v1913_v38 = vmul.f32 %v3853_v52, %v3477_v36 }
 0x6ba   :  { %2512 = vtanh.f32 %v1575_v10  ;;  %v1909_v1 = vadd.f32 %v1905_v42, %v3301_v55  ;;  %v934_v19 = vadd.f32 %v930_v39, %v4416_v5  ;;  %v938_v21 = vmul.f32 %v3802_v57, %v4358_v41 }
 0x6bb   :  { %2514 = vtanh.f32 %v1918_v61  ;;  %v1269_v13 = vmul.f32 0.5, %v1259_v18  ;;  %v941_v56 = vadd.f32 %v3823_v16, %v933_v9  ;;  %v1568_v29 = vadd.f32 %v1564_v12, %v3119_v24 }
 0x6bc   :  { %2516 = vtanh.f32 %v1922_v15  ;;  %v1572_v45 = vmul.f32 %v3810_v43, %v3243_v48  ;;  %v1917_v4 = vadd.f32 %v1913_v38, %v1909_v1  ;;  %v942_v54 = vadd.f32 %v938_v21, %v934_v19 }
 0x6bd   :  { %2518 = vtanh.f32 %v1916_v2 }
 0x6be   :  { %2520 = vtanh.f32 %v943_v14  ;;  %v1576_v51 = vadd.f32 %v1572_v45, %v1568_v29  ;;  %v1927_v28 = vmul.f32 0.5, %v1917_v4  ;;  %v952_v10 = vmul.f32 0.5, %v942_v54 }
 0x6bf   :  { %v2503_v40 = vpop.eup %2502  ;;  %2522 = vtanh.f32 %v947_v44 }
 0x6c0   :  { %v2505_v20 = vpop.eup %2504  ;;  %v1262_v0 = vmul.f32 0.5, %v2503_v40  ;;  %2524 = vtanh.f32 %v1269_v13  ;;  %v1586_v2 = vmul.f32 0.5, %v1576_v51 }
 0x6c1   :  { %v2507_v6 = vpop.eup %2506  ;;  %v1266_v33 = vmul.f32 0.5, %v2505_v20  ;;  %2526 = vtanh.f32 %v941_v56 }
 0x6c2   :  { %v2509_v41 = vpop.eup %2508  ;;  %v1263_v57 = vadd.f32 0.5, %v1262_v0  ;;  %2528 = vtanh.f32 %v1927_v28  ;;  %v3895_v28 = vld [vmem:[%s4057_s7 + $0x2] ss:$0 sm:$0xff] }
 0x6c3   :  { %v2511_v16 = vpop.eup %2510  ;;  %v1267_v42 = vadd.f32 0.5, %v1266_v33  ;;  %v1579_v58 = vmul.f32 0.5, %v2509_v41  ;;  %2530 = vtanh.f32 %v952_v10 }
 0x6c4   :  { %v2513_v35 = vpop.eup %2512  ;;  %v1274_v43 = vmul.f32 %v2507_v6, %v1263_v57  ;;  %v1583_v60 = vmul.f32 0.5, %v2511_v16 }
 0x6c5   :  { %v2515_v8 = vpop.eup %2514  ;;  %v1273_v39 = vmul.f32 %v1267_v42, %v3778_v49  ;;  %v1580_v61 = vadd.f32 0.5, %v1579_v58 }
 0x6c6   :  { %v2517_v22 = vpop.eup %2516  ;;  %v1920_v3 = vmul.f32 0.5, %v2515_v8  ;;  %v1584_v9 = vadd.f32 0.5, %v1583_v60 }
 0x6c7   :  { %v2519_v15 = vpop.eup %2518  ;;  %v1924_v14 = vmul.f32 0.5, %v2517_v22  ;;  %v3880_v18 = vadd.f32 %v1274_v43, %v1273_v39  ;;  %v1591_v1 = vmul.f32 %v2513_v35, %v1580_v61 }
 0x6c8   :  { %v2521_v12 = vpop.eup %2520  ;;  %v1921_v44 = vadd.f32 0.5, %v1920_v3  ;;  %v1590_v38 = vmul.f32 %v1584_v9, %v3782_v47 }
 0x6c9   :  { %v2523_v5 = vpop.eup %2522  ;;  %v1925_v19 = vadd.f32 0.5, %v1924_v14  ;;  %v945_v21 = vmul.f32 0.5, %v2521_v12  ;;  %2532 = vtanh.f32 %v3880_v18  ;;  %v2609_v14 = vld [vmem:[%s4057_s7 + $0x1] ss:$0 sm:$0xff] }
 0x6ca   :  { %v1932_v49 = vmul.f32 %v2519_v15, %v1921_v44  ;;  %v949_v13 = vmul.f32 0.5, %v2523_v5  ;;  %2534 = vtanh.f32 %v1586_v2  ;;  %v2525_v56 = vpop.eup %2524  ;;  %v3885_v20 = vadd.f32 %v1591_v1, %v1590_v38 }
 0x6cb   :  { %v1931_v29 = vmul.f32 %v1925_v19, %v3787_v53  ;;  %v946_v45 = vadd.f32 0.5, %v945_v21  ;;  %v2527_v40 = vpop.eup %2526  ;;  %v1271_v6 = vmul.f32 0.5, %v2525_v56 }
 0x6cc   :  { %v950_v4 = vadd.f32 0.5, %v949_v13  ;;  %v2529_v41 = vpop.eup %2528 }
 0x6cd   :  { %v957_v54 = vmul.f32 %v2527_v40, %v946_v45  ;;  %v3887_v0 = vadd.f32 %v1932_v49, %v1931_v29  ;;  %v2531_v57 = vpop.eup %2530  ;;  %v1272_v53 = vadd.f32 0.5, %v1271_v6  ;;  %v1929_v58 = vmul.f32 0.5, %v2529_v41  ;;  %v4417_v45 = vld [vmem:[#allocation24_spill] sm:$0xff]  ;;  %v4419_v41 = vld [vmem:[#allocation25_spill] sm:$0xff] }
 0x6ce   :  { %v956_v47 = vmul.f32 %v950_v4, %v3773_v37  ;;  %v954_v35 = vmul.f32 0.5, %v2531_v57  ;;  %v4418_v4 = vld [vmem:[#allocation39_spill] sm:$0xff]  ;;  %v4420_v57 = vld [vmem:[#allocation36_spill] sm:$0xff] }
 0x6cf   :  { %2536 = vtanh.f32 %v3887_v0  ;;  %v1930_v43 = vadd.f32 0.5, %v1929_v58  ;;  %v4422_v58 = vld [vmem:[#allocation46_spill] sm:$0xff] }
 0x6d0   :  { %v958_v33 = vadd.f32 %v957_v54, %v956_v47  ;;  %2538 = vtanh.f32 %v3885_v20  ;;  %v955_v61 = vadd.f32 0.5, %v954_v35  ;;  %v4423_v35 = vld [vmem:[#allocation48_spill] sm:$0xff] }
 0x6d2   :  { %2540 = vtanh.f32 %v958_v33 }
 0x6d3   :  { %v2533_v51 = vpop.eup %2532 }
 0x6d4   :  { %v2535_v16 = vpop.eup %2534  ;;  %v1277_v42 = vmul.f32 %v2533_v51, %v1272_v53  ;;  %v4421_v51 = vld [vmem:[#allocation28_spill] sm:$0xff] }
 0x6d5   :  { %v1588_v10 = vmul.f32 0.5, %v2535_v16 }
 0x6d6   :  { %v1278_v37 = vmul.f32 %v3895_v28, %v1277_v42 }
 0x6d7   :  { %v1589_v22 = vadd.f32 0.5, %v1588_v10 }
 0x6d8   :  { %1279 = vadd.xlane.f32.xlu1 %v1278_v37 }
 0x6d9   :  { %v2537_v60 = vpop.eup %2536 }
 0x6da   :  { %v2539_v8 = vpop.eup %2538  ;;  %v1935_v39 = vmul.f32 %v2537_v60, %v1930_v43 }
 0x6db   :  { %v1594_v15 = vmul.f32 %v2539_v8, %v1589_v22  ;;  %v4425_v22 = vld [vmem:[#allocation51_spill] sm:$0xff] }
 0x6dc   :  { %v2541_v3 = vpop.eup %2540  ;;  %v1936_v9 = vmul.f32 %v3799_v34, %v1935_v39  ;;  %v4424_v39 = vld [vmem:[#allocation50_spill] sm:$0xff] }
 0x6dd   :  { %v960_v2 = vmul.f32 %v2541_v3, %v955_v61  ;;  %v1595_v44 = vmul.f32 %v3670_v27, %v1594_v15  ;;  %v4427_v15 = vld [vmem:[#allocation53_spill] sm:$0xff] }
 0x6de   :  { %1937 = vadd.xlane.f32.xlu1 %v1936_v9  ;;  %v4426_v9 = vld [vmem:[#allocation52_spill] sm:$0xff] }
 0x6df   :  { %v961_v12 = vmul.f32 %v2609_v14, %v960_v2 }
 0x6e1   :  { %962 = vadd.xlane.f32.xlu0 %v961_v12  ;;  %v4428_v12 = vld [vmem:[#allocation45_spill] sm:$0xff] }
 0x6e5   :  { %1596 = vadd.xlane.f32.xlu0 %v1595_v44 }
 0x765   :  { %v1280_v38 = vpop.xlane.xlu1 %1279 }
 0x766   :  { %v1598_v1 = vmul.f32 %v4404_v50, %v1280_v38  ;;  %v1599_v5 = vmul.f32 %v4405_v25, %v1280_v38  ;;  %v1289_v21 = vmul.f32 %v1280_v38, %v4401_v32  ;;  %v1290_v49 = vmul.f32 %v1280_v38, %v4402_v31 }
 0x767   :  { %v1600_v13 = vmul.f32 %v4407_v26, %v1280_v38  ;;  %v1291_v54 = vmul.f32 %v1280_v38, %v4418_v4  ;;  %v1292_v33 = vmul.f32 %v1280_v38, %v3111_v17  ;;  %v1601_v32 = vmul.f32 %v3115_v23, %v1280_v38  ;;  %v4429_v38 = vld [vmem:[#allocation31_spill] sm:$0xff] }
 0x768   :  { %v1602_v6 = vadd.f32 %v1598_v1, %v4408_v11 }
 0x769   :  { %v1604_v16 = vadd.f32 %v1600_v13, %v4412_v30 }
 0x76b   :  { %v3912_v47 = vpop.xlane.xlu1 %1937 }
 0x76c   :  { %v1953_v37 = vmul.f32 %v3912_v47, %v4422_v58  ;;  %v1954_v10 = vmul.f32 %v3912_v47, %v4423_v35  ;;  %v1955_v17 = vmul.f32 %v3912_v47, %v4413_v59 }
 0x76e   :  { %v963_v19 = vpop.xlane.xlu0 %962 }
 0x76f   :  { %v1281_v56 = vmul.f32 %v4343_v63, %v963_v19  ;;  %v1282_v29 = vmul.f32 %v4344_v46, %v963_v19  ;;  %v1283_v40 = vmul.f32 %v4417_v45, %v963_v19  ;;  %v1603_v46 = vadd.f32 %v1599_v5, %v4409_v7  ;;  %v4431_v45 = vld [vmem:[#allocation55_spill] sm:$0xff] }
 0x770   :  { %v1284_v1 = vmul.f32 %v4429_v38, %v963_v19 }
 0x771   :  { %v1285_v31 = vadd.f32 %v1281_v56, %v4419_v41  ;;  %v1286_v53 = vadd.f32 %v1282_v29, %v4420_v57  ;;  %v1287_v63 = vadd.f32 %v1283_v40, %v4421_v51  ;;  %v4432_v41 = vld [vmem:[#allocation47_spill] sm:$0xff] }
 0x772   :  { %v1597_v42 = vpop.xlane.xlu0 %1596 }
 0x773   :  { %v1293_v43 = vadd.f32 %v1289_v21, %v1285_v31  ;;  %v1294_v60 = vadd.f32 %v1290_v49, %v1286_v53  ;;  %v1295_v8 = vadd.f32 %v1291_v54, %v1287_v63  ;;  %v1606_v61 = vmul.f32 %v1597_v42, %v4424_v39  ;;  %v4430_v21 = vld [vmem:[#allocation54_spill] sm:$0xff]  ;;  %v4433_v53 = vld [vmem:[#allocation56_spill] sm:$0xff] }
 0x774   :  { %v1607_v3 = vmul.f32 %v1597_v42, %v4425_v22  ;;  %v1608_v2 = vmul.f32 %v1597_v42, %v4426_v9  ;;  %v1945_v14 = vmul.f32 %v4427_v15, %v1597_v42  ;;  %v1946_v44 = vmul.f32 %v4428_v12, %v1597_v42 }
 0x775   :  { %v1297_v5 = vmul.f32 0.5, %v1293_v43  ;;  %2542 = vtanh.f32 %v1295_v8  ;;  %v1610_v13 = vadd.f32 %v1606_v61, %v1602_v6  ;;  %v1947_v49 = vmul.f32 %v4430_v21, %v1597_v42 }
 0x776   :  { %v1611_v56 = vadd.f32 %v1607_v3, %v1603_v46  ;;  %v1612_v29 = vadd.f32 %v1608_v2, %v1604_v16  ;;  %v1949_v40 = vadd.f32 %v1945_v14, %v4431_v45  ;;  %v1301_v4 = vmul.f32 0.5, %v1294_v60  ;;  %v4434_v16 = vld [vmem:[#allocation32_spill] sm:$0xff] }
 0x777   :  { %v1614_v54 = vmul.f32 0.5, %v1610_v13  ;;  %v1950_v31 = vadd.f32 %v1946_v44, %v4432_v41  ;;  %2544 = vtanh.f32 %v1297_v5  ;;  %v1951_v51 = vadd.f32 %v1947_v49, %v4433_v53 }
 0x778   :  { %v1618_v57 = vmul.f32 0.5, %v1611_v56  ;;  %2546 = vtanh.f32 %v1612_v29  ;;  %v1957_v63 = vadd.f32 %v1953_v37, %v1949_v40  ;;  %v1605_v6 = vadd.f32 %v1601_v32, %v3119_v24 }
 0x779   :  { %2548 = vtanh.f32 %v1614_v54  ;;  %v1958_v19 = vadd.f32 %v1954_v10, %v1950_v31  ;;  %v1609_v46 = vmul.f32 %v1597_v42, %v3243_v48  ;;  %v1288_v43 = vadd.f32 %v1284_v1, %v4434_v16 }
 0x77a   :  { %2550 = vtanh.f32 %v1618_v57  ;;  %v1961_v8 = vmul.f32 0.5, %v1957_v63  ;;  %v1948_v60 = vmul.f32 %v3255_v62, %v1597_v42  ;;  %v1956_v61 = vmul.f32 %v3912_v47, %v3477_v36 }
 0x77b   :  { %v1965_v3 = vmul.f32 0.5, %v1958_v19  ;;  %2552 = vtanh.f32 %v1301_v4  ;;  %v1959_v2 = vadd.f32 %v1955_v17, %v1951_v51  ;;  %v1613_v10 = vadd.f32 %v1609_v46, %v1605_v6 }
 0x77c   :  { %2554 = vtanh.f32 %v1961_v8  ;;  %v1952_v37 = vadd.f32 %v1948_v60, %v3301_v55  ;;  %v1296_v32 = vadd.f32 %v1292_v33, %v1288_v43 }
 0x77d   :  { %2556 = vtanh.f32 %v1965_v3  ;;  %v1623_v1 = vmul.f32 0.5, %v1613_v10 }
 0x77e   :  { %v1960_v44 = vadd.f32 %v1956_v61, %v1952_v37  ;;  %2558 = vtanh.f32 %v1959_v2  ;;  %v1306_v42 = vmul.f32 0.5, %v1296_v32 }
 0x77f   :  { %v2543_v14 = vpop.eup %2542  ;;  %2560 = vtanh.f32 %v1623_v1 }
 0x780   :  { %v1970_v29 = vmul.f32 0.5, %v1960_v44  ;;  %2562 = vtanh.f32 %v1306_v42 }
 0x781   :  { %v2545_v38 = vpop.eup %2544 }
 0x782   :  { %v2547_v5 = vpop.eup %2546  ;;  %v1299_v13 = vmul.f32 0.5, %v2545_v38  ;;  %2564 = vtanh.f32 %v1970_v29 }
 0x783   :  { %v2549_v56 = vpop.eup %2548 }
 0x784   :  { %v2551_v49 = vpop.eup %2550  ;;  %v1300_v40 = vadd.f32 0.5, %v1299_v13  ;;  %v1616_v4 = vmul.f32 0.5, %v2549_v56 }
 0x785   :  { %v2553_v17 = vpop.eup %2552  ;;  %v1620_v54 = vmul.f32 0.5, %v2551_v49 }
 0x786   :  { %v2555_v31 = vpop.eup %2554  ;;  %v1303_v57 = vmul.f32 0.5, %v2553_v17  ;;  %v1617_v33 = vadd.f32 0.5, %v1616_v4  ;;  %v1311_v16 = vmul.f32 %v2543_v14, %v1300_v40 }
 0x787   :  { %v2557_v51 = vpop.eup %2556  ;;  %v1963_v63 = vmul.f32 0.5, %v2555_v31  ;;  %v1621_v19 = vadd.f32 0.5, %v1620_v54 }
 0x788   :  { %v1967_v6 = vmul.f32 0.5, %v2557_v51  ;;  %v1304_v46 = vadd.f32 0.5, %v1303_v57  ;;  %v1628_v43 = vmul.f32 %v2547_v5, %v1617_v33  ;;  %v2559_v61 = vpop.eup %2558 }
 0x789   :  { %v1964_v8 = vadd.f32 0.5, %v1963_v63  ;;  %v1627_v60 = vmul.f32 %v1621_v19, %v3885_v20  ;;  %v2561_v14 = vpop.eup %2560 }
 0x78a   :  { %v1968_v3 = vadd.f32 0.5, %v1967_v6  ;;  %v1310_v2 = vmul.f32 %v1304_v46, %v3880_v18  ;;  %v2563_v1 = vpop.eup %2562  ;;  %v1625_v5 = vmul.f32 0.5, %v2561_v14 }
 0x78b   :  { %v1975_v37 = vmul.f32 %v2559_v61, %v1964_v8  ;;  %v3947_v10 = vadd.f32 %v1628_v43, %v1627_v60  ;;  %v1308_v13 = vmul.f32 0.5, %v2563_v1 }
 0x78c   :  { %v1974_v32 = vmul.f32 %v1968_v3, %v3887_v0  ;;  %v1312_v44 = vadd.f32 %v1311_v16, %v1310_v2  ;;  %v2565_v20 = vpop.eup %2564  ;;  %v1626_v18 = vadd.f32 0.5, %v1625_v5 }
 0x78d   :  { %2566 = vtanh.f32 %v3947_v10  ;;  %v1972_v42 = vmul.f32 0.5, %v2565_v20  ;;  %v1309_v29 = vadd.f32 0.5, %v1308_v13 }
 0x78e   :  { %2568 = vtanh.f32 %v1312_v44  ;;  %v3951_v38 = vadd.f32 %v1975_v37, %v1974_v32 }
 0x78f   :  { %v1973_v4 = vadd.f32 0.5, %v1972_v42 }
 0x790   :  { %2570 = vtanh.f32 %v3951_v38 }
 0x797   :  { %v2567_v56 = vpop.eup %2566 }
 0x798   :  { %v2569_v49 = vpop.eup %2568  ;;  %v1631_v40 = vmul.f32 %v2567_v56, %v1626_v18 }
 0x799   :  { %v1314_v0 = vmul.f32 %v2569_v49, %v1309_v29 }
 0x79a   :  { %v2571_v17 = vpop.eup %2570  ;;  %v1632_v54 = vmul.f32 %v3670_v27, %v1631_v40 }
 0x79b   :  { %v1315_v31 = vmul.f32 %v3895_v28, %v1314_v0  ;;  %v1978_v57 = vmul.f32 %v2571_v17, %v1973_v4 }
 0x79c   :  { %1633 = vadd.xlane.f32.xlu1 %v1632_v54 }
 0x79d   :  { %1316 = vadd.xlane.f32.xlu0 %v1315_v31  ;;  %v1979_v33 = vmul.f32 %v3799_v34, %v1978_v57 }
 0x7a1   :  { %1980 = vadd.xlane.f32.xlu0 %v1979_v33 }
 0x829   :  { %v1634_v51 = vpop.xlane.xlu1 %1633 }
 0x82a   :  { %v1317_v63 = vpop.xlane.xlu0 %1316  ;;  %v1988_v19 = vmul.f32 %v4427_v15, %v1634_v51  ;;  %v1643_v16 = vmul.f32 %v1634_v51, %v4424_v39  ;;  %v1644_v27 = vmul.f32 %v1634_v51, %v4425_v22  ;;  %v1989_v43 = vmul.f32 %v4428_v12, %v1634_v51 }
 0x82b   :  { %v1635_v6 = vmul.f32 %v4404_v50, %v1317_v63  ;;  %v1636_v46 = vmul.f32 %v4405_v25, %v1317_v63  ;;  %v1637_v28 = vmul.f32 %v4407_v26, %v1317_v63  ;;  %v1990_v8 = vmul.f32 %v4430_v21, %v1634_v51 }
 0x82c   :  { %v1992_v3 = vadd.f32 %v1988_v19, %v4431_v45  ;;  %v1993_v25 = vadd.f32 %v1989_v43, %v4432_v41  ;;  %v1645_v37 = vmul.f32 %v1634_v51, %v4426_v9  ;;  %v1991_v1 = vmul.f32 %v3255_v62, %v1634_v51 }
 0x82d   :  { %v1639_v60 = vadd.f32 %v1635_v6, %v4408_v11  ;;  %v1640_v61 = vadd.f32 %v1636_v46, %v4409_v7  ;;  %v1641_v26 = vadd.f32 %v1637_v28, %v4412_v30  ;;  %v1994_v32 = vadd.f32 %v1990_v8, %v4433_v53 }
 0x82e   :  { %v3968_v2 = vpop.xlane.xlu0 %1980  ;;  %v1638_v20 = vmul.f32 %v3115_v23, %v1317_v63  ;;  %v1995_v29 = vadd.f32 %v1991_v1, %v3301_v55  ;;  %v1646_v40 = vmul.f32 %v1634_v51, %v3243_v48 }
 0x82f   :  { %v1647_v50 = vadd.f32 %v1643_v16, %v1639_v60  ;;  %v1648_v39 = vadd.f32 %v1644_v27, %v1640_v61  ;;  %v1996_v22 = vmul.f32 %v3968_v2, %v4422_v58  ;;  %v1997_v7 = vmul.f32 %v3968_v2, %v4423_v35 }
 0x830   :  { %v1998_v44 = vmul.f32 %v3968_v2, %v4413_v59  ;;  %v1649_v30 = vadd.f32 %v1645_v37, %v1641_v26  ;;  %v1999_v18 = vmul.f32 %v3968_v2, %v3477_v36  ;;  %v1642_v49 = vadd.f32 %v1638_v20, %v3119_v24 }
 0x831   :  { %v1651_v11 = vmul.f32 0.5, %v1647_v50  ;;  %v2000_v14 = vadd.f32 %v1996_v22, %v1992_v3  ;;  %v2001_v5 = vadd.f32 %v1997_v7, %v1993_v25  ;;  %v1655_v13 = vmul.f32 0.5, %v1648_v39 }
 0x832   :  { %v2002_v56 = vadd.f32 %v1998_v44, %v1994_v32  ;;  %v2003_v23 = vadd.f32 %v1999_v18, %v1995_v29  ;;  %v1650_v0 = vadd.f32 %v1646_v40, %v1642_v49  ;;  %v2612_v20 = vmov 1  }
 0x833   :  { %v2004_v42 = vmul.f32 0.5, %v2000_v14  ;;  %2572 = vtanh.f32 %v1651_v11  ;;  %v2008_v9 = vmul.f32 0.5, %v2001_v5  ;;  %2210 = vset.pattern.permute.xlu1 %v2612_v20  ;;  %v2074_v5 = vld [vmem:[%s4060_s1] sm:$0xff] }
 0x834   :  { %v2013_v17 = vmul.f32 0.5, %v2003_v23  ;;  %v1660_v31 = vmul.f32 0.5, %v1650_v0 }
 0x835   :  { %2574 = vtanh.f32 %v2004_v42 }
 0x836   :  { %2576 = vtanh.f32 %v2008_v9 }
 0x837   :  { %2578 = vtanh.f32 %v1655_v13  ;;  %v2613_v13 = vmov 0  }
 0x838   :  { %2580 = vtanh.f32 %v1649_v30  ;;  %2209 = vset.pattern.permute.xlu0 %v2613_v13 }
 0x839   :  { %2582 = vtanh.f32 %v2002_v56 }
 0x83a   :  { %2584 = vtanh.f32 %v2013_v17 }
 0x83b   :  { %2586 = vtanh.f32 %v1660_v31 }
 0x83d   :  { %v2573_v4 = vpop.eup %2572 }
 0x83e   :  { %v1653_v54 = vmul.f32 0.5, %v2573_v4 }
 0x83f   :  { %v2575_v57 = vpop.eup %2574 }
 0x840   :  { %v2577_v33 = vpop.eup %2576  ;;  %v2006_v63 = vmul.f32 0.5, %v2575_v57  ;;  %v1654_v19 = vadd.f32 0.5, %v1653_v54 }
 0x841   :  { %v2579_v6 = vpop.eup %2578  ;;  %v2010_v46 = vmul.f32 0.5, %v2577_v33 }
 0x842   :  { %v2581_v24 = vpop.eup %2580  ;;  %v2007_v16 = vadd.f32 0.5, %v2006_v63  ;;  %v1657_v27 = vmul.f32 0.5, %v2579_v6 }
 0x843   :  { %v2583_v48 = vpop.eup %2582  ;;  %v2011_v51 = vadd.f32 0.5, %v2010_v46  ;;  %v1665_v8 = vmul.f32 %v2581_v24, %v1654_v19 }
 0x844   :  { %v2018_v28 = vmul.f32 %v2583_v48, %v2007_v16  ;;  %v1658_v43 = vadd.f32 0.5, %v1657_v27  ;;  %v2585_v50 = vpop.eup %2584 }
 0x845   :  { %v2017_v60 = vmul.f32 %v2011_v51, %v3951_v38  ;;  %v2587_v39 = vpop.eup %2586  ;;  %v2015_v22 = vmul.f32 0.5, %v2585_v50 }
 0x846   :  { %v1664_v61 = vmul.f32 %v1658_v43, %v3947_v10  ;;  %v1662_v26 = vmul.f32 0.5, %v2587_v39  ;;  %v2610_v10 = vld [vmem:[%s4057_s7 + $0x3] ss:$0 sm:$0xff]  ;;  %v17_v43 = vstv %s4062_s11 }
 0x847   :  { %v2019_v3 = vadd.f32 %v2018_v28, %v2017_v60  ;;  %v2016_v37 = vadd.f32 0.5, %v2015_v22  ;;  %v2075_v28 = vld [vmem:[%s4061_s2] sm:$0xff]  ;;  %18 = vst [vmem:[#allocation2] sm:$0x1] %v17_v43 }
 0x848   :  { %v1666_v25 = vadd.f32 %v1665_v8, %v1664_v61  ;;  %v1663_v7 = vadd.f32 0.5, %v1662_v26  ;;  %v364_v8 = vld [vmem:[%s4063_s8] sm:$0xff] }
 0x849   :  { %2588 = vtanh.f32 %v2019_v3  ;;  %v4435_v60 = vld [vmem:[#allocation10_spill] sm:$0xff]  ;;  %v4438_v39 = vld [vmem:[#allocation3_spill] sm:$0xff] }
 0x84a   :  { %2590 = vtanh.f32 %v1666_v25  ;;  %v1813_v61 = vrot.slane %v364_v8, %v4435_v60  ;;  %v1941_v22 = vsub.s32 4, %v4438_v39  ;;  %v4439_v26 = vld [vmem:[#allocation6_spill] sm:$0xff]  ;;  %v2027_v20 = vsub.s32 6, %v4438_v39 }
 0x853   :  { %v2589_v32 = vpop.eup %2588 }
 0x854   :  { %v2591_v11 = vpop.eup %2590  ;;  %v2021_v44 = vmul.f32 %v2589_v32, %v2016_v37  ;;  %v1814_v37 = vmul.f32 %v1813_v61, %v4439_v26  ;;  %v4440_v32 = vld [vmem:[#allocation7_spill] sm:$0xff] }
 0x855   :  { %v1668_v14 = vmul.f32 %v2591_v11, %v1663_v7  ;;  %v1899_v7 = vrot.slane %v364_v8, %v4440_v32  ;;  %v1984_v11 = vsub.s32 5, %v4438_v39 }
 0x856   :  { %v2022_v1 = vmul.f32 %v3799_v34, %v2021_v44  ;;  %v4441_v44 = vld [vmem:[#allocation64_spill] sm:$0xff] }
 0x857   :  { %v1669_v38 = vmul.f32 %v2610_v10, %v1668_v14 }
 0x858   :  { %2023 = vadd.xlane.f32.xlu0 %v2022_v1  ;;  %v4442_v1 = vld [vmem:[#allocation59_spill] sm:$0xff] }
 0x859   :  { %1670 = vadd.xlane.f32.xlu1 %v1669_v38  ;;  %v1942_v38 = vrot.slane %v364_v8, %v1941_v22 }
 0x86a   :  { %2088 = vperm.xlu1 %2210, %v2074_v5  }
 0x86e   :  { %2211 = vset.pattern.permute.xlu1 %v2613_v13  ;;  %2078 = vperm.xlu0 %2209, %v2074_v5   ;;  %v1900_v13 = vmul.f32 %v1899_v7, %v3853_v52 }
 0x8e5   :  { %v3996_v42 = vpop.xlane.xlu0 %2023 }
 0x8e6   :  { %v1671_v30 = vpop.xlane.xlu1 %1670  ;;  %v2039_v9 = vmul.f32 %v3996_v42, %v4422_v58  ;;  %v2040_v49 = vmul.f32 %v3996_v42, %v4423_v35  ;;  %v2041_v0 = vmul.f32 %v3996_v42, %v4413_v59  ;;  %v2042_v35 = vmul.f32 %v3996_v42, %v3477_v36 }
 0x8e7   :  { %v2031_v18 = vmul.f32 %v4427_v15, %v1671_v30  ;;  %v2032_v56 = vmul.f32 %v4428_v12, %v1671_v30  ;;  %v2033_v29 = vmul.f32 %v4430_v21, %v1671_v30  ;;  %v2034_v4 = vmul.f32 %v3255_v62, %v1671_v30 }
 0x8e8   :  { %v1985_v30 = vrot.slane %v364_v8, %v1984_v11 }
 0x8e9   :  { %v2035_v40 = vadd.f32 %v2031_v18, %v4431_v45  ;;  %v2036_v23 = vadd.f32 %v2032_v56, %v4432_v41  ;;  %v2037_v58 = vadd.f32 %v2033_v29, %v4433_v53  ;;  %v2038_v21 = vadd.f32 %v2034_v4, %v3301_v55 }
 0x8ea   :  { %v1943_v18 = vmul.f32 %v1942_v38, %v3912_v47  ;;  %v2028_v56 = vrot.slane %v364_v8, %v2027_v20  ;;  %v2070_v29 = vsub.s32 7, %v4438_v39 }
 0x8eb   :  { %v2043_v17 = vadd.f32 %v2039_v9, %v2035_v40  ;;  %v2044_v15 = vadd.f32 %v2040_v49, %v2036_v23  ;;  %v2045_v31 = vadd.f32 %v2041_v0, %v2037_v58  ;;  %v2046_v45 = vadd.f32 %v2042_v35, %v2038_v21  ;;  %v365_v23 = vld [vmem:[%s4063_s8 + $0x8] sm:$0x7]  ;;  %v2089_v0 = vpop.permute.xlu1 %2088 }
 0x8ec   :  { %v1986_v40 = vmul.f32 %v1985_v30, %v3968_v2  ;;  %v2029_v58 = vmul.f32 %v2028_v56, %v3996_v42  ;;  %v2094_v47 = vrot.slane %v365_v23, %v4435_v60  ;;  %v2179_v42 = vld [vmem:[%s4064_s9] ss:$0 sm:$0xff] }
 0x8ed   :  { %v2047_v54 = vmul.f32 0.5, %v2043_v17  ;;  %v2051_v12 = vmul.f32 0.5, %v2044_v15  ;;  %v2056_v41 = vmul.f32 0.5, %v2046_v45  ;;  %v2071_v17 = vrot.slane %v364_v8, %v2070_v29  ;;  %v2079_v15 = vpop.permute.xlu0 %2078 }
 0x8ef   :  { %2592 = vtanh.f32 %v2047_v54 }
 0x8f0   :  { %2594 = vtanh.f32 %v2051_v12 }
 0x8f1   :  { %2596 = vtanh.f32 %v2045_v31 }
 0x8f2   :  { %2598 = vtanh.f32 %v2056_v41 }
 0x8f9   :  { %v2593_v59 = vpop.eup %2592 }
 0x8fa   :  { %v2595_v57 = vpop.eup %2594  ;;  %v2049_v62 = vmul.f32 0.5, %v2593_v59  ;;  %v2095_v59 = vmul.f32 %v2094_v47, %v2089_v0 }
 0x8fb   :  { %v2053_v33 = vmul.f32 0.5, %v2595_v57  ;;  %v2597_v63 = vpop.eup %2596 }
 0x8fc   :  { %v2050_v53 = vadd.f32 0.5, %v2049_v62  ;;  %v2599_v24 = vpop.eup %2598 }
 0x8fd   :  { %v2054_v19 = vadd.f32 0.5, %v2053_v33  ;;  %v2058_v36 = vmul.f32 0.5, %v2599_v24  ;;  %v2181_v24 = vld [vmem:[#allocation2] ss:$0 sm:$0xff] }
 0x8fe   :  { %v2061_v6 = vmul.f32 %v2597_v63, %v2050_v53 }
 0x8ff   :  { %v2060_v46 = vmul.f32 %v2054_v19, %v2019_v3  ;;  %v2059_v16 = vadd.f32 0.5, %v2058_v36  ;;  %v4436_v3 = vld [vmem:[#allocation4_spill] sm:$0xff]  ;;  %v2180_v19 = vld [vmem:[%s4065_s10] ss:$0 sm:$0xff] }
 0x900   :  { %v1749_v25 = vrot.slane %v364_v8, %v4436_v3  ;;  %v2084_v52 = vrot.slane %v365_v23, %v4436_v3 }
 0x901   :  { %v2062_v55 = vadd.f32 %v2061_v6, %v2060_v46 }
 0x902   :  { %v1750_v14 = vmul.f32 %v1749_v25, %v4441_v44  ;;  %v2085_v31 = vmul.f32 %v2084_v52, %v2079_v15 }
 0x903   :  { %2600 = vtanh.f32 %v2062_v55 }
 0x904   :  { %v1815_v5 = vadd.f32 %v1814_v37, %v1750_v14 }
 0x90d   :  { %v2601_v27 = vpop.eup %2600 }
 0x90e   :  { %v2064_v48 = vmul.f32 %v2601_v27, %v2059_v16 }
 0x910   :  { %v2065_v51 = vmul.f32 %v3799_v34, %v2064_v48  ;;  %v4437_v34 = vld [vmem:[#allocation5_spill] sm:$0xff] }
 0x911   :  { %v1856_v50 = vrot.slane %v364_v8, %v4437_v34  ;;  %v2105_v2 = vrot.slane %v365_v23, %v4437_v34 }
 0x912   :  { %2066 = vadd.xlane.f32.xlu1 %v2065_v51 }
 0x913   :  { %v1857_v10 = vmul.f32 %v1856_v50, %v4442_v1 }
 0x915   :  { %v1858_v9 = vadd.f32 %v1857_v10, %v1815_v5 }
 0x917   :  { %v1901_v49 = vadd.f32 %v1900_v13, %v1858_v9 }
 0x919   :  { %v1944_v4 = vadd.f32 %v1943_v18, %v1901_v49 }
 0x91b   :  { %v1987_v54 = vadd.f32 %v1986_v40, %v1944_v4 }
 0x91d   :  { %v2030_v21 = vadd.f32 %v2029_v58, %v1987_v54 }
 0x923   :  { %2099 = vperm.xlu1 %2211, %v2075_v28  }
 0x99f   :  { %v2067_v12 = vpop.xlane.xlu1 %2066 }
 0x9a0   :  { %v2072_v35 = vmul.f32 %v2071_v17, %v2067_v12 }
 0x9a2   :  { %v2073_v45 = vadd.f32 %v2072_v35, %v2030_v21 }
 0x9a3   :  { %v2100_v41 = vpop.permute.xlu1 %2099 }
 0x9a4   :  { %v2086_v57 = vadd.f32 %v2085_v31, %v2073_v45  ;;  %v2106_v62 = vmul.f32 %v2105_v2, %v2100_v41 }
 0x9a6   :  { %v2096_v33 = vadd.f32 %v2095_v59, %v2086_v57 }
 0x9a8   :  { %v2107_v53 = vadd.f32 %v2106_v62, %v2096_v33 }
 0x9aa   :  { %v2115_v63 = vadd.f32 %v2179_v42, %v2107_v53 }
 0x9ac   :  { %v2116_v6 = vmax.f32 %v2115_v63, 0.0 }
 0x9ae   :  { %v2124_v46 = vmul.f32 %v2180_v19, %v2116_v6 }
 0x9b0   :  { %v2126_v55 = vsel %vm2125_vm2, %v2124_v46, 0.0 }
 0x9b1   :  { %2127 = vadd.xlane.f32.xlu1 %v2126_v55 }
 0xa3e   :  { %v2128_v36 = vpop.xlane.xlu1 %2127 }
 0xa3f   :  { %v2136_v16 = vadd.f32 %v2181_v24, %v2128_v36 }
 0xa41   :  { %2138 = vst.msk [vmem:[%s4066_s12] sm:$0xff] %vm2137_vm3, %v2136_v16 }

</bundles_post_ra>
